<compile_context>
chip_gen: v7x
topology: tpu7x:2x2x1
jax: 0.10.0
libtpu: 0.0.40
codegen_flags: <defaults>
</compile_context>

<pallas_src>
import functools

import jax
import jax.numpy as jnp
from jax import lax
from jax.experimental import pallas as pl
from jax.experimental.pallas import tpu as pltpu


def _mae2d_stage1_kernel(x_ref, w1_ref, b1_ref, w2_ref, b2_ref,
                         wd1_ref, bd1_ref, wd2_ref, bd2_ref,
                         o_ref,
                         f1_ref, c1_ref, f2_ref, c2_ref, p3_ref,
                         *, H1, W1, C0, C1, C2, Cout):
    f32 = jnp.float32
    Wp1 = W1 + 2
    M1 = H1 * Wp1                      # wide conv1 output (2 junk cols per row)
    H2, W2 = H1 // 2, W1 // 2
    Wp2 = W2 + 2
    M2 = H2 * Wp2                      # wide conv2 output
    H3, W3 = H2 // 2, W2 // 2
    P3 = H3 * W3

    taps = [(dy, dx) for dy in range(3) for dx in range(3)]

    # --- Stage 0: zero-pad the image into a flat row-major VMEM buffer. ----
    # f1_ref holds the zero-padded (H1+2, Wp1) plane flattened plus one guard
    # row so every shifted tap slice stays in bounds. Re-zeroed every step
    # (tiny buffer; required for correctness under "parallel" semantics).
    f1_ref[...] = jnp.zeros_like(f1_ref)
    for y in range(H1):
        f1_ref[pl.ds((y + 1) * Wp1 + 1, W1), :] = x_ref[0, pl.ds(y * W1, W1), :]

    # --- Stage 1: conv1 3x3 (C0->C1), pad=1, + ReLU: 9 MXU matmuls. --------
    # Wide-output trick: out_flat[p] = sum_t f1_flat[p + dy*Wp1 + dx] @ W1[t];
    # only the first W1 columns of each Wp1-wide row are valid outputs.
    acc1 = jnp.zeros((M1, C1), f32)
    for t, (dy, dx) in enumerate(taps):
        lhs = f1_ref[pl.ds(dy * Wp1 + dx, M1), :]                    # (M1, C0)
        acc1 = acc1 + jnp.dot(lhs, w1_ref[t], preferred_element_type=f32)
    c1_ref[...] = jnp.maximum(acc1 + b1_ref[...], 0.0)               # (M1, C1)

    # --- Stage 2: maxpool 2x2/2, write zero-padded input for conv2. --------
    f2_ref[...] = jnp.zeros_like(f2_ref)
    for yo in range(H2):
        r0 = (2 * yo) * Wp1
        r1 = (2 * yo + 1) * Wp1
        e00 = c1_ref[pl.ds(r0 + 0, W2, stride=2), :]
        e01 = c1_ref[pl.ds(r0 + 1, W2, stride=2), :]
        e10 = c1_ref[pl.ds(r1 + 0, W2, stride=2), :]
        e11 = c1_ref[pl.ds(r1 + 1, W2, stride=2), :]
        pooled = jnp.maximum(jnp.maximum(e00, e01), jnp.maximum(e10, e11))
        f2_ref[pl.ds((yo + 1) * Wp2 + 1, W2), :] = pooled             # (W2, C1)

    # --- Stage 3: conv2 3x3 (C1->C2), pad=1, + ReLU: 9 MXU matmuls. --------
    acc2 = jnp.zeros((M2, C2), f32)
    for t, (dy, dx) in enumerate(taps):
        lhs = f2_ref[pl.ds(dy * Wp2 + dx, M2), :]                    # (M2, C1)
        acc2 = acc2 + jnp.dot(lhs, w2_ref[t], preferred_element_type=f32)
    c2_ref[...] = jnp.maximum(acc2 + b2_ref[...], 0.0)               # (M2, C2)

    # --- Stage 4: maxpool 2x2/2 -> pixel-major encoder output (P3, C2). ----
    for yo in range(H3):
        r0 = (2 * yo) * Wp2
        r1 = (2 * yo + 1) * Wp2
        e00 = c2_ref[pl.ds(r0 + 0, W3, stride=2), :]
        e01 = c2_ref[pl.ds(r0 + 1, W3, stride=2), :]
        e10 = c2_ref[pl.ds(r1 + 0, W3, stride=2), :]
        e11 = c2_ref[pl.ds(r1 + 1, W3, stride=2), :]
        p3_ref[pl.ds(yo * W3, W3), :] = jnp.maximum(
            jnp.maximum(e00, e01), jnp.maximum(e10, e11))

    # --- Stage 5: decoder. ConvTranspose2d(k=2, s=2) x2 (ReLU in between). -
    # Stride-2/kernel-2 transposed convs write disjoint 2x2 blocks -> pure
    # per-pixel matmuls. Output layout: o[0, (dy,ey,dx,ex), (y,x), c]; final
    # pixel is (4y + 2dy + ey, 4x + 2dx + ex), un-interleaved in the wrapper.
    p3 = p3_ref[...]                                                 # (P3, C2)
    for dy in range(2):
        for dx in range(2):
            d1 = jnp.dot(p3, wd1_ref[dy * 2 + dx], preferred_element_type=f32)
            d1 = jnp.maximum(d1 + bd1_ref[...], 0.0)                 # (P3, C1)
            for ey in range(2):
                for ex in range(2):
                    out = jnp.dot(d1, wd2_ref[ey * 2 + ex],
                                  preferred_element_type=f32) + bd2_ref[...]
                    j = dy * 8 + ey * 4 + dx * 2 + ex
                    o_ref[0, j, :, :] = out.astype(o_ref.dtype)      # (P3, Cout)


def mae2d_stage1(x_nchw, w1, b1, w2, b2, wd1, bd1, wd2, bd2):
    """MAE2DStageI forward. x is NCHW; weights use PyTorch layouts:
       Conv2d weight (Cout, Cin, 3, 3); ConvTranspose2d weight (Cin, Cout, 2, 2)."""
    N, C0, H1, W1 = x_nchw.shape
    C1 = w1.shape[0]
    C2 = w2.shape[0]
    Cout = wd2.shape[1]
    assert H1 % 4 == 0 and W1 % 4 == 0
    f32 = jnp.float32

    Wp1 = W1 + 2
    H2, W2s = H1 // 2, W1 // 2
    Wp2 = W2s + 2
    H3, W3 = H2 // 2, W2s // 2
    P3 = H3 * W3

    # Flat channels-last input (single cheap XLA transpose; no wrapper pad).
    x_flat = jnp.transpose(x_nchw, (0, 2, 3, 1)).reshape(N, H1 * W1, C0).astype(f32)

    # Per-tap matmul operands: (tap, Cin, Cout).
    w1k = jnp.transpose(w1.astype(f32), (2, 3, 1, 0)).reshape(9, C0, C1)
    w2k = jnp.transpose(w2.astype(f32), (2, 3, 1, 0)).reshape(9, C1, C2)
    wd1k = jnp.transpose(wd1.astype(f32), (2, 3, 0, 1)).reshape(4, C2, C1)
    wd2k = jnp.transpose(wd2.astype(f32), (2, 3, 0, 1)).reshape(4, C1, Cout)
    b1r = b1.reshape(1, C1).astype(f32)
    b2r = b2.reshape(1, C2).astype(f32)
    bd1r = bd1.reshape(1, C1).astype(f32)
    bd2r = bd2.reshape(1, Cout).astype(f32)

    kernel = functools.partial(_mae2d_stage1_kernel,
                               H1=H1, W1=W1, C0=C0, C1=C1, C2=C2, Cout=Cout)

    flops = 2 * N * (H1 * W1 * 9 * C0 * C1
                     + H2 * W2s * 9 * C1 * C2
                     + P3 * 4 * C2 * C1
                     + P3 * 16 * C1 * Cout)
    bytes_accessed = 4 * (x_flat.size + w1k.size + w2k.size + wd1k.size + wd2k.size
                          + 2 * C1 + C2 + Cout + N * 16 * P3 * Cout)

    out_k = pl.pallas_call(
        kernel,
        out_shape=jax.ShapeDtypeStruct((N, 16, P3, Cout), f32),
        grid=(N,),
        in_specs=[
            pl.BlockSpec((1, H1 * W1, C0), lambda n: (n, 0, 0)),
            pl.BlockSpec((9, C0, C1), lambda n: (0, 0, 0)),
            pl.BlockSpec((1, C1), lambda n: (0, 0)),
            pl.BlockSpec((9, C1, C2), lambda n: (0, 0, 0)),
            pl.BlockSpec((1, C2), lambda n: (0, 0)),
            pl.BlockSpec((4, C2, C1), lambda n: (0, 0, 0)),
            pl.BlockSpec((1, C1), lambda n: (0, 0)),
            pl.BlockSpec((4, C1, Cout), lambda n: (0, 0, 0)),
            pl.BlockSpec((1, Cout), lambda n: (0, 0)),
        ],
        out_specs=pl.BlockSpec((1, 16, P3, Cout), lambda n: (n, 0, 0, 0)),
        scratch_shapes=[
            pltpu.VMEM(((H1 + 2) * Wp1 + Wp1, C0), f32),   # padded input, flat (+guard)
            pltpu.VMEM((H1 * Wp1, C1), f32),               # conv1 wide output
            pltpu.VMEM(((H2 + 2) * Wp2 + Wp2, C1), f32),   # padded pool1, flat (+guard)
            pltpu.VMEM((H2 * Wp2, C2), f32),               # conv2 wide output
            pltpu.VMEM((P3, C2), f32),                     # encoder output pixels
        ],
        compiler_params=pltpu.CompilerParams(dimension_semantics=("parallel",)),
        cost_estimate=pl.CostEstimate(flops=flops, transcendentals=0,
                                      bytes_accessed=bytes_accessed),
    )(x_flat, w1k, b1r, w2k, b2r, wd1k, bd1r, wd2k, bd2r)

    # Un-interleave the decoder output: kernel emits [n, (dy,ey,dx,ex), (y,x), c]
    # with the final pixel at (4y + 2dy + ey, 4x + 2dx + ex). Free in XLA.
    o = out_k.reshape(N, 2, 2, 2, 2, H3, W3, Cout)
    o = jnp.transpose(o, (0, 7, 5, 1, 2, 6, 3, 4))
    return o.reshape(N, Cout, H1, W1)


def mae2d_stage1_reference(x, w1, b1, w2, b2, wd1, bd1, wd2, bd2):
    """Pure-JAX reference matching the PyTorch module exactly."""
    dn = ('NCHW', 'OIHW', 'NCHW')
    y = lax.conv_general_dilated(x, w1, (1, 1), ((1, 1), (1, 1)),
                                 dimension_numbers=dn)
    y = jnp.maximum(y + b1.reshape(1, -1, 1, 1), 0.0)
    y = lax.reduce_window(y, -jnp.inf, lax.max, (1, 1, 2, 2), (1, 1, 2, 2), 'VALID')
    y = lax.conv_general_dilated(y, w2, (1, 1), ((1, 1), (1, 1)),
                                 dimension_numbers=dn)
    y = jnp.maximum(y + b2.reshape(1, -1, 1, 1), 0.0)
    y = lax.reduce_window(y, -jnp.inf, lax.max, (1, 1, 2, 2), (1, 1, 2, 2), 'VALID')

    def deconv2x2(z, w, b):
        # ConvTranspose2d(k=2, s=2): each input pixel owns its 2x2 output block.
        n, ci, h, wdim = z.shape
        co = w.shape[1]
        r = jnp.einsum('ncyx,copq->noypxq', z, w)
        return r.reshape(n, co, 2 * h, 2 * wdim) + b.reshape(1, co, 1, 1)

    y = jnp.maximum(deconv2x2(y, wd1, bd1), 0.0)
    y = deconv2x2(y, wd2, bd2)
    return y


if __name__ == "__main__":
    # Small shapes consistent with the module: 64/128 channels are fixed by it.
    N, Cin, Cout, H, W = 2, 4, 4, 16, 16
    C1, C2 = 64, 128

    key = jax.random.PRNGKey(0)
    ks = jax.random.split(key, 9)
    x = jax.random.normal(ks[0], (N, Cin, H, W), dtype=jnp.float32)
    w1 = 0.10 * jax.random.normal(ks[1], (C1, Cin, 3, 3), dtype=jnp.float32)
    b1 = 0.10 * jax.random.normal(ks[2], (C1,), dtype=jnp.float32)
    w2 = 0.05 * jax.random.normal(ks[3], (C2, C1, 3, 3), dtype=jnp.float32)
    b2 = 0.10 * jax.random.normal(ks[4], (C2,), dtype=jnp.float32)
    wd1 = 0.05 * jax.random.normal(ks[5], (C2, C1, 2, 2), dtype=jnp.float32)
    bd1 = 0.10 * jax.random.normal(ks[6], (C1,), dtype=jnp.float32)
    wd2 = 0.10 * jax.random.normal(ks[7], (C1, Cout, 2, 2), dtype=jnp.float32)
    bd2 = 0.10 * jax.random.normal(ks[8], (Cout,), dtype=jnp.float32)

    out = jax.block_until_ready(
        mae2d_stage1(x, w1, b1, w2, b2, wd1, bd1, wd2, bd2))
    ref = jax.block_until_ready(
        mae2d_stage1_reference(x, w1, b1, w2, b2, wd1, bd1, wd2, bd2))

    assert out.shape == (N, Cout, H, W), out.shape
    max_err = float(jnp.max(jnp.abs(out - ref)))
    assert jnp.allclose(out, ref, rtol=1e-2, atol=1e-2), max_err

    print("KERNEL_OK")
</pallas_src>

<mosaic_0001>
module attributes {stable_mosaic.version = 11 : i64} {
  func.func @_mae2d_stage1_kernel(%arg0: i32, %arg1: memref<1x256x4xf32, #tpu.memory_space<vmem>>, %arg2: memref<9x4x64xf32, #tpu.memory_space<vmem>>, %arg3: memref<1x64xf32, #tpu.memory_space<vmem>>, %arg4: memref<9x64x128xf32, #tpu.memory_space<vmem>>, %arg5: memref<1x128xf32, #tpu.memory_space<vmem>>, %arg6: memref<4x128x64xf32, #tpu.memory_space<vmem>>, %arg7: memref<1x64xf32, #tpu.memory_space<vmem>>, %arg8: memref<4x64x4xf32, #tpu.memory_space<vmem>>, %arg9: memref<1x4xf32, #tpu.memory_space<vmem>>, %arg10: memref<1x16x16x4xf32, #tpu.memory_space<vmem>>, %arg11: memref<342x4xf32, #tpu.memory_space<vmem>>, %arg12: memref<288x64xf32, #tpu.memory_space<vmem>>, %arg13: memref<110x64xf32, #tpu.memory_space<vmem>>, %arg14: memref<80x128xf32, #tpu.memory_space<vmem>>, %arg15: memref<16x128xf32, #tpu.memory_space<vmem>>) attributes {dimension_semantics = [#tpu.dimension_semantics<parallel>], iteration_bounds = array<i64: 2>, scalar_prefetch = 0 : i64, scratch_operands = 5 : i64, tpu.core_type = #tpu.core_type<tc>, window_params = [{transform_indices = @transform_0, window_bounds = array<i64: 1, 256, 4>}, {pipeline_mode = #tpu.pipeline_mode<synchronous>, transform_indices = @transform_1, window_bounds = array<i64: 9, 4, 64>}, {pipeline_mode = #tpu.pipeline_mode<synchronous>, transform_indices = @transform_2, window_bounds = array<i64: 1, 64>}, {pipeline_mode = #tpu.pipeline_mode<synchronous>, transform_indices = @transform_3, window_bounds = array<i64: 9, 64, 128>}, {pipeline_mode = #tpu.pipeline_mode<synchronous>, transform_indices = @transform_4, window_bounds = array<i64: 1, 128>}, {pipeline_mode = #tpu.pipeline_mode<synchronous>, transform_indices = @transform_5, window_bounds = array<i64: 4, 128, 64>}, {pipeline_mode = #tpu.pipeline_mode<synchronous>, transform_indices = @transform_6, window_bounds = array<i64: 1, 64>}, {pipeline_mode = #tpu.pipeline_mode<synchronous>, transform_indices = @transform_7, window_bounds = array<i64: 4, 64, 4>}, {pipeline_mode = #tpu.pipeline_mode<synchronous>, transform_indices = @transform_8, window_bounds = array<i64: 1, 4>}, {transform_indices = @transform_9, window_bounds = array<i64: 1, 16, 16, 4>}]} {
    %cst = arith.constant 0.000000e+00 : f32
    %0 = vector.broadcast %cst : f32 to vector<342x4xf32>
    %c0 = arith.constant 0 : index
    %c0_0 = arith.constant 0 : index
    %1 = vector.load %arg11[%c0, %c0_0] : memref<342x4xf32, #tpu.memory_space<vmem>>, vector<342x4xf32>
    tpu.vector_store %arg11[%c0, %c0_0], %0 {strides = array<i32>} : memref<342x4xf32, #tpu.memory_space<vmem>>, vector<342x4xf32>,
    %c0_1 = arith.constant 0 : index
    %c0_2 = arith.constant 0 : index
    %c0_3 = arith.constant 0 : index
    %2 = vector.load %arg1[%c0_1, %c0_2, %c0_3] : memref<1x256x4xf32, #tpu.memory_space<vmem>>, vector<1x16x4xf32>
    %3 = vector.shape_cast %2 : vector<1x16x4xf32> to vector<16x4xf32>
    %c19 = arith.constant 19 : index
    %c0_4 = arith.constant 0 : index
    %4 = vector.load %arg11[%c19, %c0_4] : memref<342x4xf32, #tpu.memory_space<vmem>>, vector<16x4xf32>
    tpu.vector_store %arg11[%c19, %c0_4], %3 {strides = array<i32>} : memref<342x4xf32, #tpu.memory_space<vmem>>, vector<16x4xf32>,
    %c0_5 = arith.constant 0 : index
    %c16 = arith.constant 16 : index
    %c0_6 = arith.constant 0 : index
    %5 = vector.load %arg1[%c0_5, %c16, %c0_6] : memref<1x256x4xf32, #tpu.memory_space<vmem>>, vector<1x16x4xf32>
    %6 = vector.shape_cast %5 : vector<1x16x4xf32> to vector<16x4xf32>
    %c37 = arith.constant 37 : index
    %c0_7 = arith.constant 0 : index
    %7 = vector.load %arg11[%c37, %c0_7] : memref<342x4xf32, #tpu.memory_space<vmem>>, vector<16x4xf32>
    tpu.vector_store %arg11[%c37, %c0_7], %6 {strides = array<i32>} : memref<342x4xf32, #tpu.memory_space<vmem>>, vector<16x4xf32>,
    %c0_8 = arith.constant 0 : index
    %c32 = arith.constant 32 : index
    %c0_9 = arith.constant 0 : index
    %8 = vector.load %arg1[%c0_8, %c32, %c0_9] : memref<1x256x4xf32, #tpu.memory_space<vmem>>, vector<1x16x4xf32>
    %9 = vector.shape_cast %8 : vector<1x16x4xf32> to vector<16x4xf32>
    %c55 = arith.constant 55 : index
    %c0_10 = arith.constant 0 : index
    %10 = vector.load %arg11[%c55, %c0_10] : memref<342x4xf32, #tpu.memory_space<vmem>>, vector<16x4xf32>
    tpu.vector_store %arg11[%c55, %c0_10], %9 {strides = array<i32>} : memref<342x4xf32, #tpu.memory_space<vmem>>, vector<16x4xf32>,
    %c0_11 = arith.constant 0 : index
    %c48 = arith.constant 48 : index
    %c0_12 = arith.constant 0 : index
    %11 = vector.load %arg1[%c0_11, %c48, %c0_12] : memref<1x256x4xf32, #tpu.memory_space<vmem>>, vector<1x16x4xf32>
    %12 = vector.shape_cast %11 : vector<1x16x4xf32> to vector<16x4xf32>
    %c73 = arith.constant 73 : index
    %c0_13 = arith.constant 0 : index
    %13 = vector.load %arg11[%c73, %c0_13] : memref<342x4xf32, #tpu.memory_space<vmem>>, vector<16x4xf32>
    tpu.vector_store %arg11[%c73, %c0_13], %12 {strides = array<i32>} : memref<342x4xf32, #tpu.memory_space<vmem>>, vector<16x4xf32>,
    %c0_14 = arith.constant 0 : index
    %c64 = arith.constant 64 : index
    %c0_15 = arith.constant 0 : index
    %14 = vector.load %arg1[%c0_14, %c64, %c0_15] : memref<1x256x4xf32, #tpu.memory_space<vmem>>, vector<1x16x4xf32>
    %15 = vector.shape_cast %14 : vector<1x16x4xf32> to vector<16x4xf32>
    %c91 = arith.constant 91 : index
    %c0_16 = arith.constant 0 : index
    %16 = vector.load %arg11[%c91, %c0_16] : memref<342x4xf32, #tpu.memory_space<vmem>>, vector<16x4xf32>
    tpu.vector_store %arg11[%c91, %c0_16], %15 {strides = array<i32>} : memref<342x4xf32, #tpu.memory_space<vmem>>, vector<16x4xf32>,
    %c0_17 = arith.constant 0 : index
    %c80 = arith.constant 80 : index
    %c0_18 = arith.constant 0 : index
    %17 = vector.load %arg1[%c0_17, %c80, %c0_18] : memref<1x256x4xf32, #tpu.memory_space<vmem>>, vector<1x16x4xf32>
    %18 = vector.shape_cast %17 : vector<1x16x4xf32> to vector<16x4xf32>
    %c109 = arith.constant 109 : index
    %c0_19 = arith.constant 0 : index
    %19 = vector.load %arg11[%c109, %c0_19] : memref<342x4xf32, #tpu.memory_space<vmem>>, vector<16x4xf32>
    tpu.vector_store %arg11[%c109, %c0_19], %18 {strides = array<i32>} : memref<342x4xf32, #tpu.memory_space<vmem>>, vector<16x4xf32>,
    %c0_20 = arith.constant 0 : index
    %c96 = arith.constant 96 : index
    %c0_21 = arith.constant 0 : index
    %20 = vector.load %arg1[%c0_20, %c96, %c0_21] : memref<1x256x4xf32, #tpu.memory_space<vmem>>, vector<1x16x4xf32>
    %21 = vector.shape_cast %20 : vector<1x16x4xf32> to vector<16x4xf32>
    %c127 = arith.constant 127 : index
    %c0_22 = arith.constant 0 : index
    %22 = vector.load %arg11[%c127, %c0_22] : memref<342x4xf32, #tpu.memory_space<vmem>>, vector<16x4xf32>
    tpu.vector_store %arg11[%c127, %c0_22], %21 {strides = array<i32>} : memref<342x4xf32, #tpu.memory_space<vmem>>, vector<16x4xf32>,
    %c0_23 = arith.constant 0 : index
    %c112 = arith.constant 112 : index
    %c0_24 = arith.constant 0 : index
    %23 = vector.load %arg1[%c0_23, %c112, %c0_24] : memref<1x256x4xf32, #tpu.memory_space<vmem>>, vector<1x16x4xf32>
    %24 = vector.shape_cast %23 : vector<1x16x4xf32> to vector<16x4xf32>
    %c145 = arith.constant 145 : index
    %c0_25 = arith.constant 0 : index
    %25 = vector.load %arg11[%c145, %c0_25] : memref<342x4xf32, #tpu.memory_space<vmem>>, vector<16x4xf32>
    tpu.vector_store %arg11[%c145, %c0_25], %24 {strides = array<i32>} : memref<342x4xf32, #tpu.memory_space<vmem>>, vector<16x4xf32>,
    %c0_26 = arith.constant 0 : index
    %c128 = arith.constant 128 : index
    %c0_27 = arith.constant 0 : index
    %26 = vector.load %arg1[%c0_26, %c128, %c0_27] : memref<1x256x4xf32, #tpu.memory_space<vmem>>, vector<1x16x4xf32>
    %27 = vector.shape_cast %26 : vector<1x16x4xf32> to vector<16x4xf32>
    %c163 = arith.constant 163 : index
    %c0_28 = arith.constant 0 : index
    %28 = vector.load %arg11[%c163, %c0_28] : memref<342x4xf32, #tpu.memory_space<vmem>>, vector<16x4xf32>
    tpu.vector_store %arg11[%c163, %c0_28], %27 {strides = array<i32>} : memref<342x4xf32, #tpu.memory_space<vmem>>, vector<16x4xf32>,
    %c0_29 = arith.constant 0 : index
    %c144 = arith.constant 144 : index
    %c0_30 = arith.constant 0 : index
    %29 = vector.load %arg1[%c0_29, %c144, %c0_30] : memref<1x256x4xf32, #tpu.memory_space<vmem>>, vector<1x16x4xf32>
    %30 = vector.shape_cast %29 : vector<1x16x4xf32> to vector<16x4xf32>
    %c181 = arith.constant 181 : index
    %c0_31 = arith.constant 0 : index
    %31 = vector.load %arg11[%c181, %c0_31] : memref<342x4xf32, #tpu.memory_space<vmem>>, vector<16x4xf32>
    tpu.vector_store %arg11[%c181, %c0_31], %30 {strides = array<i32>} : memref<342x4xf32, #tpu.memory_space<vmem>>, vector<16x4xf32>,
    %c0_32 = arith.constant 0 : index
    %c160 = arith.constant 160 : index
    %c0_33 = arith.constant 0 : index
    %32 = vector.load %arg1[%c0_32, %c160, %c0_33] : memref<1x256x4xf32, #tpu.memory_space<vmem>>, vector<1x16x4xf32>
    %33 = vector.shape_cast %32 : vector<1x16x4xf32> to vector<16x4xf32>
    %c199 = arith.constant 199 : index
    %c0_34 = arith.constant 0 : index
    %34 = vector.load %arg11[%c199, %c0_34] : memref<342x4xf32, #tpu.memory_space<vmem>>, vector<16x4xf32>
    tpu.vector_store %arg11[%c199, %c0_34], %33 {strides = array<i32>} : memref<342x4xf32, #tpu.memory_space<vmem>>, vector<16x4xf32>,
    %c0_35 = arith.constant 0 : index
    %c176 = arith.constant 176 : index
    %c0_36 = arith.constant 0 : index
    %35 = vector.load %arg1[%c0_35, %c176, %c0_36] : memref<1x256x4xf32, #tpu.memory_space<vmem>>, vector<1x16x4xf32>
    %36 = vector.shape_cast %35 : vector<1x16x4xf32> to vector<16x4xf32>
    %c217 = arith.constant 217 : index
    %c0_37 = arith.constant 0 : index
    %37 = vector.load %arg11[%c217, %c0_37] : memref<342x4xf32, #tpu.memory_space<vmem>>, vector<16x4xf32>
    tpu.vector_store %arg11[%c217, %c0_37], %36 {strides = array<i32>} : memref<342x4xf32, #tpu.memory_space<vmem>>, vector<16x4xf32>,
    %c0_38 = arith.constant 0 : index
    %c192 = arith.constant 192 : index
    %c0_39 = arith.constant 0 : index
    %38 = vector.load %arg1[%c0_38, %c192, %c0_39] : memref<1x256x4xf32, #tpu.memory_space<vmem>>, vector<1x16x4xf32>
    %39 = vector.shape_cast %38 : vector<1x16x4xf32> to vector<16x4xf32>
    %c235 = arith.constant 235 : index
    %c0_40 = arith.constant 0 : index
    %40 = vector.load %arg11[%c235, %c0_40] : memref<342x4xf32, #tpu.memory_space<vmem>>, vector<16x4xf32>
    tpu.vector_store %arg11[%c235, %c0_40], %39 {strides = array<i32>} : memref<342x4xf32, #tpu.memory_space<vmem>>, vector<16x4xf32>,
    %c0_41 = arith.constant 0 : index
    %c208 = arith.constant 208 : index
    %c0_42 = arith.constant 0 : index
    %41 = vector.load %arg1[%c0_41, %c208, %c0_42] : memref<1x256x4xf32, #tpu.memory_space<vmem>>, vector<1x16x4xf32>
    %42 = vector.shape_cast %41 : vector<1x16x4xf32> to vector<16x4xf32>
    %c253 = arith.constant 253 : index
    %c0_43 = arith.constant 0 : index
    %43 = vector.load %arg11[%c253, %c0_43] : memref<342x4xf32, #tpu.memory_space<vmem>>, vector<16x4xf32>
    tpu.vector_store %arg11[%c253, %c0_43], %42 {strides = array<i32>} : memref<342x4xf32, #tpu.memory_space<vmem>>, vector<16x4xf32>,
    %c0_44 = arith.constant 0 : index
    %c224 = arith.constant 224 : index
    %c0_45 = arith.constant 0 : index
    %44 = vector.load %arg1[%c0_44, %c224, %c0_45] : memref<1x256x4xf32, #tpu.memory_space<vmem>>, vector<1x16x4xf32>
    %45 = vector.shape_cast %44 : vector<1x16x4xf32> to vector<16x4xf32>
    %c271 = arith.constant 271 : index
    %c0_46 = arith.constant 0 : index
    %46 = vector.load %arg11[%c271, %c0_46] : memref<342x4xf32, #tpu.memory_space<vmem>>, vector<16x4xf32>
    tpu.vector_store %arg11[%c271, %c0_46], %45 {strides = array<i32>} : memref<342x4xf32, #tpu.memory_space<vmem>>, vector<16x4xf32>,
    %c0_47 = arith.constant 0 : index
    %c240 = arith.constant 240 : index
    %c0_48 = arith.constant 0 : index
    %47 = vector.load %arg1[%c0_47, %c240, %c0_48] : memref<1x256x4xf32, #tpu.memory_space<vmem>>, vector<1x16x4xf32>
    %48 = vector.shape_cast %47 : vector<1x16x4xf32> to vector<16x4xf32>
    %c289 = arith.constant 289 : index
    %c0_49 = arith.constant 0 : index
    %49 = vector.load %arg11[%c289, %c0_49] : memref<342x4xf32, #tpu.memory_space<vmem>>, vector<16x4xf32>
    tpu.vector_store %arg11[%c289, %c0_49], %48 {strides = array<i32>} : memref<342x4xf32, #tpu.memory_space<vmem>>, vector<16x4xf32>,
    %cst_50 = arith.constant 0.000000e+00 : f32
    %50 = vector.broadcast %cst_50 : f32 to vector<288x64xf32>
    %c0_51 = arith.constant 0 : index
    %c0_52 = arith.constant 0 : index
    %51 = vector.load %arg11[%c0_51, %c0_52] : memref<342x4xf32, #tpu.memory_space<vmem>>, vector<288x4xf32>
    %c0_53 = arith.constant 0 : index
    %c0_54 = arith.constant 0 : index
    %c0_55 = arith.constant 0 : index
    %52 = vector.load %arg2[%c0_53, %c0_54, %c0_55] : memref<9x4x64xf32, #tpu.memory_space<vmem>>, vector<1x4x64xf32>
    %53 = vector.shape_cast %52 : vector<1x4x64xf32> to vector<4x64xf32>
    %cst_56 = arith.constant dense<0.000000e+00> : vector<288x64xf32>
    %54 = tpu.matmul %51, %53, %cst_56 {dimension_numbers = #tpu.dot_dimension_numbers<[1], [0], [0], [1], [0, 0, 1, 1], [], []>} : vector<288x4xf32>, vector<4x64xf32>, vector<288x64xf32> -> vector<288x64xf32>
    %55 = arith.addf %50, %54 : vector<288x64xf32>
    %c1 = arith.constant 1 : index
    %c0_57 = arith.constant 0 : index
    %56 = vector.load %arg11[%c1, %c0_57] : memref<342x4xf32, #tpu.memory_space<vmem>>, vector<288x4xf32>
    %c1_58 = arith.constant 1 : index
    %c0_59 = arith.constant 0 : index
    %c0_60 = arith.constant 0 : index
    %57 = vector.load %arg2[%c1_58, %c0_59, %c0_60] : memref<9x4x64xf32, #tpu.memory_space<vmem>>, vector<1x4x64xf32>
    %58 = vector.shape_cast %57 : vector<1x4x64xf32> to vector<4x64xf32>
    %cst_61 = arith.constant dense<0.000000e+00> : vector<288x64xf32>
    %59 = tpu.matmul %56, %58, %cst_61 {dimension_numbers = #tpu.dot_dimension_numbers<[1], [0], [0], [1], [0, 0, 1, 1], [], []>} : vector<288x4xf32>, vector<4x64xf32>, vector<288x64xf32> -> vector<288x64xf32>
    %60 = arith.addf %55, %59 : vector<288x64xf32>
    %c2 = arith.constant 2 : index
    %c0_62 = arith.constant 0 : index
    %61 = vector.load %arg11[%c2, %c0_62] : memref<342x4xf32, #tpu.memory_space<vmem>>, vector<288x4xf32>
    %c2_63 = arith.constant 2 : index
    %c0_64 = arith.constant 0 : index
    %c0_65 = arith.constant 0 : index
    %62 = vector.load %arg2[%c2_63, %c0_64, %c0_65] : memref<9x4x64xf32, #tpu.memory_space<vmem>>, vector<1x4x64xf32>
    %63 = vector.shape_cast %62 : vector<1x4x64xf32> to vector<4x64xf32>
    %cst_66 = arith.constant dense<0.000000e+00> : vector<288x64xf32>
    %64 = tpu.matmul %61, %63, %cst_66 {dimension_numbers = #tpu.dot_dimension_numbers<[1], [0], [0], [1], [0, 0, 1, 1], [], []>} : vector<288x4xf32>, vector<4x64xf32>, vector<288x64xf32> -> vector<288x64xf32>
    %65 = arith.addf %60, %64 : vector<288x64xf32>
    %c18 = arith.constant 18 : index
    %c0_67 = arith.constant 0 : index
    %66 = vector.load %arg11[%c18, %c0_67] : memref<342x4xf32, #tpu.memory_space<vmem>>, vector<288x4xf32>
    %c3 = arith.constant 3 : index
    %c0_68 = arith.constant 0 : index
    %c0_69 = arith.constant 0 : index
    %67 = vector.load %arg2[%c3, %c0_68, %c0_69] : memref<9x4x64xf32, #tpu.memory_space<vmem>>, vector<1x4x64xf32>
    %68 = vector.shape_cast %67 : vector<1x4x64xf32> to vector<4x64xf32>
    %cst_70 = arith.constant dense<0.000000e+00> : vector<288x64xf32>
    %69 = tpu.matmul %66, %68, %cst_70 {dimension_numbers = #tpu.dot_dimension_numbers<[1], [0], [0], [1], [0, 0, 1, 1], [], []>} : vector<288x4xf32>, vector<4x64xf32>, vector<288x64xf32> -> vector<288x64xf32>
    %70 = arith.addf %65, %69 : vector<288x64xf32>
    %c19_71 = arith.constant 19 : index
    %c0_72 = arith.constant 0 : index
    %71 = vector.load %arg11[%c19_71, %c0_72] : memref<342x4xf32, #tpu.memory_space<vmem>>, vector<288x4xf32>
    %c4 = arith.constant 4 : index
    %c0_73 = arith.constant 0 : index
    %c0_74 = arith.constant 0 : index
    %72 = vector.load %arg2[%c4, %c0_73, %c0_74] : memref<9x4x64xf32, #tpu.memory_space<vmem>>, vector<1x4x64xf32>
    %73 = vector.shape_cast %72 : vector<1x4x64xf32> to vector<4x64xf32>
    %cst_75 = arith.constant dense<0.000000e+00> : vector<288x64xf32>
    %74 = tpu.matmul %71, %73, %cst_75 {dimension_numbers = #tpu.dot_dimension_numbers<[1], [0], [0], [1], [0, 0, 1, 1], [], []>} : vector<288x4xf32>, vector<4x64xf32>, vector<288x64xf32> -> vector<288x64xf32>
    %75 = arith.addf %70, %74 : vector<288x64xf32>
    %c20 = arith.constant 20 : index
    %c0_76 = arith.constant 0 : index
    %76 = vector.load %arg11[%c20, %c0_76] : memref<342x4xf32, #tpu.memory_space<vmem>>, vector<288x4xf32>
    %c5 = arith.constant 5 : index
    %c0_77 = arith.constant 0 : index
    %c0_78 = arith.constant 0 : index
    %77 = vector.load %arg2[%c5, %c0_77, %c0_78] : memref<9x4x64xf32, #tpu.memory_space<vmem>>, vector<1x4x64xf32>
    %78 = vector.shape_cast %77 : vector<1x4x64xf32> to vector<4x64xf32>
    %cst_79 = arith.constant dense<0.000000e+00> : vector<288x64xf32>
    %79 = tpu.matmul %76, %78, %cst_79 {dimension_numbers = #tpu.dot_dimension_numbers<[1], [0], [0], [1], [0, 0, 1, 1], [], []>} : vector<288x4xf32>, vector<4x64xf32>, vector<288x64xf32> -> vector<288x64xf32>
    %80 = arith.addf %75, %79 : vector<288x64xf32>
    %c36 = arith.constant 36 : index
    %c0_80 = arith.constant 0 : index
    %81 = vector.load %arg11[%c36, %c0_80] : memref<342x4xf32, #tpu.memory_space<vmem>>, vector<288x4xf32>
    %c6 = arith.constant 6 : index
    %c0_81 = arith.constant 0 : index
    %c0_82 = arith.constant 0 : index
    %82 = vector.load %arg2[%c6, %c0_81, %c0_82] : memref<9x4x64xf32, #tpu.memory_space<vmem>>, vector<1x4x64xf32>
    %83 = vector.shape_cast %82 : vector<1x4x64xf32> to vector<4x64xf32>
    %cst_83 = arith.constant dense<0.000000e+00> : vector<288x64xf32>
    %84 = tpu.matmul %81, %83, %cst_83 {dimension_numbers = #tpu.dot_dimension_numbers<[1], [0], [0], [1], [0, 0, 1, 1], [], []>} : vector<288x4xf32>, vector<4x64xf32>, vector<288x64xf32> -> vector<288x64xf32>
    %85 = arith.addf %80, %84 : vector<288x64xf32>
    %c37_84 = arith.constant 37 : index
    %c0_85 = arith.constant 0 : index
    %86 = vector.load %arg11[%c37_84, %c0_85] : memref<342x4xf32, #tpu.memory_space<vmem>>, vector<288x4xf32>
    %c7 = arith.constant 7 : index
    %c0_86 = arith.constant 0 : index
    %c0_87 = arith.constant 0 : index
    %87 = vector.load %arg2[%c7, %c0_86, %c0_87] : memref<9x4x64xf32, #tpu.memory_space<vmem>>, vector<1x4x64xf32>
    %88 = vector.shape_cast %87 : vector<1x4x64xf32> to vector<4x64xf32>
    %cst_88 = arith.constant dense<0.000000e+00> : vector<288x64xf32>
    %89 = tpu.matmul %86, %88, %cst_88 {dimension_numbers = #tpu.dot_dimension_numbers<[1], [0], [0], [1], [0, 0, 1, 1], [], []>} : vector<288x4xf32>, vector<4x64xf32>, vector<288x64xf32> -> vector<288x64xf32>
    %90 = arith.addf %85, %89 : vector<288x64xf32>
    %c38 = arith.constant 38 : index
    %c0_89 = arith.constant 0 : index
    %91 = vector.load %arg11[%c38, %c0_89] : memref<342x4xf32, #tpu.memory_space<vmem>>, vector<288x4xf32>
    %c8 = arith.constant 8 : index
    %c0_90 = arith.constant 0 : index
    %c0_91 = arith.constant 0 : index
    %92 = vector.load %arg2[%c8, %c0_90, %c0_91] : memref<9x4x64xf32, #tpu.memory_space<vmem>>, vector<1x4x64xf32>
    %93 = vector.shape_cast %92 : vector<1x4x64xf32> to vector<4x64xf32>
    %cst_92 = arith.constant dense<0.000000e+00> : vector<288x64xf32>
    %94 = tpu.matmul %91, %93, %cst_92 {dimension_numbers = #tpu.dot_dimension_numbers<[1], [0], [0], [1], [0, 0, 1, 1], [], []>} : vector<288x4xf32>, vector<4x64xf32>, vector<288x64xf32> -> vector<288x64xf32>
    %95 = arith.addf %90, %94 : vector<288x64xf32>
    %c0_93 = arith.constant 0 : index
    %c0_94 = arith.constant 0 : index
    %96 = vector.load %arg3[%c0_93, %c0_94] : memref<1x64xf32, #tpu.memory_space<vmem>>, vector<1x64xf32>
    %97 = vector.broadcast %96 : vector<1x64xf32> to vector<288x64xf32>
    %98 = arith.addf %95, %97 : vector<288x64xf32>
    %cst_95 = arith.constant 0.000000e+00 : f32
    %99 = vector.broadcast %cst_95 : f32 to vector<288x64xf32>
    %100 = arith.maximumf %98, %99 : vector<288x64xf32>
    %c0_96 = arith.constant 0 : index
    %c0_97 = arith.constant 0 : index
    %101 = vector.load %arg12[%c0_96, %c0_97] : memref<288x64xf32, #tpu.memory_space<vmem>>, vector<288x64xf32>
    tpu.vector_store %arg12[%c0_96, %c0_97], %100 {strides = array<i32>} : memref<288x64xf32, #tpu.memory_space<vmem>>, vector<288x64xf32>,
    %cst_98 = arith.constant 0.000000e+00 : f32
    %102 = vector.broadcast %cst_98 : f32 to vector<110x64xf32>
    %c0_99 = arith.constant 0 : index
    %c0_100 = arith.constant 0 : index
    %103 = vector.load %arg13[%c0_99, %c0_100] : memref<110x64xf32, #tpu.memory_space<vmem>>, vector<110x64xf32>
    tpu.vector_store %arg13[%c0_99, %c0_100], %102 {strides = array<i32>} : memref<110x64xf32, #tpu.memory_space<vmem>>, vector<110x64xf32>,
    %c0_101 = arith.constant 0 : index
    %c0_102 = arith.constant 0 : index
    %104 = tpu.strided_load %arg12[%c0_101, %c0_102] {strides = array<i32: 2, 1>} : memref<288x64xf32, #tpu.memory_space<vmem>>, vector<8x64xf32>
    %c1_103 = arith.constant 1 : index
    %c0_104 = arith.constant 0 : index
    %105 = tpu.strided_load %arg12[%c1_103, %c0_104] {strides = array<i32: 2, 1>} : memref<288x64xf32, #tpu.memory_space<vmem>>, vector<8x64xf32>
    %c18_105 = arith.constant 18 : index
    %c0_106 = arith.constant 0 : index
    %106 = tpu.strided_load %arg12[%c18_105, %c0_106] {strides = array<i32: 2, 1>} : memref<288x64xf32, #tpu.memory_space<vmem>>, vector<8x64xf32>
    %c19_107 = arith.constant 19 : index
    %c0_108 = arith.constant 0 : index
    %107 = tpu.strided_load %arg12[%c19_107, %c0_108] {strides = array<i32: 2, 1>} : memref<288x64xf32, #tpu.memory_space<vmem>>, vector<8x64xf32>
    %108 = arith.maximumf %104, %105 : vector<8x64xf32>
    %109 = arith.maximumf %106, %107 : vector<8x64xf32>
    %110 = arith.maximumf %108, %109 : vector<8x64xf32>
    %c11 = arith.constant 11 : index
    %c0_109 = arith.constant 0 : index
    %111 = vector.load %arg13[%c11, %c0_109] : memref<110x64xf32, #tpu.memory_space<vmem>>, vector<8x64xf32>
    tpu.vector_store %arg13[%c11, %c0_109], %110 {strides = array<i32>} : memref<110x64xf32, #tpu.memory_space<vmem>>, vector<8x64xf32>,
    %c36_110 = arith.constant 36 : index
    %c0_111 = arith.constant 0 : index
    %112 = tpu.strided_load %arg12[%c36_110, %c0_111] {strides = array<i32: 2, 1>} : memref<288x64xf32, #tpu.memory_space<vmem>>, vector<8x64xf32>
    %c37_112 = arith.constant 37 : index
    %c0_113 = arith.constant 0 : index
    %113 = tpu.strided_load %arg12[%c37_112, %c0_113] {strides = array<i32: 2, 1>} : memref<288x64xf32, #tpu.memory_space<vmem>>, vector<8x64xf32>
    %c54 = arith.constant 54 : index
    %c0_114 = arith.constant 0 : index
    %114 = tpu.strided_load %arg12[%c54, %c0_114] {strides = array<i32: 2, 1>} : memref<288x64xf32, #tpu.memory_space<vmem>>, vector<8x64xf32>
    %c55_115 = arith.constant 55 : index
    %c0_116 = arith.constant 0 : index
    %115 = tpu.strided_load %arg12[%c55_115, %c0_116] {strides = array<i32: 2, 1>} : memref<288x64xf32, #tpu.memory_space<vmem>>, vector<8x64xf32>
    %116 = arith.maximumf %112, %113 : vector<8x64xf32>
    %117 = arith.maximumf %114, %115 : vector<8x64xf32>
    %118 = arith.maximumf %116, %117 : vector<8x64xf32>
    %c21 = arith.constant 21 : index
    %c0_117 = arith.constant 0 : index
    %119 = vector.load %arg13[%c21, %c0_117] : memref<110x64xf32, #tpu.memory_space<vmem>>, vector<8x64xf32>
    tpu.vector_store %arg13[%c21, %c0_117], %118 {strides = array<i32>} : memref<110x64xf32, #tpu.memory_space<vmem>>, vector<8x64xf32>,
    %c72 = arith.constant 72 : index
    %c0_118 = arith.constant 0 : index
    %120 = tpu.strided_load %arg12[%c72, %c0_118] {strides = array<i32: 2, 1>} : memref<288x64xf32, #tpu.memory_space<vmem>>, vector<8x64xf32>
    %c73_119 = arith.constant 73 : index
    %c0_120 = arith.constant 0 : index
    %121 = tpu.strided_load %arg12[%c73_119, %c0_120] {strides = array<i32: 2, 1>} : memref<288x64xf32, #tpu.memory_space<vmem>>, vector<8x64xf32>
    %c90 = arith.constant 90 : index
    %c0_121 = arith.constant 0 : index
    %122 = tpu.strided_load %arg12[%c90, %c0_121] {strides = array<i32: 2, 1>} : memref<288x64xf32, #tpu.memory_space<vmem>>, vector<8x64xf32>
    %c91_122 = arith.constant 91 : index
    %c0_123 = arith.constant 0 : index
    %123 = tpu.strided_load %arg12[%c91_122, %c0_123] {strides = array<i32: 2, 1>} : memref<288x64xf32, #tpu.memory_space<vmem>>, vector<8x64xf32>
    %124 = arith.maximumf %120, %121 : vector<8x64xf32>
    %125 = arith.maximumf %122, %123 : vector<8x64xf32>
    %126 = arith.maximumf %124, %125 : vector<8x64xf32>
    %c31 = arith.constant 31 : index
    %c0_124 = arith.constant 0 : index
    %127 = vector.load %arg13[%c31, %c0_124] : memref<110x64xf32, #tpu.memory_space<vmem>>, vector<8x64xf32>
    tpu.vector_store %arg13[%c31, %c0_124], %126 {strides = array<i32>} : memref<110x64xf32, #tpu.memory_space<vmem>>, vector<8x64xf32>,
    %c108 = arith.constant 108 : index
    %c0_125 = arith.constant 0 : index
    %128 = tpu.strided_load %arg12[%c108, %c0_125] {strides = array<i32: 2, 1>} : memref<288x64xf32, #tpu.memory_space<vmem>>, vector<8x64xf32>
    %c109_126 = arith.constant 109 : index
    %c0_127 = arith.constant 0 : index
    %129 = tpu.strided_load %arg12[%c109_126, %c0_127] {strides = array<i32: 2, 1>} : memref<288x64xf32, #tpu.memory_space<vmem>>, vector<8x64xf32>
    %c126 = arith.constant 126 : index
    %c0_128 = arith.constant 0 : index
    %130 = tpu.strided_load %arg12[%c126, %c0_128] {strides = array<i32: 2, 1>} : memref<288x64xf32, #tpu.memory_space<vmem>>, vector<8x64xf32>
    %c127_129 = arith.constant 127 : index
    %c0_130 = arith.constant 0 : index
    %131 = tpu.strided_load %arg12[%c127_129, %c0_130] {strides = array<i32: 2, 1>} : memref<288x64xf32, #tpu.memory_space<vmem>>, vector<8x64xf32>
    %132 = arith.maximumf %128, %129 : vector<8x64xf32>
    %133 = arith.maximumf %130, %131 : vector<8x64xf32>
    %134 = arith.maximumf %132, %133 : vector<8x64xf32>
    %c41 = arith.constant 41 : index
    %c0_131 = arith.constant 0 : index
    %135 = vector.load %arg13[%c41, %c0_131] : memref<110x64xf32, #tpu.memory_space<vmem>>, vector<8x64xf32>
    tpu.vector_store %arg13[%c41, %c0_131], %134 {strides = array<i32>} : memref<110x64xf32, #tpu.memory_space<vmem>>, vector<8x64xf32>,
    %c144_132 = arith.constant 144 : index
    %c0_133 = arith.constant 0 : index
    %136 = tpu.strided_load %arg12[%c144_132, %c0_133] {strides = array<i32: 2, 1>} : memref<288x64xf32, #tpu.memory_space<vmem>>, vector<8x64xf32>
    %c145_134 = arith.constant 145 : index
    %c0_135 = arith.constant 0 : index
    %137 = tpu.strided_load %arg12[%c145_134, %c0_135] {strides = array<i32: 2, 1>} : memref<288x64xf32, #tpu.memory_space<vmem>>, vector<8x64xf32>
    %c162 = arith.constant 162 : index
    %c0_136 = arith.constant 0 : index
    %138 = tpu.strided_load %arg12[%c162, %c0_136] {strides = array<i32: 2, 1>} : memref<288x64xf32, #tpu.memory_space<vmem>>, vector<8x64xf32>
    %c163_137 = arith.constant 163 : index
    %c0_138 = arith.constant 0 : index
    %139 = tpu.strided_load %arg12[%c163_137, %c0_138] {strides = array<i32: 2, 1>} : memref<288x64xf32, #tpu.memory_space<vmem>>, vector<8x64xf32>
    %140 = arith.maximumf %136, %137 : vector<8x64xf32>
    %141 = arith.maximumf %138, %139 : vector<8x64xf32>
    %142 = arith.maximumf %140, %141 : vector<8x64xf32>
    %c51 = arith.constant 51 : index
    %c0_139 = arith.constant 0 : index
    %143 = vector.load %arg13[%c51, %c0_139] : memref<110x64xf32, #tpu.memory_space<vmem>>, vector<8x64xf32>
    tpu.vector_store %arg13[%c51, %c0_139], %142 {strides = array<i32>} : memref<110x64xf32, #tpu.memory_space<vmem>>, vector<8x64xf32>,
    %c180 = arith.constant 180 : index
    %c0_140 = arith.constant 0 : index
    %144 = tpu.strided_load %arg12[%c180, %c0_140] {strides = array<i32: 2, 1>} : memref<288x64xf32, #tpu.memory_space<vmem>>, vector<8x64xf32>
    %c181_141 = arith.constant 181 : index
    %c0_142 = arith.constant 0 : index
    %145 = tpu.strided_load %arg12[%c181_141, %c0_142] {strides = array<i32: 2, 1>} : memref<288x64xf32, #tpu.memory_space<vmem>>, vector<8x64xf32>
    %c198 = arith.constant 198 : index
    %c0_143 = arith.constant 0 : index
    %146 = tpu.strided_load %arg12[%c198, %c0_143] {strides = array<i32: 2, 1>} : memref<288x64xf32, #tpu.memory_space<vmem>>, vector<8x64xf32>
    %c199_144 = arith.constant 199 : index
    %c0_145 = arith.constant 0 : index
    %147 = tpu.strided_load %arg12[%c199_144, %c0_145] {strides = array<i32: 2, 1>} : memref<288x64xf32, #tpu.memory_space<vmem>>, vector<8x64xf32>
    %148 = arith.maximumf %144, %145 : vector<8x64xf32>
    %149 = arith.maximumf %146, %147 : vector<8x64xf32>
    %150 = arith.maximumf %148, %149 : vector<8x64xf32>
    %c61 = arith.constant 61 : index
    %c0_146 = arith.constant 0 : index
    %151 = vector.load %arg13[%c61, %c0_146] : memref<110x64xf32, #tpu.memory_space<vmem>>, vector<8x64xf32>
    tpu.vector_store %arg13[%c61, %c0_146], %150 {strides = array<i32>} : memref<110x64xf32, #tpu.memory_space<vmem>>, vector<8x64xf32>,
    %c216 = arith.constant 216 : index
    %c0_147 = arith.constant 0 : index
    %152 = tpu.strided_load %arg12[%c216, %c0_147] {strides = array<i32: 2, 1>} : memref<288x64xf32, #tpu.memory_space<vmem>>, vector<8x64xf32>
    %c217_148 = arith.constant 217 : index
    %c0_149 = arith.constant 0 : index
    %153 = tpu.strided_load %arg12[%c217_148, %c0_149] {strides = array<i32: 2, 1>} : memref<288x64xf32, #tpu.memory_space<vmem>>, vector<8x64xf32>
    %c234 = arith.constant 234 : index
    %c0_150 = arith.constant 0 : index
    %154 = tpu.strided_load %arg12[%c234, %c0_150] {strides = array<i32: 2, 1>} : memref<288x64xf32, #tpu.memory_space<vmem>>, vector<8x64xf32>
    %c235_151 = arith.constant 235 : index
    %c0_152 = arith.constant 0 : index
    %155 = tpu.strided_load %arg12[%c235_151, %c0_152] {strides = array<i32: 2, 1>} : memref<288x64xf32, #tpu.memory_space<vmem>>, vector<8x64xf32>
    %156 = arith.maximumf %152, %153 : vector<8x64xf32>
    %157 = arith.maximumf %154, %155 : vector<8x64xf32>
    %158 = arith.maximumf %156, %157 : vector<8x64xf32>
    %c71 = arith.constant 71 : index
    %c0_153 = arith.constant 0 : index
    %159 = vector.load %arg13[%c71, %c0_153] : memref<110x64xf32, #tpu.memory_space<vmem>>, vector<8x64xf32>
    tpu.vector_store %arg13[%c71, %c0_153], %158 {strides = array<i32>} : memref<110x64xf32, #tpu.memory_space<vmem>>, vector<8x64xf32>,
    %c252 = arith.constant 252 : index
    %c0_154 = arith.constant 0 : index
    %160 = tpu.strided_load %arg12[%c252, %c0_154] {strides = array<i32: 2, 1>} : memref<288x64xf32, #tpu.memory_space<vmem>>, vector<8x64xf32>
    %c253_155 = arith.constant 253 : index
    %c0_156 = arith.constant 0 : index
    %161 = tpu.strided_load %arg12[%c253_155, %c0_156] {strides = array<i32: 2, 1>} : memref<288x64xf32, #tpu.memory_space<vmem>>, vector<8x64xf32>
    %c270 = arith.constant 270 : index
    %c0_157 = arith.constant 0 : index
    %162 = tpu.strided_load %arg12[%c270, %c0_157] {strides = array<i32: 2, 1>} : memref<288x64xf32, #tpu.memory_space<vmem>>, vector<8x64xf32>
    %c271_158 = arith.constant 271 : index
    %c0_159 = arith.constant 0 : index
    %163 = tpu.strided_load %arg12[%c271_158, %c0_159] {strides = array<i32: 2, 1>} : memref<288x64xf32, #tpu.memory_space<vmem>>, vector<8x64xf32>
    %164 = arith.maximumf %160, %161 : vector<8x64xf32>
    %165 = arith.maximumf %162, %163 : vector<8x64xf32>
    %166 = arith.maximumf %164, %165 : vector<8x64xf32>
    %c81 = arith.constant 81 : index
    %c0_160 = arith.constant 0 : index
    %167 = vector.load %arg13[%c81, %c0_160] : memref<110x64xf32, #tpu.memory_space<vmem>>, vector<8x64xf32>
    tpu.vector_store %arg13[%c81, %c0_160], %166 {strides = array<i32>} : memref<110x64xf32, #tpu.memory_space<vmem>>, vector<8x64xf32>,
    %cst_161 = arith.constant 0.000000e+00 : f32
    %168 = vector.broadcast %cst_161 : f32 to vector<80x128xf32>
    %c0_162 = arith.constant 0 : index
    %c0_163 = arith.constant 0 : index
    %169 = vector.load %arg13[%c0_162, %c0_163] : memref<110x64xf32, #tpu.memory_space<vmem>>, vector<80x64xf32>
    %c0_164 = arith.constant 0 : index
    %c0_165 = arith.constant 0 : index
    %c0_166 = arith.constant 0 : index
    %170 = vector.load %arg4[%c0_164, %c0_165, %c0_166] : memref<9x64x128xf32, #tpu.memory_space<vmem>>, vector<1x64x128xf32>
    %171 = vector.shape_cast %170 : vector<1x64x128xf32> to vector<64x128xf32>
    %cst_167 = arith.constant dense<0.000000e+00> : vector<80x128xf32>
    %172 = tpu.matmul %169, %171, %cst_167 {dimension_numbers = #tpu.dot_dimension_numbers<[1], [0], [0], [1], [0, 0, 1, 1], [], []>} : vector<80x64xf32>, vector<64x128xf32>, vector<80x128xf32> -> vector<80x128xf32>
    %173 = arith.addf %168, %172 : vector<80x128xf32>
    %c1_168 = arith.constant 1 : index
    %c0_169 = arith.constant 0 : index
    %174 = vector.load %arg13[%c1_168, %c0_169] : memref<110x64xf32, #tpu.memory_space<vmem>>, vector<80x64xf32>
    %c1_170 = arith.constant 1 : index
    %c0_171 = arith.constant 0 : index
    %c0_172 = arith.constant 0 : index
    %175 = vector.load %arg4[%c1_170, %c0_171, %c0_172] : memref<9x64x128xf32, #tpu.memory_space<vmem>>, vector<1x64x128xf32>
    %176 = vector.shape_cast %175 : vector<1x64x128xf32> to vector<64x128xf32>
    %cst_173 = arith.constant dense<0.000000e+00> : vector<80x128xf32>
    %177 = tpu.matmul %174, %176, %cst_173 {dimension_numbers = #tpu.dot_dimension_numbers<[1], [0], [0], [1], [0, 0, 1, 1], [], []>} : vector<80x64xf32>, vector<64x128xf32>, vector<80x128xf32> -> vector<80x128xf32>
    %178 = arith.addf %173, %177 : vector<80x128xf32>
    %c2_174 = arith.constant 2 : index
    %c0_175 = arith.constant 0 : index
    %179 = vector.load %arg13[%c2_174, %c0_175] : memref<110x64xf32, #tpu.memory_space<vmem>>, vector<80x64xf32>
    %c2_176 = arith.constant 2 : index
    %c0_177 = arith.constant 0 : index
    %c0_178 = arith.constant 0 : index
    %180 = vector.load %arg4[%c2_176, %c0_177, %c0_178] : memref<9x64x128xf32, #tpu.memory_space<vmem>>, vector<1x64x128xf32>
    %181 = vector.shape_cast %180 : vector<1x64x128xf32> to vector<64x128xf32>
    %cst_179 = arith.constant dense<0.000000e+00> : vector<80x128xf32>
    %182 = tpu.matmul %179, %181, %cst_179 {dimension_numbers = #tpu.dot_dimension_numbers<[1], [0], [0], [1], [0, 0, 1, 1], [], []>} : vector<80x64xf32>, vector<64x128xf32>, vector<80x128xf32> -> vector<80x128xf32>
    %183 = arith.addf %178, %182 : vector<80x128xf32>
    %c10 = arith.constant 10 : index
    %c0_180 = arith.constant 0 : index
    %184 = vector.load %arg13[%c10, %c0_180] : memref<110x64xf32, #tpu.memory_space<vmem>>, vector<80x64xf32>
    %c3_181 = arith.constant 3 : index
    %c0_182 = arith.constant 0 : index
    %c0_183 = arith.constant 0 : index
    %185 = vector.load %arg4[%c3_181, %c0_182, %c0_183] : memref<9x64x128xf32, #tpu.memory_space<vmem>>, vector<1x64x128xf32>
    %186 = vector.shape_cast %185 : vector<1x64x128xf32> to vector<64x128xf32>
    %cst_184 = arith.constant dense<0.000000e+00> : vector<80x128xf32>
    %187 = tpu.matmul %184, %186, %cst_184 {dimension_numbers = #tpu.dot_dimension_numbers<[1], [0], [0], [1], [0, 0, 1, 1], [], []>} : vector<80x64xf32>, vector<64x128xf32>, vector<80x128xf32> -> vector<80x128xf32>
    %188 = arith.addf %183, %187 : vector<80x128xf32>
    %c11_185 = arith.constant 11 : index
    %c0_186 = arith.constant 0 : index
    %189 = vector.load %arg13[%c11_185, %c0_186] : memref<110x64xf32, #tpu.memory_space<vmem>>, vector<80x64xf32>
    %c4_187 = arith.constant 4 : index
    %c0_188 = arith.constant 0 : index
    %c0_189 = arith.constant 0 : index
    %190 = vector.load %arg4[%c4_187, %c0_188, %c0_189] : memref<9x64x128xf32, #tpu.memory_space<vmem>>, vector<1x64x128xf32>
    %191 = vector.shape_cast %190 : vector<1x64x128xf32> to vector<64x128xf32>
    %cst_190 = arith.constant dense<0.000000e+00> : vector<80x128xf32>
    %192 = tpu.matmul %189, %191, %cst_190 {dimension_numbers = #tpu.dot_dimension_numbers<[1], [0], [0], [1], [0, 0, 1, 1], [], []>} : vector<80x64xf32>, vector<64x128xf32>, vector<80x128xf32> -> vector<80x128xf32>
    %193 = arith.addf %188, %192 : vector<80x128xf32>
    %c12 = arith.constant 12 : index
    %c0_191 = arith.constant 0 : index
    %194 = vector.load %arg13[%c12, %c0_191] : memref<110x64xf32, #tpu.memory_space<vmem>>, vector<80x64xf32>
    %c5_192 = arith.constant 5 : index
    %c0_193 = arith.constant 0 : index
    %c0_194 = arith.constant 0 : index
    %195 = vector.load %arg4[%c5_192, %c0_193, %c0_194] : memref<9x64x128xf32, #tpu.memory_space<vmem>>, vector<1x64x128xf32>
    %196 = vector.shape_cast %195 : vector<1x64x128xf32> to vector<64x128xf32>
    %cst_195 = arith.constant dense<0.000000e+00> : vector<80x128xf32>
    %197 = tpu.matmul %194, %196, %cst_195 {dimension_numbers = #tpu.dot_dimension_numbers<[1], [0], [0], [1], [0, 0, 1, 1], [], []>} : vector<80x64xf32>, vector<64x128xf32>, vector<80x128xf32> -> vector<80x128xf32>
    %198 = arith.addf %193, %197 : vector<80x128xf32>
    %c20_196 = arith.constant 20 : index
    %c0_197 = arith.constant 0 : index
    %199 = vector.load %arg13[%c20_196, %c0_197] : memref<110x64xf32, #tpu.memory_space<vmem>>, vector<80x64xf32>
    %c6_198 = arith.constant 6 : index
    %c0_199 = arith.constant 0 : index
    %c0_200 = arith.constant 0 : index
    %200 = vector.load %arg4[%c6_198, %c0_199, %c0_200] : memref<9x64x128xf32, #tpu.memory_space<vmem>>, vector<1x64x128xf32>
    %201 = vector.shape_cast %200 : vector<1x64x128xf32> to vector<64x128xf32>
    %cst_201 = arith.constant dense<0.000000e+00> : vector<80x128xf32>
    %202 = tpu.matmul %199, %201, %cst_201 {dimension_numbers = #tpu.dot_dimension_numbers<[1], [0], [0], [1], [0, 0, 1, 1], [], []>} : vector<80x64xf32>, vector<64x128xf32>, vector<80x128xf32> -> vector<80x128xf32>
    %203 = arith.addf %198, %202 : vector<80x128xf32>
    %c21_202 = arith.constant 21 : index
    %c0_203 = arith.constant 0 : index
    %204 = vector.load %arg13[%c21_202, %c0_203] : memref<110x64xf32, #tpu.memory_space<vmem>>, vector<80x64xf32>
    %c7_204 = arith.constant 7 : index
    %c0_205 = arith.constant 0 : index
    %c0_206 = arith.constant 0 : index
    %205 = vector.load %arg4[%c7_204, %c0_205, %c0_206] : memref<9x64x128xf32, #tpu.memory_space<vmem>>, vector<1x64x128xf32>
    %206 = vector.shape_cast %205 : vector<1x64x128xf32> to vector<64x128xf32>
    %cst_207 = arith.constant dense<0.000000e+00> : vector<80x128xf32>
    %207 = tpu.matmul %204, %206, %cst_207 {dimension_numbers = #tpu.dot_dimension_numbers<[1], [0], [0], [1], [0, 0, 1, 1], [], []>} : vector<80x64xf32>, vector<64x128xf32>, vector<80x128xf32> -> vector<80x128xf32>
    %208 = arith.addf %203, %207 : vector<80x128xf32>
    %c22 = arith.constant 22 : index
    %c0_208 = arith.constant 0 : index
    %209 = vector.load %arg13[%c22, %c0_208] : memref<110x64xf32, #tpu.memory_space<vmem>>, vector<80x64xf32>
    %c8_209 = arith.constant 8 : index
    %c0_210 = arith.constant 0 : index
    %c0_211 = arith.constant 0 : index
    %210 = vector.load %arg4[%c8_209, %c0_210, %c0_211] : memref<9x64x128xf32, #tpu.memory_space<vmem>>, vector<1x64x128xf32>
    %211 = vector.shape_cast %210 : vector<1x64x128xf32> to vector<64x128xf32>
    %cst_212 = arith.constant dense<0.000000e+00> : vector<80x128xf32>
    %212 = tpu.matmul %209, %211, %cst_212 {dimension_numbers = #tpu.dot_dimension_numbers<[1], [0], [0], [1], [0, 0, 1, 1], [], []>} : vector<80x64xf32>, vector<64x128xf32>, vector<80x128xf32> -> vector<80x128xf32>
    %213 = arith.addf %208, %212 : vector<80x128xf32>
    %c0_213 = arith.constant 0 : index
    %c0_214 = arith.constant 0 : index
    %214 = vector.load %arg5[%c0_213, %c0_214] : memref<1x128xf32, #tpu.memory_space<vmem>>, vector<1x128xf32>
    %215 = vector.broadcast %214 : vector<1x128xf32> to vector<80x128xf32>
    %216 = arith.addf %213, %215 : vector<80x128xf32>
    %cst_215 = arith.constant 0.000000e+00 : f32
    %217 = vector.broadcast %cst_215 : f32 to vector<80x128xf32>
    %218 = arith.maximumf %216, %217 : vector<80x128xf32>
    %c0_216 = arith.constant 0 : index
    %c0_217 = arith.constant 0 : index
    %219 = vector.load %arg14[%c0_216, %c0_217] : memref<80x128xf32, #tpu.memory_space<vmem>>, vector<80x128xf32>
    tpu.vector_store %arg14[%c0_216, %c0_217], %218 {strides = array<i32>} : memref<80x128xf32, #tpu.memory_space<vmem>>, vector<80x128xf32>,
    %c0_218 = arith.constant 0 : index
    %c0_219 = arith.constant 0 : index
    %220 = tpu.strided_load %arg14[%c0_218, %c0_219] {strides = array<i32: 2, 1>} : memref<80x128xf32, #tpu.memory_space<vmem>>, vector<4x128xf32>
    %c1_220 = arith.constant 1 : index
    %c0_221 = arith.constant 0 : index
    %221 = tpu.strided_load %arg14[%c1_220, %c0_221] {strides = array<i32: 2, 1>} : memref<80x128xf32, #tpu.memory_space<vmem>>, vector<4x128xf32>
    %c10_222 = arith.constant 10 : index
    %c0_223 = arith.constant 0 : index
    %222 = tpu.strided_load %arg14[%c10_222, %c0_223] {strides = array<i32: 2, 1>} : memref<80x128xf32, #tpu.memory_space<vmem>>, vector<4x128xf32>
    %c11_224 = arith.constant 11 : index
    %c0_225 = arith.constant 0 : index
    %223 = tpu.strided_load %arg14[%c11_224, %c0_225] {strides = array<i32: 2, 1>} : memref<80x128xf32, #tpu.memory_space<vmem>>, vector<4x128xf32>
    %224 = arith.maximumf %220, %221 : vector<4x128xf32>
    %225 = arith.maximumf %222, %223 : vector<4x128xf32>
    %226 = arith.maximumf %224, %225 : vector<4x128xf32>
    %c0_226 = arith.constant 0 : index
    %c0_227 = arith.constant 0 : index
    %227 = vector.load %arg15[%c0_226, %c0_227] : memref<16x128xf32, #tpu.memory_space<vmem>>, vector<4x128xf32>
    tpu.vector_store %arg15[%c0_226, %c0_227], %226 {strides = array<i32>} : memref<16x128xf32, #tpu.memory_space<vmem>>, vector<4x128xf32>,
    %c20_228 = arith.constant 20 : index
    %c0_229 = arith.constant 0 : index
    %228 = tpu.strided_load %arg14[%c20_228, %c0_229] {strides = array<i32: 2, 1>} : memref<80x128xf32, #tpu.memory_space<vmem>>, vector<4x128xf32>
    %c21_230 = arith.constant 21 : index
    %c0_231 = arith.constant 0 : index
    %229 = tpu.strided_load %arg14[%c21_230, %c0_231] {strides = array<i32: 2, 1>} : memref<80x128xf32, #tpu.memory_space<vmem>>, vector<4x128xf32>
    %c30 = arith.constant 30 : index
    %c0_232 = arith.constant 0 : index
    %230 = tpu.strided_load %arg14[%c30, %c0_232] {strides = array<i32: 2, 1>} : memref<80x128xf32, #tpu.memory_space<vmem>>, vector<4x128xf32>
    %c31_233 = arith.constant 31 : index
    %c0_234 = arith.constant 0 : index
    %231 = tpu.strided_load %arg14[%c31_233, %c0_234] {strides = array<i32: 2, 1>} : memref<80x128xf32, #tpu.memory_space<vmem>>, vector<4x128xf32>
    %232 = arith.maximumf %228, %229 : vector<4x128xf32>
    %233 = arith.maximumf %230, %231 : vector<4x128xf32>
    %234 = arith.maximumf %232, %233 : vector<4x128xf32>
    %c4_235 = arith.constant 4 : index
    %c0_236 = arith.constant 0 : index
    %235 = vector.load %arg15[%c4_235, %c0_236] : memref<16x128xf32, #tpu.memory_space<vmem>>, vector<4x128xf32>
    tpu.vector_store %arg15[%c4_235, %c0_236], %234 {strides = array<i32>} : memref<16x128xf32, #tpu.memory_space<vmem>>, vector<4x128xf32>,
    %c40 = arith.constant 40 : index
    %c0_237 = arith.constant 0 : index
    %236 = tpu.strided_load %arg14[%c40, %c0_237] {strides = array<i32: 2, 1>} : memref<80x128xf32, #tpu.memory_space<vmem>>, vector<4x128xf32>
    %c41_238 = arith.constant 41 : index
    %c0_239 = arith.constant 0 : index
    %237 = tpu.strided_load %arg14[%c41_238, %c0_239] {strides = array<i32: 2, 1>} : memref<80x128xf32, #tpu.memory_space<vmem>>, vector<4x128xf32>
    %c50 = arith.constant 50 : index
    %c0_240 = arith.constant 0 : index
    %238 = tpu.strided_load %arg14[%c50, %c0_240] {strides = array<i32: 2, 1>} : memref<80x128xf32, #tpu.memory_space<vmem>>, vector<4x128xf32>
    %c51_241 = arith.constant 51 : index
    %c0_242 = arith.constant 0 : index
    %239 = tpu.strided_load %arg14[%c51_241, %c0_242] {strides = array<i32: 2, 1>} : memref<80x128xf32, #tpu.memory_space<vmem>>, vector<4x128xf32>
    %240 = arith.maximumf %236, %237 : vector<4x128xf32>
    %241 = arith.maximumf %238, %239 : vector<4x128xf32>
    %242 = arith.maximumf %240, %241 : vector<4x128xf32>
    %c8_243 = arith.constant 8 : index
    %c0_244 = arith.constant 0 : index
    %243 = vector.load %arg15[%c8_243, %c0_244] : memref<16x128xf32, #tpu.memory_space<vmem>>, vector<4x128xf32>
    tpu.vector_store %arg15[%c8_243, %c0_244], %242 {strides = array<i32>} : memref<16x128xf32, #tpu.memory_space<vmem>>, vector<4x128xf32>,
    %c60 = arith.constant 60 : index
    %c0_245 = arith.constant 0 : index
    %244 = tpu.strided_load %arg14[%c60, %c0_245] {strides = array<i32: 2, 1>} : memref<80x128xf32, #tpu.memory_space<vmem>>, vector<4x128xf32>
    %c61_246 = arith.constant 61 : index
    %c0_247 = arith.constant 0 : index
    %245 = tpu.strided_load %arg14[%c61_246, %c0_247] {strides = array<i32: 2, 1>} : memref<80x128xf32, #tpu.memory_space<vmem>>, vector<4x128xf32>
    %c70 = arith.constant 70 : index
    %c0_248 = arith.constant 0 : index
    %246 = tpu.strided_load %arg14[%c70, %c0_248] {strides = array<i32: 2, 1>} : memref<80x128xf32, #tpu.memory_space<vmem>>, vector<4x128xf32>
    %c71_249 = arith.constant 71 : index
    %c0_250 = arith.constant 0 : index
    %247 = tpu.strided_load %arg14[%c71_249, %c0_250] {strides = array<i32: 2, 1>} : memref<80x128xf32, #tpu.memory_space<vmem>>, vector<4x128xf32>
    %248 = arith.maximumf %244, %245 : vector<4x128xf32>
    %249 = arith.maximumf %246, %247 : vector<4x128xf32>
    %250 = arith.maximumf %248, %249 : vector<4x128xf32>
    %c12_251 = arith.constant 12 : index
    %c0_252 = arith.constant 0 : index
    %251 = vector.load %arg15[%c12_251, %c0_252] : memref<16x128xf32, #tpu.memory_space<vmem>>, vector<4x128xf32>
    tpu.vector_store %arg15[%c12_251, %c0_252], %250 {strides = array<i32>} : memref<16x128xf32, #tpu.memory_space<vmem>>, vector<4x128xf32>,
    %c0_253 = arith.constant 0 : index
    %c0_254 = arith.constant 0 : index
    %252 = vector.load %arg15[%c0_253, %c0_254] : memref<16x128xf32, #tpu.memory_space<vmem>>, vector<16x128xf32>
    %c0_255 = arith.constant 0 : index
    %c0_256 = arith.constant 0 : index
    %c0_257 = arith.constant 0 : index
    %253 = vector.load %arg6[%c0_255, %c0_256, %c0_257] : memref<4x128x64xf32, #tpu.memory_space<vmem>>, vector<1x128x64xf32>
    %254 = vector.shape_cast %253 : vector<1x128x64xf32> to vector<128x64xf32>
    %cst_258 = arith.constant dense<0.000000e+00> : vector<16x64xf32>
    %255 = tpu.matmul %252, %254, %cst_258 {dimension_numbers = #tpu.dot_dimension_numbers<[1], [0], [0], [1], [0, 0, 1, 1], [], []>} : vector<16x128xf32>, vector<128x64xf32>, vector<16x64xf32> -> vector<16x64xf32>
    %c0_259 = arith.constant 0 : index
    %c0_260 = arith.constant 0 : index
    %256 = vector.load %arg7[%c0_259, %c0_260] : memref<1x64xf32, #tpu.memory_space<vmem>>, vector<1x64xf32>
    %257 = vector.broadcast %256 : vector<1x64xf32> to vector<16x64xf32>
    %258 = arith.addf %255, %257 : vector<16x64xf32>
    %cst_261 = arith.constant 0.000000e+00 : f32
    %259 = vector.broadcast %cst_261 : f32 to vector<16x64xf32>
    %260 = arith.maximumf %258, %259 : vector<16x64xf32>
    %c0_262 = arith.constant 0 : index
    %c0_263 = arith.constant 0 : index
    %c0_264 = arith.constant 0 : index
    %261 = vector.load %arg8[%c0_262, %c0_263, %c0_264] : memref<4x64x4xf32, #tpu.memory_space<vmem>>, vector<1x64x4xf32>
    %262 = vector.shape_cast %261 : vector<1x64x4xf32> to vector<64x4xf32>
    %cst_265 = arith.constant dense<0.000000e+00> : vector<16x4xf32>
    %263 = tpu.matmul %260, %262, %cst_265 {dimension_numbers = #tpu.dot_dimension_numbers<[1], [0], [0], [1], [0, 0, 1, 1], [], []>} : vector<16x64xf32>, vector<64x4xf32>, vector<16x4xf32> -> vector<16x4xf32>
    %c0_266 = arith.constant 0 : index
    %c0_267 = arith.constant 0 : index
    %264 = vector.load %arg9[%c0_266, %c0_267] : memref<1x4xf32, #tpu.memory_space<vmem>>, vector<1x4xf32>
    %265 = vector.broadcast %264 : vector<1x4xf32> to vector<16x4xf32>
    %266 = arith.addf %263, %265 : vector<16x4xf32>
    %c0_268 = arith.constant 0 : index
    %c0_269 = arith.constant 0 : index
    %c0_270 = arith.constant 0 : index
    %c0_271 = arith.constant 0 : index
    %267 = vector.load %arg10[%c0_268, %c0_269, %c0_270, %c0_271] : memref<1x16x16x4xf32, #tpu.memory_space<vmem>>, vector<1x1x16x4xf32>
    %268 = vector.shape_cast %267 : vector<1x1x16x4xf32> to vector<16x4xf32>
    %269 = vector.shape_cast %266 : vector<16x4xf32> to vector<1x1x16x4xf32>
    tpu.vector_store %arg10[%c0_268, %c0_269, %c0_270, %c0_271], %269 {strides = array<i32>} : memref<1x16x16x4xf32, #tpu.memory_space<vmem>>, vector<1x1x16x4xf32>,
    %c1_272 = arith.constant 1 : index
    %c0_273 = arith.constant 0 : index
    %c0_274 = arith.constant 0 : index
    %270 = vector.load %arg8[%c1_272, %c0_273, %c0_274] : memref<4x64x4xf32, #tpu.memory_space<vmem>>, vector<1x64x4xf32>
    %271 = vector.shape_cast %270 : vector<1x64x4xf32> to vector<64x4xf32>
    %cst_275 = arith.constant dense<0.000000e+00> : vector<16x4xf32>
    %272 = tpu.matmul %260, %271, %cst_275 {dimension_numbers = #tpu.dot_dimension_numbers<[1], [0], [0], [1], [0, 0, 1, 1], [], []>} : vector<16x64xf32>, vector<64x4xf32>, vector<16x4xf32> -> vector<16x4xf32>
    %c0_276 = arith.constant 0 : index
    %c0_277 = arith.constant 0 : index
    %273 = vector.load %arg9[%c0_276, %c0_277] : memref<1x4xf32, #tpu.memory_space<vmem>>, vector<1x4xf32>
    %274 = vector.broadcast %273 : vector<1x4xf32> to vector<16x4xf32>
    %275 = arith.addf %272, %274 : vector<16x4xf32>
    %c0_278 = arith.constant 0 : index
    %c1_279 = arith.constant 1 : index
    %c0_280 = arith.constant 0 : index
    %c0_281 = arith.constant 0 : index
    %276 = vector.load %arg10[%c0_278, %c1_279, %c0_280, %c0_281] : memref<1x16x16x4xf32, #tpu.memory_space<vmem>>, vector<1x1x16x4xf32>
    %277 = vector.shape_cast %276 : vector<1x1x16x4xf32> to vector<16x4xf32>
    %278 = vector.shape_cast %275 : vector<16x4xf32> to vector<1x1x16x4xf32>
    tpu.vector_store %arg10[%c0_278, %c1_279, %c0_280, %c0_281], %278 {strides = array<i32>} : memref<1x16x16x4xf32, #tpu.memory_space<vmem>>, vector<1x1x16x4xf32>,
    %c2_282 = arith.constant 2 : index
    %c0_283 = arith.constant 0 : index
    %c0_284 = arith.constant 0 : index
    %279 = vector.load %arg8[%c2_282, %c0_283, %c0_284] : memref<4x64x4xf32, #tpu.memory_space<vmem>>, vector<1x64x4xf32>
    %280 = vector.shape_cast %279 : vector<1x64x4xf32> to vector<64x4xf32>
    %cst_285 = arith.constant dense<0.000000e+00> : vector<16x4xf32>
    %281 = tpu.matmul %260, %280, %cst_285 {dimension_numbers = #tpu.dot_dimension_numbers<[1], [0], [0], [1], [0, 0, 1, 1], [], []>} : vector<16x64xf32>, vector<64x4xf32>, vector<16x4xf32> -> vector<16x4xf32>
    %c0_286 = arith.constant 0 : index
    %c0_287 = arith.constant 0 : index
    %282 = vector.load %arg9[%c0_286, %c0_287] : memref<1x4xf32, #tpu.memory_space<vmem>>, vector<1x4xf32>
    %283 = vector.broadcast %282 : vector<1x4xf32> to vector<16x4xf32>
    %284 = arith.addf %281, %283 : vector<16x4xf32>
    %c0_288 = arith.constant 0 : index
    %c4_289 = arith.constant 4 : index
    %c0_290 = arith.constant 0 : index
    %c0_291 = arith.constant 0 : index
    %285 = vector.load %arg10[%c0_288, %c4_289, %c0_290, %c0_291] : memref<1x16x16x4xf32, #tpu.memory_space<vmem>>, vector<1x1x16x4xf32>
    %286 = vector.shape_cast %285 : vector<1x1x16x4xf32> to vector<16x4xf32>
    %287 = vector.shape_cast %284 : vector<16x4xf32> to vector<1x1x16x4xf32>
    tpu.vector_store %arg10[%c0_288, %c4_289, %c0_290, %c0_291], %287 {strides = array<i32>} : memref<1x16x16x4xf32, #tpu.memory_space<vmem>>, vector<1x1x16x4xf32>,
    %c3_292 = arith.constant 3 : index
    %c0_293 = arith.constant 0 : index
    %c0_294 = arith.constant 0 : index
    %288 = vector.load %arg8[%c3_292, %c0_293, %c0_294] : memref<4x64x4xf32, #tpu.memory_space<vmem>>, vector<1x64x4xf32>
    %289 = vector.shape_cast %288 : vector<1x64x4xf32> to vector<64x4xf32>
    %cst_295 = arith.constant dense<0.000000e+00> : vector<16x4xf32>
    %290 = tpu.matmul %260, %289, %cst_295 {dimension_numbers = #tpu.dot_dimension_numbers<[1], [0], [0], [1], [0, 0, 1, 1], [], []>} : vector<16x64xf32>, vector<64x4xf32>, vector<16x4xf32> -> vector<16x4xf32>
    %c0_296 = arith.constant 0 : index
    %c0_297 = arith.constant 0 : index
    %291 = vector.load %arg9[%c0_296, %c0_297] : memref<1x4xf32, #tpu.memory_space<vmem>>, vector<1x4xf32>
    %292 = vector.broadcast %291 : vector<1x4xf32> to vector<16x4xf32>
    %293 = arith.addf %290, %292 : vector<16x4xf32>
    %c0_298 = arith.constant 0 : index
    %c5_299 = arith.constant 5 : index
    %c0_300 = arith.constant 0 : index
    %c0_301 = arith.constant 0 : index
    %294 = vector.load %arg10[%c0_298, %c5_299, %c0_300, %c0_301] : memref<1x16x16x4xf32, #tpu.memory_space<vmem>>, vector<1x1x16x4xf32>
    %295 = vector.shape_cast %294 : vector<1x1x16x4xf32> to vector<16x4xf32>
    %296 = vector.shape_cast %293 : vector<16x4xf32> to vector<1x1x16x4xf32>
    tpu.vector_store %arg10[%c0_298, %c5_299, %c0_300, %c0_301], %296 {strides = array<i32>} : memref<1x16x16x4xf32, #tpu.memory_space<vmem>>, vector<1x1x16x4xf32>,
    %c1_302 = arith.constant 1 : index
    %c0_303 = arith.constant 0 : index
    %c0_304 = arith.constant 0 : index
    %297 = vector.load %arg6[%c1_302, %c0_303, %c0_304] : memref<4x128x64xf32, #tpu.memory_space<vmem>>, vector<1x128x64xf32>
    %298 = vector.shape_cast %297 : vector<1x128x64xf32> to vector<128x64xf32>
    %cst_305 = arith.constant dense<0.000000e+00> : vector<16x64xf32>
    %299 = tpu.matmul %252, %298, %cst_305 {dimension_numbers = #tpu.dot_dimension_numbers<[1], [0], [0], [1], [0, 0, 1, 1], [], []>} : vector<16x128xf32>, vector<128x64xf32>, vector<16x64xf32> -> vector<16x64xf32>
    %c0_306 = arith.constant 0 : index
    %c0_307 = arith.constant 0 : index
    %300 = vector.load %arg7[%c0_306, %c0_307] : memref<1x64xf32, #tpu.memory_space<vmem>>, vector<1x64xf32>
    %301 = vector.broadcast %300 : vector<1x64xf32> to vector<16x64xf32>
    %302 = arith.addf %299, %301 : vector<16x64xf32>
    %cst_308 = arith.constant 0.000000e+00 : f32
    %303 = vector.broadcast %cst_308 : f32 to vector<16x64xf32>
    %304 = arith.maximumf %302, %303 : vector<16x64xf32>
    %c0_309 = arith.constant 0 : index
    %c0_310 = arith.constant 0 : index
    %c0_311 = arith.constant 0 : index
    %305 = vector.load %arg8[%c0_309, %c0_310, %c0_311] : memref<4x64x4xf32, #tpu.memory_space<vmem>>, vector<1x64x4xf32>
    %306 = vector.shape_cast %305 : vector<1x64x4xf32> to vector<64x4xf32>
    %cst_312 = arith.constant dense<0.000000e+00> : vector<16x4xf32>
    %307 = tpu.matmul %304, %306, %cst_312 {dimension_numbers = #tpu.dot_dimension_numbers<[1], [0], [0], [1], [0, 0, 1, 1], [], []>} : vector<16x64xf32>, vector<64x4xf32>, vector<16x4xf32> -> vector<16x4xf32>
    %c0_313 = arith.constant 0 : index
    %c0_314 = arith.constant 0 : index
    %308 = vector.load %arg9[%c0_313, %c0_314] : memref<1x4xf32, #tpu.memory_space<vmem>>, vector<1x4xf32>
    %309 = vector.broadcast %308 : vector<1x4xf32> to vector<16x4xf32>
    %310 = arith.addf %307, %309 : vector<16x4xf32>
    %c0_315 = arith.constant 0 : index
    %c2_316 = arith.constant 2 : index
    %c0_317 = arith.constant 0 : index
    %c0_318 = arith.constant 0 : index
    %311 = vector.load %arg10[%c0_315, %c2_316, %c0_317, %c0_318] : memref<1x16x16x4xf32, #tpu.memory_space<vmem>>, vector<1x1x16x4xf32>
    %312 = vector.shape_cast %311 : vector<1x1x16x4xf32> to vector<16x4xf32>
    %313 = vector.shape_cast %310 : vector<16x4xf32> to vector<1x1x16x4xf32>
    tpu.vector_store %arg10[%c0_315, %c2_316, %c0_317, %c0_318], %313 {strides = array<i32>} : memref<1x16x16x4xf32, #tpu.memory_space<vmem>>, vector<1x1x16x4xf32>,
    %c1_319 = arith.constant 1 : index
    %c0_320 = arith.constant 0 : index
    %c0_321 = arith.constant 0 : index
    %314 = vector.load %arg8[%c1_319, %c0_320, %c0_321] : memref<4x64x4xf32, #tpu.memory_space<vmem>>, vector<1x64x4xf32>
    %315 = vector.shape_cast %314 : vector<1x64x4xf32> to vector<64x4xf32>
    %cst_322 = arith.constant dense<0.000000e+00> : vector<16x4xf32>
    %316 = tpu.matmul %304, %315, %cst_322 {dimension_numbers = #tpu.dot_dimension_numbers<[1], [0], [0], [1], [0, 0, 1, 1], [], []>} : vector<16x64xf32>, vector<64x4xf32>, vector<16x4xf32> -> vector<16x4xf32>
    %c0_323 = arith.constant 0 : index
    %c0_324 = arith.constant 0 : index
    %317 = vector.load %arg9[%c0_323, %c0_324] : memref<1x4xf32, #tpu.memory_space<vmem>>, vector<1x4xf32>
    %318 = vector.broadcast %317 : vector<1x4xf32> to vector<16x4xf32>
    %319 = arith.addf %316, %318 : vector<16x4xf32>
    %c0_325 = arith.constant 0 : index
    %c3_326 = arith.constant 3 : index
    %c0_327 = arith.constant 0 : index
    %c0_328 = arith.constant 0 : index
    %320 = vector.load %arg10[%c0_325, %c3_326, %c0_327, %c0_328] : memref<1x16x16x4xf32, #tpu.memory_space<vmem>>, vector<1x1x16x4xf32>
    %321 = vector.shape_cast %320 : vector<1x1x16x4xf32> to vector<16x4xf32>
    %322 = vector.shape_cast %319 : vector<16x4xf32> to vector<1x1x16x4xf32>
    tpu.vector_store %arg10[%c0_325, %c3_326, %c0_327, %c0_328], %322 {strides = array<i32>} : memref<1x16x16x4xf32, #tpu.memory_space<vmem>>, vector<1x1x16x4xf32>,
    %c2_329 = arith.constant 2 : index
    %c0_330 = arith.constant 0 : index
    %c0_331 = arith.constant 0 : index
    %323 = vector.load %arg8[%c2_329, %c0_330, %c0_331] : memref<4x64x4xf32, #tpu.memory_space<vmem>>, vector<1x64x4xf32>
    %324 = vector.shape_cast %323 : vector<1x64x4xf32> to vector<64x4xf32>
    %cst_332 = arith.constant dense<0.000000e+00> : vector<16x4xf32>
    %325 = tpu.matmul %304, %324, %cst_332 {dimension_numbers = #tpu.dot_dimension_numbers<[1], [0], [0], [1], [0, 0, 1, 1], [], []>} : vector<16x64xf32>, vector<64x4xf32>, vector<16x4xf32> -> vector<16x4xf32>
    %c0_333 = arith.constant 0 : index
    %c0_334 = arith.constant 0 : index
    %326 = vector.load %arg9[%c0_333, %c0_334] : memref<1x4xf32, #tpu.memory_space<vmem>>, vector<1x4xf32>
    %327 = vector.broadcast %326 : vector<1x4xf32> to vector<16x4xf32>
    %328 = arith.addf %325, %327 : vector<16x4xf32>
    %c0_335 = arith.constant 0 : index
    %c6_336 = arith.constant 6 : index
    %c0_337 = arith.constant 0 : index
    %c0_338 = arith.constant 0 : index
    %329 = vector.load %arg10[%c0_335, %c6_336, %c0_337, %c0_338] : memref<1x16x16x4xf32, #tpu.memory_space<vmem>>, vector<1x1x16x4xf32>
    %330 = vector.shape_cast %329 : vector<1x1x16x4xf32> to vector<16x4xf32>
    %331 = vector.shape_cast %328 : vector<16x4xf32> to vector<1x1x16x4xf32>
    tpu.vector_store %arg10[%c0_335, %c6_336, %c0_337, %c0_338], %331 {strides = array<i32>} : memref<1x16x16x4xf32, #tpu.memory_space<vmem>>, vector<1x1x16x4xf32>,
    %c3_339 = arith.constant 3 : index
    %c0_340 = arith.constant 0 : index
    %c0_341 = arith.constant 0 : index
    %332 = vector.load %arg8[%c3_339, %c0_340, %c0_341] : memref<4x64x4xf32, #tpu.memory_space<vmem>>, vector<1x64x4xf32>
    %333 = vector.shape_cast %332 : vector<1x64x4xf32> to vector<64x4xf32>
    %cst_342 = arith.constant dense<0.000000e+00> : vector<16x4xf32>
    %334 = tpu.matmul %304, %333, %cst_342 {dimension_numbers = #tpu.dot_dimension_numbers<[1], [0], [0], [1], [0, 0, 1, 1], [], []>} : vector<16x64xf32>, vector<64x4xf32>, vector<16x4xf32> -> vector<16x4xf32>
    %c0_343 = arith.constant 0 : index
    %c0_344 = arith.constant 0 : index
    %335 = vector.load %arg9[%c0_343, %c0_344] : memref<1x4xf32, #tpu.memory_space<vmem>>, vector<1x4xf32>
    %336 = vector.broadcast %335 : vector<1x4xf32> to vector<16x4xf32>
    %337 = arith.addf %334, %336 : vector<16x4xf32>
    %c0_345 = arith.constant 0 : index
    %c7_346 = arith.constant 7 : index
    %c0_347 = arith.constant 0 : index
    %c0_348 = arith.constant 0 : index
    %338 = vector.load %arg10[%c0_345, %c7_346, %c0_347, %c0_348] : memref<1x16x16x4xf32, #tpu.memory_space<vmem>>, vector<1x1x16x4xf32>
    %339 = vector.shape_cast %338 : vector<1x1x16x4xf32> to vector<16x4xf32>
    %340 = vector.shape_cast %337 : vector<16x4xf32> to vector<1x1x16x4xf32>
    tpu.vector_store %arg10[%c0_345, %c7_346, %c0_347, %c0_348], %340 {strides = array<i32>} : memref<1x16x16x4xf32, #tpu.memory_space<vmem>>, vector<1x1x16x4xf32>,
    %c2_349 = arith.constant 2 : index
    %c0_350 = arith.constant 0 : index
    %c0_351 = arith.constant 0 : index
    %341 = vector.load %arg6[%c2_349, %c0_350, %c0_351] : memref<4x128x64xf32, #tpu.memory_space<vmem>>, vector<1x128x64xf32>
    %342 = vector.shape_cast %341 : vector<1x128x64xf32> to vector<128x64xf32>
    %cst_352 = arith.constant dense<0.000000e+00> : vector<16x64xf32>
    %343 = tpu.matmul %252, %342, %cst_352 {dimension_numbers = #tpu.dot_dimension_numbers<[1], [0], [0], [1], [0, 0, 1, 1], [], []>} : vector<16x128xf32>, vector<128x64xf32>, vector<16x64xf32> -> vector<16x64xf32>
    %c0_353 = arith.constant 0 : index
    %c0_354 = arith.constant 0 : index
    %344 = vector.load %arg7[%c0_353, %c0_354] : memref<1x64xf32, #tpu.memory_space<vmem>>, vector<1x64xf32>
    %345 = vector.broadcast %344 : vector<1x64xf32> to vector<16x64xf32>
    %346 = arith.addf %343, %345 : vector<16x64xf32>
    %cst_355 = arith.constant 0.000000e+00 : f32
    %347 = vector.broadcast %cst_355 : f32 to vector<16x64xf32>
    %348 = arith.maximumf %346, %347 : vector<16x64xf32>
    %c0_356 = arith.constant 0 : index
    %c0_357 = arith.constant 0 : index
    %c0_358 = arith.constant 0 : index
    %349 = vector.load %arg8[%c0_356, %c0_357, %c0_358] : memref<4x64x4xf32, #tpu.memory_space<vmem>>, vector<1x64x4xf32>
    %350 = vector.shape_cast %349 : vector<1x64x4xf32> to vector<64x4xf32>
    %cst_359 = arith.constant dense<0.000000e+00> : vector<16x4xf32>
    %351 = tpu.matmul %348, %350, %cst_359 {dimension_numbers = #tpu.dot_dimension_numbers<[1], [0], [0], [1], [0, 0, 1, 1], [], []>} : vector<16x64xf32>, vector<64x4xf32>, vector<16x4xf32> -> vector<16x4xf32>
    %c0_360 = arith.constant 0 : index
    %c0_361 = arith.constant 0 : index
    %352 = vector.load %arg9[%c0_360, %c0_361] : memref<1x4xf32, #tpu.memory_space<vmem>>, vector<1x4xf32>
    %353 = vector.broadcast %352 : vector<1x4xf32> to vector<16x4xf32>
    %354 = arith.addf %351, %353 : vector<16x4xf32>
    %c0_362 = arith.constant 0 : index
    %c8_363 = arith.constant 8 : index
    %c0_364 = arith.constant 0 : index
    %c0_365 = arith.constant 0 : index
    %355 = vector.load %arg10[%c0_362, %c8_363, %c0_364, %c0_365] : memref<1x16x16x4xf32, #tpu.memory_space<vmem>>, vector<1x1x16x4xf32>
    %356 = vector.shape_cast %355 : vector<1x1x16x4xf32> to vector<16x4xf32>
    %357 = vector.shape_cast %354 : vector<16x4xf32> to vector<1x1x16x4xf32>
    tpu.vector_store %arg10[%c0_362, %c8_363, %c0_364, %c0_365], %357 {strides = array<i32>} : memref<1x16x16x4xf32, #tpu.memory_space<vmem>>, vector<1x1x16x4xf32>,
    %c1_366 = arith.constant 1 : index
    %c0_367 = arith.constant 0 : index
    %c0_368 = arith.constant 0 : index
    %358 = vector.load %arg8[%c1_366, %c0_367, %c0_368] : memref<4x64x4xf32, #tpu.memory_space<vmem>>, vector<1x64x4xf32>
    %359 = vector.shape_cast %358 : vector<1x64x4xf32> to vector<64x4xf32>
    %cst_369 = arith.constant dense<0.000000e+00> : vector<16x4xf32>
    %360 = tpu.matmul %348, %359, %cst_369 {dimension_numbers = #tpu.dot_dimension_numbers<[1], [0], [0], [1], [0, 0, 1, 1], [], []>} : vector<16x64xf32>, vector<64x4xf32>, vector<16x4xf32> -> vector<16x4xf32>
    %c0_370 = arith.constant 0 : index
    %c0_371 = arith.constant 0 : index
    %361 = vector.load %arg9[%c0_370, %c0_371] : memref<1x4xf32, #tpu.memory_space<vmem>>, vector<1x4xf32>
    %362 = vector.broadcast %361 : vector<1x4xf32> to vector<16x4xf32>
    %363 = arith.addf %360, %362 : vector<16x4xf32>
    %c0_372 = arith.constant 0 : index
    %c9 = arith.constant 9 : index
    %c0_373 = arith.constant 0 : index
    %c0_374 = arith.constant 0 : index
    %364 = vector.load %arg10[%c0_372, %c9, %c0_373, %c0_374] : memref<1x16x16x4xf32, #tpu.memory_space<vmem>>, vector<1x1x16x4xf32>
    %365 = vector.shape_cast %364 : vector<1x1x16x4xf32> to vector<16x4xf32>
    %366 = vector.shape_cast %363 : vector<16x4xf32> to vector<1x1x16x4xf32>
    tpu.vector_store %arg10[%c0_372, %c9, %c0_373, %c0_374], %366 {strides = array<i32>} : memref<1x16x16x4xf32, #tpu.memory_space<vmem>>, vector<1x1x16x4xf32>,
    %c2_375 = arith.constant 2 : index
    %c0_376 = arith.constant 0 : index
    %c0_377 = arith.constant 0 : index
    %367 = vector.load %arg8[%c2_375, %c0_376, %c0_377] : memref<4x64x4xf32, #tpu.memory_space<vmem>>, vector<1x64x4xf32>
    %368 = vector.shape_cast %367 : vector<1x64x4xf32> to vector<64x4xf32>
    %cst_378 = arith.constant dense<0.000000e+00> : vector<16x4xf32>
    %369 = tpu.matmul %348, %368, %cst_378 {dimension_numbers = #tpu.dot_dimension_numbers<[1], [0], [0], [1], [0, 0, 1, 1], [], []>} : vector<16x64xf32>, vector<64x4xf32>, vector<16x4xf32> -> vector<16x4xf32>
    %c0_379 = arith.constant 0 : index
    %c0_380 = arith.constant 0 : index
    %370 = vector.load %arg9[%c0_379, %c0_380] : memref<1x4xf32, #tpu.memory_space<vmem>>, vector<1x4xf32>
    %371 = vector.broadcast %370 : vector<1x4xf32> to vector<16x4xf32>
    %372 = arith.addf %369, %371 : vector<16x4xf32>
    %c0_381 = arith.constant 0 : index
    %c12_382 = arith.constant 12 : index
    %c0_383 = arith.constant 0 : index
    %c0_384 = arith.constant 0 : index
    %373 = vector.load %arg10[%c0_381, %c12_382, %c0_383, %c0_384] : memref<1x16x16x4xf32, #tpu.memory_space<vmem>>, vector<1x1x16x4xf32>
    %374 = vector.shape_cast %373 : vector<1x1x16x4xf32> to vector<16x4xf32>
    %375 = vector.shape_cast %372 : vector<16x4xf32> to vector<1x1x16x4xf32>
    tpu.vector_store %arg10[%c0_381, %c12_382, %c0_383, %c0_384], %375 {strides = array<i32>} : memref<1x16x16x4xf32, #tpu.memory_space<vmem>>, vector<1x1x16x4xf32>,
    %c3_385 = arith.constant 3 : index
    %c0_386 = arith.constant 0 : index
    %c0_387 = arith.constant 0 : index
    %376 = vector.load %arg8[%c3_385, %c0_386, %c0_387] : memref<4x64x4xf32, #tpu.memory_space<vmem>>, vector<1x64x4xf32>
    %377 = vector.shape_cast %376 : vector<1x64x4xf32> to vector<64x4xf32>
    %cst_388 = arith.constant dense<0.000000e+00> : vector<16x4xf32>
    %378 = tpu.matmul %348, %377, %cst_388 {dimension_numbers = #tpu.dot_dimension_numbers<[1], [0], [0], [1], [0, 0, 1, 1], [], []>} : vector<16x64xf32>, vector<64x4xf32>, vector<16x4xf32> -> vector<16x4xf32>
    %c0_389 = arith.constant 0 : index
    %c0_390 = arith.constant 0 : index
    %379 = vector.load %arg9[%c0_389, %c0_390] : memref<1x4xf32, #tpu.memory_space<vmem>>, vector<1x4xf32>
    %380 = vector.broadcast %379 : vector<1x4xf32> to vector<16x4xf32>
    %381 = arith.addf %378, %380 : vector<16x4xf32>
    %c0_391 = arith.constant 0 : index
    %c13 = arith.constant 13 : index
    %c0_392 = arith.constant 0 : index
    %c0_393 = arith.constant 0 : index
    %382 = vector.load %arg10[%c0_391, %c13, %c0_392, %c0_393] : memref<1x16x16x4xf32, #tpu.memory_space<vmem>>, vector<1x1x16x4xf32>
    %383 = vector.shape_cast %382 : vector<1x1x16x4xf32> to vector<16x4xf32>
    %384 = vector.shape_cast %381 : vector<16x4xf32> to vector<1x1x16x4xf32>
    tpu.vector_store %arg10[%c0_391, %c13, %c0_392, %c0_393], %384 {strides = array<i32>} : memref<1x16x16x4xf32, #tpu.memory_space<vmem>>, vector<1x1x16x4xf32>,
    %c3_394 = arith.constant 3 : index
    %c0_395 = arith.constant 0 : index
    %c0_396 = arith.constant 0 : index
    %385 = vector.load %arg6[%c3_394, %c0_395, %c0_396] : memref<4x128x64xf32, #tpu.memory_space<vmem>>, vector<1x128x64xf32>
    %386 = vector.shape_cast %385 : vector<1x128x64xf32> to vector<128x64xf32>
    %cst_397 = arith.constant dense<0.000000e+00> : vector<16x64xf32>
    %387 = tpu.matmul %252, %386, %cst_397 {dimension_numbers = #tpu.dot_dimension_numbers<[1], [0], [0], [1], [0, 0, 1, 1], [], []>} : vector<16x128xf32>, vector<128x64xf32>, vector<16x64xf32> -> vector<16x64xf32>
    %c0_398 = arith.constant 0 : index
    %c0_399 = arith.constant 0 : index
    %388 = vector.load %arg7[%c0_398, %c0_399] : memref<1x64xf32, #tpu.memory_space<vmem>>, vector<1x64xf32>
    %389 = vector.broadcast %388 : vector<1x64xf32> to vector<16x64xf32>
    %390 = arith.addf %387, %389 : vector<16x64xf32>
    %cst_400 = arith.constant 0.000000e+00 : f32
    %391 = vector.broadcast %cst_400 : f32 to vector<16x64xf32>
    %392 = arith.maximumf %390, %391 : vector<16x64xf32>
    %c0_401 = arith.constant 0 : index
    %c0_402 = arith.constant 0 : index
    %c0_403 = arith.constant 0 : index
    %393 = vector.load %arg8[%c0_401, %c0_402, %c0_403] : memref<4x64x4xf32, #tpu.memory_space<vmem>>, vector<1x64x4xf32>
    %394 = vector.shape_cast %393 : vector<1x64x4xf32> to vector<64x4xf32>
    %cst_404 = arith.constant dense<0.000000e+00> : vector<16x4xf32>
    %395 = tpu.matmul %392, %394, %cst_404 {dimension_numbers = #tpu.dot_dimension_numbers<[1], [0], [0], [1], [0, 0, 1, 1], [], []>} : vector<16x64xf32>, vector<64x4xf32>, vector<16x4xf32> -> vector<16x4xf32>
    %c0_405 = arith.constant 0 : index
    %c0_406 = arith.constant 0 : index
    %396 = vector.load %arg9[%c0_405, %c0_406] : memref<1x4xf32, #tpu.memory_space<vmem>>, vector<1x4xf32>
    %397 = vector.broadcast %396 : vector<1x4xf32> to vector<16x4xf32>
    %398 = arith.addf %395, %397 : vector<16x4xf32>
    %c0_407 = arith.constant 0 : index
    %c10_408 = arith.constant 10 : index
    %c0_409 = arith.constant 0 : index
    %c0_410 = arith.constant 0 : index
    %399 = vector.load %arg10[%c0_407, %c10_408, %c0_409, %c0_410] : memref<1x16x16x4xf32, #tpu.memory_space<vmem>>, vector<1x1x16x4xf32>
    %400 = vector.shape_cast %399 : vector<1x1x16x4xf32> to vector<16x4xf32>
    %401 = vector.shape_cast %398 : vector<16x4xf32> to vector<1x1x16x4xf32>
    tpu.vector_store %arg10[%c0_407, %c10_408, %c0_409, %c0_410], %401 {strides = array<i32>} : memref<1x16x16x4xf32, #tpu.memory_space<vmem>>, vector<1x1x16x4xf32>,
    %c1_411 = arith.constant 1 : index
    %c0_412 = arith.constant 0 : index
    %c0_413 = arith.constant 0 : index
    %402 = vector.load %arg8[%c1_411, %c0_412, %c0_413] : memref<4x64x4xf32, #tpu.memory_space<vmem>>, vector<1x64x4xf32>
    %403 = vector.shape_cast %402 : vector<1x64x4xf32> to vector<64x4xf32>
    %cst_414 = arith.constant dense<0.000000e+00> : vector<16x4xf32>
    %404 = tpu.matmul %392, %403, %cst_414 {dimension_numbers = #tpu.dot_dimension_numbers<[1], [0], [0], [1], [0, 0, 1, 1], [], []>} : vector<16x64xf32>, vector<64x4xf32>, vector<16x4xf32> -> vector<16x4xf32>
    %c0_415 = arith.constant 0 : index
    %c0_416 = arith.constant 0 : index
    %405 = vector.load %arg9[%c0_415, %c0_416] : memref<1x4xf32, #tpu.memory_space<vmem>>, vector<1x4xf32>
    %406 = vector.broadcast %405 : vector<1x4xf32> to vector<16x4xf32>
    %407 = arith.addf %404, %406 : vector<16x4xf32>
    %c0_417 = arith.constant 0 : index
    %c11_418 = arith.constant 11 : index
    %c0_419 = arith.constant 0 : index
    %c0_420 = arith.constant 0 : index
    %408 = vector.load %arg10[%c0_417, %c11_418, %c0_419, %c0_420] : memref<1x16x16x4xf32, #tpu.memory_space<vmem>>, vector<1x1x16x4xf32>
    %409 = vector.shape_cast %408 : vector<1x1x16x4xf32> to vector<16x4xf32>
    %410 = vector.shape_cast %407 : vector<16x4xf32> to vector<1x1x16x4xf32>
    tpu.vector_store %arg10[%c0_417, %c11_418, %c0_419, %c0_420], %410 {strides = array<i32>} : memref<1x16x16x4xf32, #tpu.memory_space<vmem>>, vector<1x1x16x4xf32>,
    %c2_421 = arith.constant 2 : index
    %c0_422 = arith.constant 0 : index
    %c0_423 = arith.constant 0 : index
    %411 = vector.load %arg8[%c2_421, %c0_422, %c0_423] : memref<4x64x4xf32, #tpu.memory_space<vmem>>, vector<1x64x4xf32>
    %412 = vector.shape_cast %411 : vector<1x64x4xf32> to vector<64x4xf32>
    %cst_424 = arith.constant dense<0.000000e+00> : vector<16x4xf32>
    %413 = tpu.matmul %392, %412, %cst_424 {dimension_numbers = #tpu.dot_dimension_numbers<[1], [0], [0], [1], [0, 0, 1, 1], [], []>} : vector<16x64xf32>, vector<64x4xf32>, vector<16x4xf32> -> vector<16x4xf32>
    %c0_425 = arith.constant 0 : index
    %c0_426 = arith.constant 0 : index
    %414 = vector.load %arg9[%c0_425, %c0_426] : memref<1x4xf32, #tpu.memory_space<vmem>>, vector<1x4xf32>
    %415 = vector.broadcast %414 : vector<1x4xf32> to vector<16x4xf32>
    %416 = arith.addf %413, %415 : vector<16x4xf32>
    %c0_427 = arith.constant 0 : index
    %c14 = arith.constant 14 : index
    %c0_428 = arith.constant 0 : index
    %c0_429 = arith.constant 0 : index
    %417 = vector.load %arg10[%c0_427, %c14, %c0_428, %c0_429] : memref<1x16x16x4xf32, #tpu.memory_space<vmem>>, vector<1x1x16x4xf32>
    %418 = vector.shape_cast %417 : vector<1x1x16x4xf32> to vector<16x4xf32>
    %419 = vector.shape_cast %416 : vector<16x4xf32> to vector<1x1x16x4xf32>
    tpu.vector_store %arg10[%c0_427, %c14, %c0_428, %c0_429], %419 {strides = array<i32>} : memref<1x16x16x4xf32, #tpu.memory_space<vmem>>, vector<1x1x16x4xf32>,
    %c3_430 = arith.constant 3 : index
    %c0_431 = arith.constant 0 : index
    %c0_432 = arith.constant 0 : index
    %420 = vector.load %arg8[%c3_430, %c0_431, %c0_432] : memref<4x64x4xf32, #tpu.memory_space<vmem>>, vector<1x64x4xf32>
    %421 = vector.shape_cast %420 : vector<1x64x4xf32> to vector<64x4xf32>
    %cst_433 = arith.constant dense<0.000000e+00> : vector<16x4xf32>
    %422 = tpu.matmul %392, %421, %cst_433 {dimension_numbers = #tpu.dot_dimension_numbers<[1], [0], [0], [1], [0, 0, 1, 1], [], []>} : vector<16x64xf32>, vector<64x4xf32>, vector<16x4xf32> -> vector<16x4xf32>
    %c0_434 = arith.constant 0 : index
    %c0_435 = arith.constant 0 : index
    %423 = vector.load %arg9[%c0_434, %c0_435] : memref<1x4xf32, #tpu.memory_space<vmem>>, vector<1x4xf32>
    %424 = vector.broadcast %423 : vector<1x4xf32> to vector<16x4xf32>
    %425 = arith.addf %422, %424 : vector<16x4xf32>
    %c0_436 = arith.constant 0 : index
    %c15 = arith.constant 15 : index
    %c0_437 = arith.constant 0 : index
    %c0_438 = arith.constant 0 : index
    %426 = vector.load %arg10[%c0_436, %c15, %c0_437, %c0_438] : memref<1x16x16x4xf32, #tpu.memory_space<vmem>>, vector<1x1x16x4xf32>
    %427 = vector.shape_cast %426 : vector<1x1x16x4xf32> to vector<16x4xf32>
    %428 = vector.shape_cast %425 : vector<16x4xf32> to vector<1x1x16x4xf32>
    tpu.vector_store %arg10[%c0_436, %c15, %c0_437, %c0_438], %428 {strides = array<i32>} : memref<1x16x16x4xf32, #tpu.memory_space<vmem>>, vector<1x1x16x4xf32>,
    return
  }
  func.func @transform_0(%arg0: i32) -> (i32, i32, i32) {
    %c0_i32 = arith.constant 0 : i32
    %c0_i32_0 = arith.constant 0 : i32
    %c0_i32_1 = arith.constant 0 : i32
    return %arg0, %c0_i32, %c0_i32_0 : i32, i32, i32
  }
  func.func @transform_1(%arg0: i32) -> (i32, i32, i32) {
    %c0_i32 = arith.constant 0 : i32
    %c0_i32_0 = arith.constant 0 : i32
    %c0_i32_1 = arith.constant 0 : i32
    %c0_i32_2 = arith.constant 0 : i32
    return %c0_i32, %c0_i32_0, %c0_i32_1 : i32, i32, i32
  }
  func.func @transform_2(%arg0: i32) -> (i32, i32) {
    %c0_i32 = arith.constant 0 : i32
    %c0_i32_0 = arith.constant 0 : i32
    %c0_i32_1 = arith.constant 0 : i32
    return %c0_i32, %c0_i32_0 : i32, i32
  }
  func.func @transform_3(%arg0: i32) -> (i32, i32, i32) {
    %c0_i32 = arith.constant 0 : i32
    %c0_i32_0 = arith.constant 0 : i32
    %c0_i32_1 = arith.constant 0 : i32
    %c0_i32_2 = arith.constant 0 : i32
    return %c0_i32, %c0_i32_0, %c0_i32_1 : i32, i32, i32
  }
  func.func @transform_4(%arg0: i32) -> (i32, i32) {
    %c0_i32 = arith.constant 0 : i32
    %c0_i32_0 = arith.constant 0 : i32
    %c0_i32_1 = arith.constant 0 : i32
    return %c0_i32, %c0_i32_0 : i32, i32
  }
  func.func @transform_5(%arg0: i32) -> (i32, i32, i32) {
    %c0_i32 = arith.constant 0 : i32
    %c0_i32_0 = arith.constant 0 : i32
    %c0_i32_1 = arith.constant 0 : i32
    %c0_i32_2 = arith.constant 0 : i32
    return %c0_i32, %c0_i32_0, %c0_i32_1 : i32, i32, i32
  }
  func.func @transform_6(%arg0: i32) -> (i32, i32) {
    %c0_i32 = arith.constant 0 : i32
    %c0_i32_0 = arith.constant 0 : i32
    %c0_i32_1 = arith.constant 0 : i32
    return %c0_i32, %c0_i32_0 : i32, i32
  }
  func.func @transform_7(%arg0: i32) -> (i32, i32, i32) {
    %c0_i32 = arith.constant 0 : i32
    %c0_i32_0 = arith.constant 0 : i32
    %c0_i32_1 = arith.constant 0 : i32
    %c0_i32_2 = arith.constant 0 : i32
    return %c0_i32, %c0_i32_0, %c0_i32_1 : i32, i32, i32
  }
  func.func @transform_8(%arg0: i32) -> (i32, i32) {
    %c0_i32 = arith.constant 0 : i32
    %c0_i32_0 = arith.constant 0 : i32
    %c0_i32_1 = arith.constant 0 : i32
    return %c0_i32, %c0_i32_0 : i32, i32
  }
  func.func @transform_9(%arg0: i32) -> (i32, i32, i32, i32) {
    %c0_i32 = arith.constant 0 : i32
    %c0_i32_0 = arith.constant 0 : i32
    %c0_i32_1 = arith.constant 0 : i32
    %c0_i32_2 = arith.constant 0 : i32
    return %arg0, %c0_i32, %c0_i32_0, %c0_i32_1 : i32, i32, i32, i32
  }
}

</mosaic_0001>

<bundles_post_ra>
// kernel: tpu_custom_call.1
= control target key start
LH: loop header
LB: loop body
LE: loop exit
PB: predicated region body
PF: predicated region fallthrough
CT: control target
= control target key end

     0   :  { %s11725_s30 = smov 0   ;;  %s13498_s0 = inlined_call_operand.vmem [shape: f32[2,256,4], index: 0, kind: input, shape index: {}]   ;;  %s13499_s1 = inlined_call_operand.vmem [shape: f32[9,4,64], index: 1, kind: input, shape index: {}]   ;;  %s13500_s2 = inlined_call_operand.vmem [shape: f32[1,64], index: 2, kind: input, shape index: {}]   ;;  %s13501_s3 = inlined_call_operand.vmem [shape: f32[9,64,128], index: 3, kind: input, shape index: {}]   ;;  %s13502_s4 = inlined_call_operand.vmem [shape: f32[1,128], index: 4, kind: input, shape index: {}]   ;;  %s13503_s5 = inlined_call_operand.vmem [shape: f32[4,128,64], index: 5, kind: input, shape index: {}]   ;;  %s13504_s6 = inlined_call_operand.vmem [shape: f32[1,64], index: 6, kind: input, shape index: {}]   ;;  %s13505_s7 = inlined_call_operand.vmem [shape: f32[4,64,4], index: 7, kind: input, shape index: {}]   ;;  %s13506_s8 = inlined_call_operand.vmem [shape: f32[1,4], index: 8, kind: input, shape index: {}]   ;;  %s13507_s9 = inlined_call_operand.vmem [shape: f32[2,16,16,4], index: 9, kind: output, shape index: {}]  }
   0x1 LB: > { %s8069_s10 = sadd.s32 4294967295, %s11672_s30   ;;  %p8073_p0 = scmp.ge.s32.totalorder %s11672_s30, 1  ;;  %s11672_s30 = sphi %s11725_s30, %s19_s30  }
   0x2   : > { %p287_p1 = scmp.lt.s32.totalorder %s11672_s30, 3 }
   0x4   : > { %p288_p2 = pnand %p8073_p0, %p287_p1 }
   0x5   : > { %v8078_v0 = vld [vmem:[%s13499_s1 + $0x4] sm:$0xf] (!%p288_p2)  ;;  %vm625_vm0 = vcmask (!%p288_p2), 1043456   ;;  %vm333_vm1 = vcmask (!%p288_p2), 31744   ;;  %v11674_v1 = vmov (!%p288_p2), 0.0   ;;  %p323_p3 = scmp.lt.s32.totalorder (!%p288_p2), %s8069_s10, 1 }
   0x6   : > { %291 = sbr.rel (%p288_p2) target bundleno = 2635 (0xa4b), region = 56  ;;  %9532 = vmatprep.subr.msk.mxu0 (!%p288_p2), %vm625_vm0, %v8078_v0  ;;  %334 = vst.msk [vmem:[#allocation2] sm:$0xff] (!%p288_p2), %vm333_vm1, %v11674_v1  ;;  %335 = vst.msk [vmem:[#allocation2 + $0x8] sm:$0xff] (!%p288_p2), %vm333_vm1, %v11674_v1  ;;  %v478_v2 = vld [vmem:[%s13499_s1] sm:$0xf] (!%p288_p2)  ;;  %11287 = vmatprep.subr.msk.mxu1 (!%p288_p2), %vm625_vm0, %v8078_v0  ;;  %vm4319_vm2 = vcmask (!%p288_p2), 523264  }
   0x7   : > { %336 = vst.msk [vmem:[#allocation2 + $0x10] sm:$0xff] (!%p288_p2), %vm333_vm1, %v11674_v1  ;;  %337 = vst.msk [vmem:[#allocation2 + $0x18] sm:$0xff] (!%p288_p2), %vm333_vm1, %v11674_v1  ;;  %9533 = vmatpush3.msk.msra.mxu0 (!%p288_p2), %vm625_vm0, %v8078_v0  ;;  %11288 = vmatpush3.msk.msra.mxu1 (!%p288_p2), %vm625_vm0, %v8078_v0  ;;  %v11846_v6 = vld [vmem:[%s13499_s1 + $0x8] sm:$0xf] (!%p288_p2)  ;;  %v11924_v49 = vld [vmem:[%s13499_s1 + $0xc] sm:$0xf] (!%p288_p2) }
   0x8   : > { %338 = vst.msk [vmem:[#allocation2 + $0x20] sm:$0xff] (!%p288_p2), %vm333_vm1, %v11674_v1  ;;  %339 = vst.msk [vmem:[#allocation2 + $0x28] sm:$0xff] (!%p288_p2), %vm333_vm1, %v11674_v1  ;;  %9588 = vmatprep.subr.msk.mxu0 (!%p288_p2), %vm625_vm0, %v478_v2 }
   0x9   : > { %340 = vst.msk [vmem:[#allocation2 + $0x30] sm:$0xff] (!%p288_p2), %vm333_vm1, %v11674_v1  ;;  %341 = vst.msk [vmem:[#allocation2 + $0x38] sm:$0xff] (!%p288_p2), %vm333_vm1, %v11674_v1 }
   0xa   : > { %342 = vst.msk [vmem:[#allocation2 + $0x40] sm:$0xff] (!%p288_p2), %vm333_vm1, %v11674_v1  ;;  %343 = vst.msk [vmem:[#allocation2 + $0x48] sm:$0xff] (!%p288_p2), %vm333_vm1, %v11674_v1 }
   0xb   : > { %344 = vst.msk [vmem:[#allocation2 + $0x50] sm:$0xff] (!%p288_p2), %vm333_vm1, %v11674_v1  ;;  %345 = vst.msk [vmem:[#allocation2 + $0x58] sm:$0xff] (!%p288_p2), %vm333_vm1, %v11674_v1 }
   0xc   : > { %346 = vst.msk [vmem:[#allocation2 + $0x60] sm:$0xff] (!%p288_p2), %vm333_vm1, %v11674_v1  ;;  %347 = vst.msk [vmem:[#allocation2 + $0x68] sm:$0xff] (!%p288_p2), %vm333_vm1, %v11674_v1 }
   0xd   : > { %348 = vst.msk [vmem:[#allocation2 + $0x70] sm:$0xff] %vm333_vm1, %v11674_v1  ;;  %349 = vst.msk [vmem:[#allocation2 + $0x78] sm:$0xff] %vm333_vm1, %v11674_v1  ;;  %s13509_s10 = smov (!%p323_p3, %s8069_s10), 1  ;;  %v479_v7 = vld [vmem:[#allocation2 + $0x1] sm:$0xff] }
   0xe   : > { %350 = vst.msk [vmem:[#allocation2 + $0x80] sm:$0xff] %vm333_vm1, %v11674_v1  ;;  %351 = vst.msk [vmem:[#allocation2 + $0x88] sm:$0xff] %vm333_vm1, %v11674_v1  ;;  %s8803_s15 = sshll.u32 %s13509_s10, 8  ;;  %v480_v8 = vld [vmem:[#allocation2 + $0x9] sm:$0xff]  ;;  %9534 = vmatprep.mubr.msk.f32.mxu0 %vm333_vm1, %v479_v7  ;;  %v442_v46 = vld [vmem:[#allocation2] sm:$0xff] }
   0xf   : > { %352 = vst.msk [vmem:[#allocation2 + $0x90] sm:$0xff] %vm333_vm1, %v11674_v1  ;;  %353 = vst.msk [vmem:[#allocation2 + $0x98] sm:$0xff] %vm333_vm1, %v11674_v1  ;;  %s11838_s18 = scalar_lea.vmem %s13498_s0, %s8803_s15  ;;  %9535 = vmatmul.mubr.msk.f32.vlgmr.msra.gmra.mrb[0].mxu0 %vm333_vm1, %v480_v8  ;;  %v443_v47 = vld [vmem:[#allocation2 + $0x8] sm:$0xff]  ;;  %s13180_s27 = scalar_lea.vmem %s13507_s9, %s8803_s15 }
  0x10   : > { %354 = vst.msk [vmem:[#allocation2 + $0xa0] sm:$0xff] %vm333_vm1, %v11674_v1  ;;  %355 = vst.msk [vmem:[#allocation2 + $0xa8] sm:$0xff] %vm333_vm1, %v11674_v1  ;;  %v378_v3 = vld [vmem:[%s11838_s18] sm:$0xff]  ;;  %v379_v4 = vld [vmem:[%s11838_s18 + $0x8] sm:$0xff]  ;;  %9589 = vmatpush3.msk.msra.mxu0 %vm625_vm0, %v478_v2 }
  0x11   : > { %356 = vst.msk [vmem:[#allocation2 + $0xb0] sm:$0xff] %vm333_vm1, %v11674_v1  ;;  %357 = vst.msk [vmem:[#allocation2 + $0xb8] sm:$0xff] %vm333_vm1, %v11674_v1  ;;  %v382_v5 = vld [vmem:[%s11838_s18 + $0x10] sm:$0xff]  ;;  %v383_v9 = vld [vmem:[%s11838_s18 + $0x18] sm:$0xff]  ;;  %9644 = vmatprep.subr.msk.mxu0 %vm625_vm0, %v11846_v6 }
  0x12   : > { %358 = vst.msk [vmem:[#allocation2 + $0xc0] sm:$0xff] %vm333_vm1, %v11674_v1  ;;  %359 = vst.msk [vmem:[#allocation2 + $0xc8] sm:$0xff] %vm333_vm1, %v11674_v1  ;;  %v386_v10 = vld [vmem:[%s11838_s18 + $0x20] sm:$0xff]  ;;  %v387_v11 = vld [vmem:[%s11838_s18 + $0x28] sm:$0xff] }
  0x13   : > { %360 = vst.msk [vmem:[#allocation2 + $0xd0] sm:$0xff] %vm333_vm1, %v11674_v1  ;;  %361 = vst.msk [vmem:[#allocation2 + $0xd8] sm:$0xff] %vm333_vm1, %v11674_v1  ;;  %v390_v12 = vld [vmem:[%s11838_s18 + $0x30] sm:$0xff]  ;;  %v391_v13 = vld [vmem:[%s11838_s18 + $0x38] sm:$0xff] }
  0x14   : > { %362 = vst.msk [vmem:[#allocation2 + $0xe0] sm:$0xff] %vm333_vm1, %v11674_v1  ;;  %363 = vst.msk [vmem:[#allocation2 + $0xe8] sm:$0xff] %vm333_vm1, %v11674_v1  ;;  %v394_v14 = vld [vmem:[%s11838_s18 + $0x40] sm:$0xff]  ;;  %v395_v15 = vld [vmem:[%s11838_s18 + $0x48] sm:$0xff] }
  0x15   : > { %364 = vst.msk [vmem:[#allocation2 + $0xf0] sm:$0xff] %vm333_vm1, %v11674_v1  ;;  %365 = vst.msk [vmem:[#allocation2 + $0xf8] sm:$0xff] %vm333_vm1, %v11674_v1  ;;  %v398_v16 = vld [vmem:[%s11838_s18 + $0x50] sm:$0xff]  ;;  %v399_v17 = vld [vmem:[%s11838_s18 + $0x58] sm:$0xff] }
  0x16   : > { %366 = vst.msk [vmem:[#allocation2 + $0x100] sm:$0xff] %vm333_vm1, %v11674_v1  ;;  %367 = vst.msk [vmem:[#allocation2 + $0x108] sm:$0xff] %vm333_vm1, %v11674_v1  ;;  %v402_v18 = vld [vmem:[%s11838_s18 + $0x60] sm:$0xff]  ;;  %v403_v19 = vld [vmem:[%s11838_s18 + $0x68] sm:$0xff] }
  0x17   : > { %368 = vst.msk [vmem:[#allocation2 + $0x110] sm:$0xff] %vm333_vm1, %v11674_v1  ;;  %369 = vst.msk [vmem:[#allocation2 + $0x118] sm:$0xff] %vm333_vm1, %v11674_v1  ;;  %v406_v20 = vld [vmem:[%s11838_s18 + $0x70] sm:$0xff]  ;;  %v407_v21 = vld [vmem:[%s11838_s18 + $0x78] sm:$0xff] }
  0x18   : > { %370 = vst.msk [vmem:[#allocation2 + $0x120] sm:$0xff] %vm333_vm1, %v11674_v1  ;;  %371 = vst.msk [vmem:[#allocation2 + $0x128] sm:$0xff] %vm333_vm1, %v11674_v1  ;;  %v410_v22 = vld [vmem:[%s11838_s18 + $0x80] sm:$0xff]  ;;  %v411_v23 = vld [vmem:[%s11838_s18 + $0x88] sm:$0xff] }
  0x19   : > { %372 = vst.msk [vmem:[#allocation2 + $0x130] sm:$0xff] %vm333_vm1, %v11674_v1  ;;  %373 = vst.msk [vmem:[#allocation2 + $0x138] sm:$0xff] %vm333_vm1, %v11674_v1  ;;  %v414_v24 = vld [vmem:[%s11838_s18 + $0x90] sm:$0xff]  ;;  %v415_v25 = vld [vmem:[%s11838_s18 + $0x98] sm:$0xff] }
  0x1a   : > { %374 = vst.msk [vmem:[#allocation2 + $0x140] sm:$0xff] %vm333_vm1, %v11674_v1  ;;  %380 = vst.msk [vmem:[#allocation2 + $0x13] sm:$0xff] %vm333_vm1, %v378_v3  ;;  %v418_v35 = vld [vmem:[%s11838_s18 + $0xa0] sm:$0xff]  ;;  %v419_v36 = vld [vmem:[%s11838_s18 + $0xa8] sm:$0xff] }
  0x1b   : > { %381 = vst.msk [vmem:[#allocation2 + $0x1b] sm:$0xff] %vm333_vm1, %v379_v4  ;;  %384 = vst.msk [vmem:[#allocation2 + $0x25] sm:$0xff] %vm333_vm1, %v382_v5  ;;  %v422_v37 = vld [vmem:[%s11838_s18 + $0xb0] sm:$0xff]  ;;  %v423_v38 = vld [vmem:[%s11838_s18 + $0xb8] sm:$0xff] }
  0x1c   : > { %385 = vst.msk [vmem:[#allocation2 + $0x2d] sm:$0xff] %vm333_vm1, %v383_v9  ;;  %388 = vst.msk [vmem:[#allocation2 + $0x37] sm:$0xff] %vm333_vm1, %v386_v10  ;;  %v426_v39 = vld [vmem:[%s11838_s18 + $0xc0] sm:$0xff]  ;;  %v427_v40 = vld [vmem:[%s11838_s18 + $0xc8] sm:$0xff] }
  0x1d   : > { %389 = vst.msk [vmem:[#allocation2 + $0x3f] sm:$0xff] %vm333_vm1, %v387_v11  ;;  %392 = vst.msk [vmem:[#allocation2 + $0x49] sm:$0xff] %vm333_vm1, %v390_v12  ;;  %v430_v41 = vld [vmem:[%s11838_s18 + $0xd0] sm:$0xff]  ;;  %v431_v42 = vld [vmem:[%s11838_s18 + $0xd8] sm:$0xff] }
  0x1e   : > { %393 = vst.msk [vmem:[#allocation2 + $0x51] sm:$0xff] %vm333_vm1, %v391_v13  ;;  %396 = vst.msk [vmem:[#allocation2 + $0x5b] sm:$0xff] %vm333_vm1, %v394_v14  ;;  %v434_v43 = vld [vmem:[%s11838_s18 + $0xe0] sm:$0xff]  ;;  %v435_v44 = vld [vmem:[%s11838_s18 + $0xe8] sm:$0xff] }
  0x1f   : > { %397 = vst.msk [vmem:[#allocation2 + $0x63] sm:$0xff] %vm333_vm1, %v395_v15  ;;  %400 = vst.msk [vmem:[#allocation2 + $0x6d] sm:$0xff] %vm333_vm1, %v398_v16  ;;  %v438_v54 = vld [vmem:[%s11838_s18 + $0xf0] sm:$0xff] }
  0x20   : > { %401 = vst.msk [vmem:[#allocation2 + $0x75] sm:$0xff] %vm333_vm1, %v399_v17  ;;  %404 = vst.msk [vmem:[#allocation2 + $0x7f] sm:$0xff] %vm333_vm1, %v402_v18 }
  0x21   : > { %405 = vst.msk [vmem:[#allocation2 + $0x87] sm:$0xff] %vm333_vm1, %v403_v19  ;;  %408 = vst.msk [vmem:[#allocation2 + $0x91] sm:$0xff] %vm333_vm1, %v406_v20  ;;  %v481_v26 = vld [vmem:[#allocation2 + $0x11] sm:$0xff] }
  0x22   : > { %409 = vst.msk [vmem:[#allocation2 + $0x99] sm:$0xff] %vm333_vm1, %v407_v21  ;;  %412 = vst.msk [vmem:[#allocation2 + $0xa3] sm:$0xff] %vm333_vm1, %v410_v22  ;;  %v482_v27 = vld [vmem:[#allocation2 + $0x19] sm:$0xff]  ;;  %v483_v28 = vld [vmem:[#allocation2 + $0x21] sm:$0xff]  ;;  %9537 = vmatprep.mubr.msk.f32.mxu0 %vm333_vm1, %v481_v26 }
  0x23   : > { %413 = vst.msk [vmem:[#allocation2 + $0xab] sm:$0xff] %vm333_vm1, %v411_v23  ;;  %416 = vst.msk [vmem:[#allocation2 + $0xb5] sm:$0xff] %vm333_vm1, %v414_v24  ;;  %9538 = vmatmul.mubr.msk.f32.gmra.mrb[2].mxu0 %vm333_vm1, %v482_v27  ;;  %v484_v29 = vld [vmem:[#allocation2 + $0x29] sm:$0xff]  ;;  %v485_v30 = vld [vmem:[#allocation2 + $0x31] sm:$0xff] }
  0x24   : > { %417 = vst.msk [vmem:[#allocation2 + $0xbd] sm:$0xff] %vm333_vm1, %v415_v25  ;;  %9540 = vmatprep.mubr.msk.f32.mxu0 %vm333_vm1, %v483_v28  ;;  %v486_v31 = vld [vmem:[#allocation2 + $0x39] sm:$0xff]  ;;  %v487_v32 = vld [vmem:[#allocation2 + $0x41] sm:$0xff]  ;;  %v488_v33 = vld [vmem:[#allocation2 + $0x49] sm:$0xff] }
  0x25   : > { %v489_v34 = vld [vmem:[#allocation2 + $0x51] sm:$0xff]  ;;  %420 = vst.msk [vmem:[#allocation2 + $0xc7] sm:$0xff] %vm333_vm1, %v418_v35  ;;  %421 = vst.msk [vmem:[#allocation2 + $0xcf] sm:$0xff] %vm333_vm1, %v419_v36  ;;  %v490_v45 = vld [vmem:[#allocation2 + $0x59] sm:$0xff] }
  0x26   : > { %424 = vst.msk [vmem:[#allocation2 + $0xd9] sm:$0xff] %vm333_vm1, %v422_v37  ;;  %425 = vst.msk [vmem:[#allocation2 + $0xe1] sm:$0xff] %vm333_vm1, %v423_v38  ;;  %v444_v48 = vld [vmem:[#allocation2 + $0x10] sm:$0xff]  ;;  %v445_v50 = vld [vmem:[#allocation2 + $0x18] sm:$0xff] }
  0x27   : > { %9541 = vmatmul.mubr.msk.f32.gmra.mrb[4].mxu0 %vm333_vm1, %v484_v29  ;;  %428 = vst.msk [vmem:[#allocation2 + $0xeb] sm:$0xff] %vm333_vm1, %v426_v39  ;;  %429 = vst.msk [vmem:[#allocation2 + $0xf3] sm:$0xff] %vm333_vm1, %v427_v40  ;;  %v446_v51 = vld [vmem:[#allocation2 + $0x20] sm:$0xff]  ;;  %v447_v52 = vld [vmem:[#allocation2 + $0x28] sm:$0xff] }
  0x28   : > { %9543 = vmatprep.mubr.msk.f32.mxu0 %vm333_vm1, %v485_v30  ;;  %432 = vst.msk [vmem:[#allocation2 + $0xfd] sm:$0xff] %vm333_vm1, %v430_v41  ;;  %433 = vst.msk [vmem:[#allocation2 + $0x105] sm:$0xff] %vm333_vm1, %v431_v42  ;;  %v448_v53 = vld [vmem:[#allocation2 + $0x30] sm:$0xff]  ;;  %v449_v55 = vld [vmem:[#allocation2 + $0x38] sm:$0xff] }
  0x29   : > { %436 = vst.msk [vmem:[#allocation2 + $0x10f] sm:$0xff] %vm333_vm1, %v434_v43  ;;  %437 = vst.msk [vmem:[#allocation2 + $0x117] sm:$0xff] %vm333_vm1, %v435_v44  ;;  %v450_v56 = vld [vmem:[#allocation2 + $0x40] sm:$0xff]  ;;  %v451_v57 = vld [vmem:[#allocation2 + $0x48] sm:$0xff] }
  0x2a   : > { %440 = vst.msk [vmem:[#allocation2 + $0x121] sm:$0xff] %vm333_vm1, %v438_v54  ;;  %v452_v58 = vld [vmem:[#allocation2 + $0x50] sm:$0xff]  ;;  %v453_v59 = vld [vmem:[#allocation2 + $0x58] sm:$0xff]  ;;  %v454_v60 = vld [vmem:[#allocation2 + $0x60] sm:$0xff] }
  0x2b   : > { %9544 = vmatmul.mubr.msk.f32.gmra.mrb[6].mxu0 %vm333_vm1, %v486_v31  ;;  %v455_v61 = vld [vmem:[#allocation2 + $0x68] sm:$0xff]  ;;  %v456_v62 = vld [vmem:[#allocation2 + $0x70] sm:$0xff]  ;;  %v457_v63 = vld [vmem:[#allocation2 + $0x78] sm:$0xff]  ;;  %4356 = vst.msk [vmem:[#allocation4] sm:$0xff] %vm4319_vm2, %v11674_v1 }
  0x2c   : > { %9546 = vmatprep.mubr.msk.f32.mxu0 %vm333_vm1, %v487_v32  ;;  %v458_v0 = vld [vmem:[#allocation2 + $0x80] sm:$0xff]  ;;  %v459_v2 = vld [vmem:[#allocation2 + $0x88] sm:$0xff]  ;;  %v460_v3 = vld [vmem:[#allocation2 + $0x90] sm:$0xff]  ;;  %4357 = vst.msk [vmem:[#allocation4 + $0x8] sm:$0xff] %vm4319_vm2, %v11674_v1 }
  0x2d   : > { %v461_v4 = vld [vmem:[#allocation2 + $0x98] sm:$0xff]  ;;  %v462_v5 = vld [vmem:[#allocation2 + $0xa0] sm:$0xff]  ;;  %v464_v7 = vld [vmem:[#allocation2 + $0xb0] sm:$0xff]  ;;  %4358 = vst.msk [vmem:[#allocation4 + $0x10] sm:$0xff] %vm4319_vm2, %v11674_v1 }
  0x2e   : > { %v465_v8 = vld [vmem:[#allocation2 + $0xb8] sm:$0xff]  ;;  %v466_v9 = vld [vmem:[#allocation2 + $0xc0] sm:$0xff]  ;;  %v467_v10 = vld [vmem:[#allocation2 + $0xc8] sm:$0xff]  ;;  %4359 = vst.msk [vmem:[#allocation4 + $0x18] sm:$0xff] %vm4319_vm2, %v11674_v1 }
  0x2f   : > { %9547 = vmatmul.mubr.msk.f32.gmra.mrb[8].mxu0 %vm333_vm1, %v488_v33  ;;  %v468_v11 = vld [vmem:[#allocation2 + $0xd0] sm:$0xff]  ;;  %v469_v12 = vld [vmem:[#allocation2 + $0xd8] sm:$0xff]  ;;  %v470_v13 = vld [vmem:[#allocation2 + $0xe0] sm:$0xff]  ;;  %4360 = vst.msk [vmem:[#allocation4 + $0x20] sm:$0xff] %vm4319_vm2, %v11674_v1 }
  0x30   : > { %9549 = vmatprep.mubr.msk.f32.mxu0 %vm333_vm1, %v489_v34  ;;  %v471_v14 = vld [vmem:[#allocation2 + $0xe8] sm:$0xff]  ;;  %v472_v15 = vld [vmem:[#allocation2 + $0xf0] sm:$0xff]  ;;  %v473_v16 = vld [vmem:[#allocation2 + $0xf8] sm:$0xff]  ;;  %4361 = vst.msk [vmem:[#allocation4 + $0x28] sm:$0xff] %vm4319_vm2, %v11674_v1 }
  0x31   : > { %v474_v17 = vld [vmem:[#allocation2 + $0x100] sm:$0xff]  ;;  %v475_v18 = vld [vmem:[#allocation2 + $0x108] sm:$0xff]  ;;  %v476_v19 = vld [vmem:[#allocation2 + $0x110] sm:$0xff]  ;;  %4362 = vst.msk [vmem:[#allocation4 + $0x30] sm:$0xff] %vm4319_vm2, %v11674_v1 }
  0x32   : > { %v477_v20 = vld [vmem:[#allocation2 + $0x118] sm:$0xff]  ;;  %v1230_v21 = vld [vmem:[#allocation2 + $0x2] sm:$0xff]  ;;  %v1231_v22 = vld [vmem:[#allocation2 + $0xa] sm:$0xff]  ;;  %4363 = vst.msk [vmem:[#allocation4 + $0x38] sm:$0xff] %vm4319_vm2, %v11674_v1 }
  0x33   : > { %9550 = vmatmul.mubr.msk.f32.gmra.mrb[10].mxu0 %vm333_vm1, %v490_v45  ;;  %v11968_v23 = vld [vmem:[#allocation2 + $0x12] sm:$0xff]  ;;  %v11980_v25 = vld [vmem:[#allocation2 + $0x1a] sm:$0xff]  ;;  %v11982_v26 = vld [vmem:[#allocation2 + $0x22] sm:$0xff]  ;;  %4364 = vst.msk [vmem:[#allocation4 + $0x40] sm:$0xff] %vm4319_vm2, %v11674_v1 }
  0x34   : > { %9590 = vmatprep.mubr.msk.f32.mxu0 %vm333_vm1, %v442_v46  ;;  %v11973_v24 = vld [vmem:[%s13499_s1 + $0x10] sm:$0xf]  ;;  %v439_v27 = vld [vmem:[%s11838_s18 + $0xf8] sm:$0xff]  ;;  %v12002_v31 = vld [vmem:[#allocation2 + $0x42] sm:$0xff]  ;;  %4365 = vst.msk [vmem:[#allocation4 + $0x48] sm:$0xff] %vm4319_vm2, %v11674_v1 }
  0x35   : > { %441 = vst.msk [vmem:[#allocation2 + $0x129] sm:$0xff] %vm333_vm1, %v439_v27  ;;  %v11992_v28 = vld [vmem:[#allocation2 + $0x2a] sm:$0xff]  ;;  %v11994_v29 = vld [vmem:[#allocation2 + $0x32] sm:$0xff]  ;;  %v12000_v30 = vld [vmem:[#allocation2 + $0x3a] sm:$0xff] }
  0x36   : > { %v12008_v32 = vld [vmem:[#allocation2 + $0x4a] sm:$0xff]  ;;  %v12010_v33 = vld [vmem:[#allocation2 + $0x52] sm:$0xff]  ;;  %v1241_v34 = vld [vmem:[#allocation2 + $0x5a] sm:$0xff]  ;;  %4366 = vst.msk [vmem:[#allocation4 + $0x50] sm:$0xff] %vm4319_vm2, %v11674_v1 }
  0x37   : > { %9591 = vmatmul.mubr.msk.f32.vlgmr.msra.gmra.mrb[0].mxu0 %vm333_vm1, %v443_v47  ;;  %v1242_v35 = vld [vmem:[#allocation2 + $0x62] sm:$0xff]  ;;  %v1243_v36 = vld [vmem:[#allocation2 + $0x6a] sm:$0xff]  ;;  %v1244_v37 = vld [vmem:[#allocation2 + $0x72] sm:$0xff]  ;;  %4367 = vst.msk [vmem:[#allocation4 + $0x58] sm:$0xff] %vm4319_vm2, %v11674_v1 }
  0x38   : > { %9645 = vmatpush3.msk.msra.mxu0 %vm625_vm0, %v11846_v6  ;;  %9593 = vmatprep.mubr.msk.f32.mxu0 %vm333_vm1, %v444_v48  ;;  %v463_v6 = vld [vmem:[#allocation2 + $0xa8] sm:$0xff]  ;;  %v1245_v38 = vld [vmem:[#allocation2 + $0x7a] sm:$0xff]  ;;  %v1248_v41 = vld [vmem:[#allocation2 + $0x92] sm:$0xff]  ;;  %4368 = vst.msk [vmem:[#allocation4 + $0x60] sm:$0xff] %vm4319_vm2, %v11674_v1 }
  0x39   : > { %9700 = vmatprep.subr.msk.mxu0 %vm625_vm0, %v11924_v49  ;;  %v1246_v39 = vld [vmem:[#allocation2 + $0x82] sm:$0xff]  ;;  %v1247_v40 = vld [vmem:[#allocation2 + $0x8a] sm:$0xff]  ;;  %v1249_v42 = vld [vmem:[#allocation2 + $0x9a] sm:$0xff] }
  0x3a   : > { %v1250_v43 = vld [vmem:[#allocation2 + $0xa2] sm:$0xff]  ;;  %v1251_v44 = vld [vmem:[#allocation2 + $0xaa] sm:$0xff]  ;;  %v1252_v45 = vld [vmem:[#allocation2 + $0xb2] sm:$0xff] }
  0x3b   : > { %9594 = vmatmul.mubr.msk.f32.gmra.mrb[2].mxu0 %vm333_vm1, %v445_v50  ;;  %v1253_v46 = vld [vmem:[#allocation2 + $0xba] sm:$0xff]  ;;  %v1254_v47 = vld [vmem:[#allocation2 + $0xc2] sm:$0xff]  ;;  %v1255_v48 = vld [vmem:[#allocation2 + $0xca] sm:$0xff] }
  0x3c   : > { %9596 = vmatprep.mubr.msk.f32.mxu0 %vm333_vm1, %v446_v51  ;;  %v1257_v50 = vld [vmem:[#allocation2 + $0xda] sm:$0xff]  ;;  %v1258_v51 = vld [vmem:[#allocation2 + $0xe2] sm:$0xff]  ;;  %v2117_v27 = vld [vmem:[#allocation2 + $0xeb] sm:$0xff] }
  0x3d   : > { %v1261_v54 = vld [vmem:[#allocation2 + $0xfa] sm:$0xff] }
  0x3f   : > { %9597 = vmatmul.mubr.msk.f32.gmra.mrb[4].mxu0 %vm333_vm1, %v447_v52  ;;  %v1259_v52 = vld [vmem:[#allocation2 + $0xea] sm:$0xff] }
  0x40   : > { %9599 = vmatprep.mubr.msk.f32.mxu0 %vm333_vm1, %v448_v53  ;;  %v1260_v53 = vld [vmem:[#allocation2 + $0xf2] sm:$0xff] }
  0x43   : > { %9600 = vmatmul.mubr.msk.f32.gmra.mrb[6].mxu0 %vm333_vm1, %v449_v55  ;;  %v1262_v55 = vld [vmem:[#allocation2 + $0x102] sm:$0xff] }
  0x44   : > { %9602 = vmatprep.mubr.msk.f32.mxu0 %vm333_vm1, %v450_v56  ;;  %v1263_v56 = vld [vmem:[#allocation2 + $0x10a] sm:$0xff] }
  0x47   : > { %9603 = vmatmul.mubr.msk.f32.gmra.mrb[8].mxu0 %vm333_vm1, %v451_v57  ;;  %v1264_v57 = vld [vmem:[#allocation2 + $0x112] sm:$0xff] }
  0x48   : > { %9605 = vmatprep.mubr.msk.f32.mxu0 %vm333_vm1, %v452_v58  ;;  %v1265_v58 = vld [vmem:[#allocation2 + $0x11a] sm:$0xff] }
  0x4b   : > { %9606 = vmatmul.mubr.msk.f32.gmra.mrb[10].mxu0 %vm333_vm1, %v453_v59  ;;  %v8267_v59 = vld [vmem:[%s13499_s1 + $0x14] sm:$0xf] }
  0x4c   : > { %9608 = vmatprep.mubr.msk.f32.mxu0 %vm333_vm1, %v454_v60  ;;  %v1694_v60 = vld [vmem:[#allocation2 + $0x122] sm:$0xff] }
  0x4f   : > { %9609 = vmatmul.mubr.msk.f32.gmra.mrb[12].mxu0 %vm333_vm1, %v455_v61  ;;  %v1695_v61 = vld [vmem:[#allocation2 + $0x12a] sm:$0xff] }
  0x50   : > { %9611 = vmatprep.mubr.msk.f32.mxu0 %vm333_vm1, %v456_v62  ;;  %v2090_v62 = vld [vmem:[#allocation2 + $0x13] sm:$0xff] }
  0x53   : > { %9612 = vmatmul.mubr.msk.f32.gmra.mrb[14].mxu0 %vm333_vm1, %v457_v63  ;;  %v2091_v63 = vld [vmem:[#allocation2 + $0x1b] sm:$0xff] }
  0x54   : > { %9614 = vmatprep.mubr.msk.f32.mxu0 %vm333_vm1, %v458_v0  ;;  %v2092_v0 = vld [vmem:[#allocation2 + $0x23] sm:$0xff] }
  0x57   : > { %9615 = vmatmul.mubr.msk.f32.gmra.mrb[16].mxu0 %vm333_vm1, %v459_v2  ;;  %v12096_v2 = vld [vmem:[%s13499_s1 + $0x18] sm:$0xf] }
  0x58   : > { %9617 = vmatprep.mubr.msk.f32.mxu0 %vm333_vm1, %v460_v3  ;;  %v2093_v3 = vld [vmem:[#allocation2 + $0x2b] sm:$0xff] }
  0x5b   : > { %9618 = vmatmul.mubr.msk.f32.gmra.mrb[18].mxu0 %vm333_vm1, %v461_v4  ;;  %v2094_v4 = vld [vmem:[#allocation2 + $0x33] sm:$0xff] }
  0x5c   : > { %9620 = vmatprep.mubr.msk.f32.mxu0 %vm333_vm1, %v462_v5  ;;  %v2095_v5 = vld [vmem:[#allocation2 + $0x3b] sm:$0xff] }
  0x5f   : > { %9621 = vmatmul.mubr.msk.f32.gmra.mrb[20].mxu0 %vm333_vm1, %v463_v6  ;;  %v2096_v6 = vld [vmem:[#allocation2 + $0x43] sm:$0xff] }
  0x60   : > { %9623 = vmatprep.mubr.msk.f32.mxu0 %vm333_vm1, %v464_v7  ;;  %v2097_v7 = vld [vmem:[#allocation2 + $0x4b] sm:$0xff] }
  0x63   : > { %9624 = vmatmul.mubr.msk.f32.gmra.mrb[22].mxu0 %vm333_vm1, %v465_v8  ;;  %v2098_v8 = vld [vmem:[#allocation2 + $0x53] sm:$0xff] }
  0x64   : > { %9626 = vmatprep.mubr.msk.f32.mxu0 %vm333_vm1, %v466_v9  ;;  %v2099_v9 = vld [vmem:[#allocation2 + $0x5b] sm:$0xff] }
  0x67   : > { %9627 = vmatmul.mubr.msk.f32.gmra.mrb[24].mxu0 %vm333_vm1, %v467_v10  ;;  %v2100_v10 = vld [vmem:[#allocation2 + $0x63] sm:$0xff] }
  0x68   : > { %9629 = vmatprep.mubr.msk.f32.mxu0 %vm333_vm1, %v468_v11  ;;  %v2101_v11 = vld [vmem:[#allocation2 + $0x6b] sm:$0xff] }
  0x6b   : > { %9630 = vmatmul.mubr.msk.f32.gmra.mrb[26].mxu0 %vm333_vm1, %v469_v12  ;;  %v2102_v12 = vld [vmem:[#allocation2 + $0x73] sm:$0xff] }
  0x6c   : > { %9632 = vmatprep.mubr.msk.f32.mxu0 %vm333_vm1, %v470_v13  ;;  %v2103_v13 = vld [vmem:[#allocation2 + $0x7b] sm:$0xff] }
  0x6f   : > { %9633 = vmatmul.mubr.msk.f32.gmra.mrb[28].mxu0 %vm333_vm1, %v471_v14  ;;  %v2104_v14 = vld [vmem:[#allocation2 + $0x83] sm:$0xff] }
  0x70   : > { %9635 = vmatprep.mubr.msk.f32.mxu0 %vm333_vm1, %v472_v15  ;;  %v2105_v15 = vld [vmem:[#allocation2 + $0x8b] sm:$0xff] }
  0x73   : > { %9636 = vmatmul.mubr.msk.f32.gmra.mrb[30].mxu0 %vm333_vm1, %v473_v16  ;;  %v2106_v16 = vld [vmem:[#allocation2 + $0x93] sm:$0xff] }
  0x74   : > { %9638 = vmatprep.mubr.msk.f32.mxu0 %vm333_vm1, %v474_v17  ;;  %v2107_v17 = vld [vmem:[#allocation2 + $0x9b] sm:$0xff] }
  0x77   : > { %9639 = vmatmul.mubr.msk.f32.gmra.mrb[32].mxu0 %vm333_vm1, %v475_v18  ;;  %v2108_v18 = vld [vmem:[#allocation2 + $0xa3] sm:$0xff] }
  0x78   : > { %9641 = vmatprep.mubr.msk.f32.mxu0 %vm333_vm1, %v476_v19  ;;  %v2109_v19 = vld [vmem:[#allocation2 + $0xab] sm:$0xff] }
  0x7b   : > { %9642 = vmatmul.mubr.msk.f32.gmra.mrb[34].mxu0 %vm333_vm1, %v477_v20  ;;  %v2110_v20 = vld [vmem:[#allocation2 + $0xb3] sm:$0xff] }
  0x7c   : > { %9646 = vmatprep.mubr.msk.f32.mxu0 %vm333_vm1, %v1230_v21  ;;  %v2111_v21 = vld [vmem:[#allocation2 + $0xbb] sm:$0xff] }
  0x7f   : > { %9647 = vmatmul.mubr.msk.f32.vlgmr.msra.gmra.mrb[0].mxu0 %vm333_vm1, %v1231_v22  ;;  %v2112_v22 = vld [vmem:[#allocation2 + $0xc3] sm:$0xff] }
  0x80   : > { %9701 = vmatpush3.msk.msra.mxu0 %vm625_vm0, %v11924_v49  ;;  %9649 = vmatprep.mubr.msk.f32.mxu0 %vm333_vm1, %v11968_v23  ;;  %v1256_v49 = vld [vmem:[#allocation2 + $0xd2] sm:$0xff] }
  0x81   : > { %9756 = vmatprep.subr.msk.mxu0 %vm625_vm0, %v11973_v24 }
  0x83   : > { %9650 = vmatmul.mubr.msk.f32.gmra.mrb[2].mxu0 %vm333_vm1, %v11980_v25 }
  0x84   : > { %9652 = vmatprep.mubr.msk.f32.mxu0 %vm333_vm1, %v11982_v26 }
  0x87   : > { %9653 = vmatmul.mubr.msk.f32.gmra.mrb[4].mxu0 %vm333_vm1, %v11992_v28 }
  0x88   : > { %9655 = vmatprep.mubr.msk.f32.mxu0 %vm333_vm1, %v11994_v29 }
  0x8b   : > { %9656 = vmatmul.mubr.msk.f32.gmra.mrb[6].mxu0 %vm333_vm1, %v12000_v30 }
  0x8c   : > { %9658 = vmatprep.mubr.msk.f32.mxu0 %vm333_vm1, %v12002_v31 }
  0x8f   : > { %9659 = vmatmul.mubr.msk.f32.gmra.mrb[8].mxu0 %vm333_vm1, %v12008_v32 }
  0x90   : > { %9661 = vmatprep.mubr.msk.f32.mxu0 %vm333_vm1, %v12010_v33 }
  0x93   : > { %9662 = vmatmul.mubr.msk.f32.gmra.mrb[10].mxu0 %vm333_vm1, %v1241_v34 }
  0x94   : > { %9664 = vmatprep.mubr.msk.f32.mxu0 %vm333_vm1, %v1242_v35 }
  0x97   : > { %9665 = vmatmul.mubr.msk.f32.gmra.mrb[12].mxu0 %vm333_vm1, %v1243_v36 }
  0x98   : > { %9667 = vmatprep.mubr.msk.f32.mxu0 %vm333_vm1, %v1244_v37 }
  0x9b   : > { %9668 = vmatmul.mubr.msk.f32.gmra.mrb[14].mxu0 %vm333_vm1, %v1245_v38 }
  0x9c   : > { %9670 = vmatprep.mubr.msk.f32.mxu0 %vm333_vm1, %v1246_v39 }
  0x9f   : > { %9671 = vmatmul.mubr.msk.f32.gmra.mrb[16].mxu0 %vm333_vm1, %v1247_v40 }
  0xa0   : > { %9673 = vmatprep.mubr.msk.f32.mxu0 %vm333_vm1, %v1248_v41 }
  0xa3   : > { %9674 = vmatmul.mubr.msk.f32.gmra.mrb[18].mxu0 %vm333_vm1, %v1249_v42 }
  0xa4   : > { %9676 = vmatprep.mubr.msk.f32.mxu0 %vm333_vm1, %v1250_v43 }
  0xa7   : > { %9677 = vmatmul.mubr.msk.f32.gmra.mrb[20].mxu0 %vm333_vm1, %v1251_v44 }
  0xa8   : > { %9679 = vmatprep.mubr.msk.f32.mxu0 %vm333_vm1, %v1252_v45 }
  0xab   : > { %9680 = vmatmul.mubr.msk.f32.gmra.mrb[22].mxu0 %vm333_vm1, %v1253_v46 }
  0xac   : > { %9682 = vmatprep.mubr.msk.f32.mxu0 %vm333_vm1, %v1254_v47 }
  0xaf   : > { %9683 = vmatmul.mubr.msk.f32.gmra.mrb[24].mxu0 %vm333_vm1, %v1255_v48 }
  0xb0   : > { %9685 = vmatprep.mubr.msk.f32.mxu0 %vm333_vm1, %v1256_v49 }
  0xb3   : > { %9686 = vmatmul.mubr.msk.f32.gmra.mrb[26].mxu0 %vm333_vm1, %v1257_v50 }
  0xb4   : > { %9688 = vmatprep.mubr.msk.f32.mxu0 %vm333_vm1, %v1258_v51 }
  0xb7   : > { %9689 = vmatmul.mubr.msk.f32.gmra.mrb[28].mxu0 %vm333_vm1, %v1259_v52 }
  0xb8   : > { %9691 = vmatprep.mubr.msk.f32.mxu0 %vm333_vm1, %v1260_v53 }
  0xbb   : > { %9692 = vmatmul.mubr.msk.f32.gmra.mrb[30].mxu0 %vm333_vm1, %v1261_v54 }
  0xbc   : > { %9694 = vmatprep.mubr.msk.f32.mxu0 %vm333_vm1, %v1262_v55 }
  0xbf   : > { %9695 = vmatmul.mubr.msk.f32.gmra.mrb[32].mxu0 %vm333_vm1, %v1263_v56 }
  0xc0   : > { %9697 = vmatprep.mubr.msk.f32.mxu0 %vm333_vm1, %v1264_v57 }
  0xc3   : > { %9698 = vmatmul.mubr.msk.f32.gmra.mrb[34].mxu0 %vm333_vm1, %v1265_v58 }
  0xc4   : > { %9702 = vmatprep.mubr.msk.f32.mxu0 %vm333_vm1, %v11968_v23  ;;  %v2113_v23 = vld [vmem:[#allocation2 + $0xcb] sm:$0xff] }
  0xc7   : > { %9703 = vmatmul.mubr.msk.f32.vlgmr.msra.gmra.mrb[0].mxu0 %vm333_vm1, %v11980_v25  ;;  %v2115_v25 = vld [vmem:[#allocation2 + $0xdb] sm:$0xff] }
  0xc8   : > { %9757 = vmatpush3.msk.msra.mxu0 %vm625_vm0, %v11973_v24  ;;  %9705 = vmatprep.mubr.msk.f32.mxu0 %vm333_vm1, %v11982_v26  ;;  %v2114_v24 = vld [vmem:[#allocation2 + $0xd3] sm:$0xff]  ;;  %v2116_v26 = vld [vmem:[#allocation2 + $0xe3] sm:$0xff] }
  0xc9   : > { %9812 = vmatprep.subr.msk.mxu0 %vm625_vm0, %v8267_v59 }
  0xcb   : > { %9706 = vmatmul.mubr.msk.f32.gmra.mrb[2].mxu0 %vm333_vm1, %v11992_v28  ;;  %v2118_v28 = vld [vmem:[#allocation2 + $0xf3] sm:$0xff] }
  0xcc   : > { %9708 = vmatprep.mubr.msk.f32.mxu0 %vm333_vm1, %v11994_v29  ;;  %v2119_v29 = vld [vmem:[#allocation2 + $0xfb] sm:$0xff] }
  0xcf   : > { %9709 = vmatmul.mubr.msk.f32.gmra.mrb[4].mxu0 %vm333_vm1, %v12000_v30  ;;  %v2120_v30 = vld [vmem:[#allocation2 + $0x103] sm:$0xff] }
  0xd0   : > { %9711 = vmatprep.mubr.msk.f32.mxu0 %vm333_vm1, %v12002_v31  ;;  %v2121_v31 = vld [vmem:[#allocation2 + $0x10b] sm:$0xff] }
  0xd3   : > { %9712 = vmatmul.mubr.msk.f32.gmra.mrb[6].mxu0 %vm333_vm1, %v12008_v32  ;;  %v2122_v32 = vld [vmem:[#allocation2 + $0x113] sm:$0xff] }
  0xd4   : > { %9714 = vmatprep.mubr.msk.f32.mxu0 %vm333_vm1, %v12010_v33  ;;  %v2123_v33 = vld [vmem:[#allocation2 + $0x11b] sm:$0xff] }
  0xd7   : > { %9715 = vmatmul.mubr.msk.f32.gmra.mrb[8].mxu0 %vm333_vm1, %v1241_v34  ;;  %v2124_v34 = vld [vmem:[#allocation2 + $0x123] sm:$0xff] }
  0xd8   : > { %9717 = vmatprep.mubr.msk.f32.mxu0 %vm333_vm1, %v1242_v35  ;;  %v2125_v35 = vld [vmem:[#allocation2 + $0x12b] sm:$0xff] }
  0xdb   : > { %9718 = vmatmul.mubr.msk.f32.gmra.mrb[10].mxu0 %vm333_vm1, %v1243_v36  ;;  %v2520_v36 = vld [vmem:[#allocation2 + $0x14] sm:$0xff] }
  0xdc   : > { %9720 = vmatprep.mubr.msk.f32.mxu0 %vm333_vm1, %v1244_v37  ;;  %v2521_v37 = vld [vmem:[#allocation2 + $0x1c] sm:$0xff] }
  0xdf   : > { %9721 = vmatmul.mubr.msk.f32.gmra.mrb[12].mxu0 %vm333_vm1, %v1245_v38  ;;  %v12137_v38 = vld [vmem:[#allocation2 + $0x24] sm:$0xff] }
  0xe0   : > { %9723 = vmatprep.mubr.msk.f32.mxu0 %vm333_vm1, %v1246_v39  ;;  %v12142_v39 = vld [vmem:[%s13499_s1 + $0x1c] sm:$0xf] }
  0xe3   : > { %9724 = vmatmul.mubr.msk.f32.gmra.mrb[14].mxu0 %vm333_vm1, %v1247_v40  ;;  %v12149_v40 = vld [vmem:[#allocation2 + $0x2c] sm:$0xff] }
  0xe4   : > { %9726 = vmatprep.mubr.msk.f32.mxu0 %vm333_vm1, %v1248_v41  ;;  %v12151_v41 = vld [vmem:[#allocation2 + $0x34] sm:$0xff] }
  0xe7   : > { %9727 = vmatmul.mubr.msk.f32.gmra.mrb[16].mxu0 %vm333_vm1, %v1249_v42  ;;  %v12159_v42 = vld [vmem:[#allocation2 + $0x3c] sm:$0xff] }
  0xe8   : > { %9729 = vmatprep.mubr.msk.f32.mxu0 %vm333_vm1, %v1250_v43  ;;  %v12161_v43 = vld [vmem:[#allocation2 + $0x44] sm:$0xff] }
  0xeb   : > { %9730 = vmatmul.mubr.msk.f32.gmra.mrb[18].mxu0 %vm333_vm1, %v1251_v44  ;;  %v12167_v44 = vld [vmem:[#allocation2 + $0x4c] sm:$0xff] }
  0xec   : > { %9732 = vmatprep.mubr.msk.f32.mxu0 %vm333_vm1, %v1252_v45  ;;  %v12169_v45 = vld [vmem:[#allocation2 + $0x54] sm:$0xff] }
  0xef   : > { %9733 = vmatmul.mubr.msk.f32.gmra.mrb[20].mxu0 %vm333_vm1, %v1253_v46  ;;  %v12175_v46 = vld [vmem:[#allocation2 + $0x5c] sm:$0xff] }
  0xf0   : > { %9735 = vmatprep.mubr.msk.f32.mxu0 %vm333_vm1, %v1254_v47  ;;  %v12177_v47 = vld [vmem:[#allocation2 + $0x64] sm:$0xff] }
  0xf3   : > { %9736 = vmatmul.mubr.msk.f32.gmra.mrb[22].mxu0 %vm333_vm1, %v1255_v48  ;;  %v2531_v48 = vld [vmem:[#allocation2 + $0x6c] sm:$0xff] }
  0xf4   : > { %9738 = vmatprep.mubr.msk.f32.mxu0 %vm333_vm1, %v1256_v49  ;;  %v2532_v49 = vld [vmem:[#allocation2 + $0x74] sm:$0xff] }
  0xf7   : > { %9739 = vmatmul.mubr.msk.f32.gmra.mrb[24].mxu0 %vm333_vm1, %v1257_v50  ;;  %v2533_v50 = vld [vmem:[#allocation2 + $0x7c] sm:$0xff] }
  0xf8   : > { %9741 = vmatprep.mubr.msk.f32.mxu0 %vm333_vm1, %v1258_v51  ;;  %v2534_v51 = vld [vmem:[#allocation2 + $0x84] sm:$0xff] }
  0xfb   : > { %9742 = vmatmul.mubr.msk.f32.gmra.mrb[26].mxu0 %vm333_vm1, %v1259_v52  ;;  %v2535_v52 = vld [vmem:[#allocation2 + $0x8c] sm:$0xff] }
  0xfc   : > { %9744 = vmatprep.mubr.msk.f32.mxu0 %vm333_vm1, %v1260_v53  ;;  %v2536_v53 = vld [vmem:[#allocation2 + $0x94] sm:$0xff] }
  0xff   : > { %9745 = vmatmul.mubr.msk.f32.gmra.mrb[28].mxu0 %vm333_vm1, %v1261_v54  ;;  %v2537_v54 = vld [vmem:[#allocation2 + $0x9c] sm:$0xff] }
 0x100   : > { %9747 = vmatprep.mubr.msk.f32.mxu0 %vm333_vm1, %v1262_v55  ;;  %v2538_v55 = vld [vmem:[#allocation2 + $0xa4] sm:$0xff] }
 0x103   : > { %9748 = vmatmul.mubr.msk.f32.gmra.mrb[30].mxu0 %vm333_vm1, %v1263_v56  ;;  %v2539_v56 = vld [vmem:[#allocation2 + $0xac] sm:$0xff] }
 0x104   : > { %9750 = vmatprep.mubr.msk.f32.mxu0 %vm333_vm1, %v1264_v57  ;;  %v2540_v57 = vld [vmem:[#allocation2 + $0xb4] sm:$0xff] }
 0x107   : > { %9751 = vmatmul.mubr.msk.f32.gmra.mrb[32].mxu0 %vm333_vm1, %v1265_v58  ;;  %v2541_v58 = vld [vmem:[#allocation2 + $0xbc] sm:$0xff] }
 0x108   : > { %9753 = vmatprep.mubr.msk.f32.mxu0 %vm333_vm1, %v1694_v60  ;;  %v2543_v60 = vld [vmem:[#allocation2 + $0xcc] sm:$0xff] }
 0x10b   : > { %9754 = vmatmul.mubr.msk.f32.gmra.mrb[34].mxu0 %vm333_vm1, %v1695_v61  ;;  %v2544_v61 = vld [vmem:[#allocation2 + $0xd4] sm:$0xff] }
 0x10c   : > { %9758 = vmatprep.mubr.msk.f32.mxu0 %vm333_vm1, %v2090_v62  ;;  %v2545_v62 = vld [vmem:[#allocation2 + $0xdc] sm:$0xff] }
 0x10f   : > { %9759 = vmatmul.mubr.msk.f32.vlgmr.msra.gmra.mrb[0].mxu0 %vm333_vm1, %v2091_v63  ;;  %v2546_v63 = vld [vmem:[#allocation2 + $0xe4] sm:$0xff] }
 0x110   : > { %9813 = vmatpush3.msk.msra.mxu0 %vm625_vm0, %v8267_v59  ;;  %9761 = vmatprep.mubr.msk.f32.mxu0 %vm333_vm1, %v2092_v0  ;;  %v2542_v59 = vld [vmem:[#allocation2 + $0xc4] sm:$0xff]  ;;  %v2547_v0 = vld [vmem:[#allocation2 + $0xec] sm:$0xff] }
 0x111   : > { %9868 = vmatprep.subr.msk.mxu0 %vm625_vm0, %v12096_v2 }
 0x113   : > { %9762 = vmatmul.mubr.msk.f32.gmra.mrb[2].mxu0 %vm333_vm1, %v2093_v3  ;;  %v2549_v3 = vld [vmem:[#allocation2 + $0xfc] sm:$0xff] }
 0x114   : > { %9764 = vmatprep.mubr.msk.f32.mxu0 %vm333_vm1, %v2094_v4  ;;  %v2550_v4 = vld [vmem:[#allocation2 + $0x104] sm:$0xff] }
 0x117   : > { %9765 = vmatmul.mubr.msk.f32.gmra.mrb[4].mxu0 %vm333_vm1, %v2095_v5  ;;  %v2551_v5 = vld [vmem:[#allocation2 + $0x10c] sm:$0xff] }
 0x118   : > { %9767 = vmatprep.mubr.msk.f32.mxu0 %vm333_vm1, %v2096_v6  ;;  %v12203_v6 = vld [vmem:[#allocation2 + $0x114] sm:$0xff] }
 0x11b   : > { %9768 = vmatmul.mubr.msk.f32.gmra.mrb[6].mxu0 %vm333_vm1, %v2097_v7  ;;  %v12208_v7 = vld [vmem:[#allocation2 + $0x11c] sm:$0xff] }
 0x11c   : > { %9770 = vmatprep.mubr.msk.f32.mxu0 %vm333_vm1, %v2098_v8  ;;  %v12210_v8 = vld [vmem:[#allocation2 + $0x124] sm:$0xff] }
 0x11f   : > { %9771 = vmatmul.mubr.msk.f32.gmra.mrb[8].mxu0 %vm333_vm1, %v2099_v9  ;;  %v12216_v9 = vld [vmem:[#allocation2 + $0x12c] sm:$0xff] }
 0x120   : > { %9773 = vmatprep.mubr.msk.f32.mxu0 %vm333_vm1, %v2100_v10  ;;  %v12225_v10 = vld [vmem:[%s13499_s1 + $0x20] sm:$0xf] }
 0x123   : > { %9774 = vmatmul.mubr.msk.f32.gmra.mrb[10].mxu0 %vm333_vm1, %v2101_v11  ;;  %v491_v11 = vld [vmem:[#allocation2 + $0x61] sm:$0xff] }
 0x124   : > { %9776 = vmatprep.mubr.msk.f32.mxu0 %vm333_vm1, %v2102_v12  ;;  %v492_v12 = vld [vmem:[#allocation2 + $0x69] sm:$0xff]  ;;  %9552 = vmatprep.mubr.msk.f32.mxu1 %vm333_vm1, %v491_v11 }
 0x125   : > { %9553 = vmatmul.mubr.msk.f32.vlgmr.msra.gmra.mrb[0].mxu1 %vm333_vm1, %v492_v12  ;;  %v3811_v11 = vld [vmem:[#allocation2 + $0x2e] sm:$0xff]  ;;  %v3812_v12 = vld [vmem:[#allocation2 + $0x36] sm:$0xff] }
 0x127   : > { %9777 = vmatmul.mubr.msk.f32.gmra.mrb[12].mxu0 %vm333_vm1, %v2103_v13  ;;  %v493_v13 = vld [vmem:[#allocation2 + $0x71] sm:$0xff] }
 0x128   : > { %9779 = vmatprep.mubr.msk.f32.mxu0 %vm333_vm1, %v2104_v14  ;;  %v494_v14 = vld [vmem:[#allocation2 + $0x79] sm:$0xff]  ;;  %9555 = vmatprep.mubr.msk.f32.mxu1 %vm333_vm1, %v493_v13 }
 0x129   : > { %9556 = vmatmul.mubr.msk.f32.gmra.mrb[2].mxu1 %vm333_vm1, %v494_v14  ;;  %v3813_v13 = vld [vmem:[#allocation2 + $0x3e] sm:$0xff]  ;;  %v3814_v14 = vld [vmem:[#allocation2 + $0x46] sm:$0xff] }
 0x12b   : > { %9780 = vmatmul.mubr.msk.f32.gmra.mrb[14].mxu0 %vm333_vm1, %v2105_v15  ;;  %v495_v15 = vld [vmem:[#allocation2 + $0x81] sm:$0xff] }
 0x12c   : > { %9782 = vmatprep.mubr.msk.f32.mxu0 %vm333_vm1, %v2106_v16  ;;  %v496_v16 = vld [vmem:[#allocation2 + $0x89] sm:$0xff]  ;;  %9558 = vmatprep.mubr.msk.f32.mxu1 %vm333_vm1, %v495_v15 }
 0x12d   : > { %9559 = vmatmul.mubr.msk.f32.gmra.mrb[4].mxu1 %vm333_vm1, %v496_v16  ;;  %v3815_v15 = vld [vmem:[#allocation2 + $0x4e] sm:$0xff]  ;;  %v3816_v16 = vld [vmem:[#allocation2 + $0x56] sm:$0xff] }
 0x12f   : > { %9783 = vmatmul.mubr.msk.f32.gmra.mrb[16].mxu0 %vm333_vm1, %v2107_v17  ;;  %v497_v17 = vld [vmem:[#allocation2 + $0x91] sm:$0xff] }
 0x130   : > { %9785 = vmatprep.mubr.msk.f32.mxu0 %vm333_vm1, %v2108_v18  ;;  %v498_v18 = vld [vmem:[#allocation2 + $0x99] sm:$0xff]  ;;  %9561 = vmatprep.mubr.msk.f32.mxu1 %vm333_vm1, %v497_v17 }
 0x131   : > { %9562 = vmatmul.mubr.msk.f32.gmra.mrb[6].mxu1 %vm333_vm1, %v498_v18  ;;  %v3817_v17 = vld [vmem:[#allocation2 + $0x5e] sm:$0xff]  ;;  %v3818_v18 = vld [vmem:[#allocation2 + $0x66] sm:$0xff] }
 0x133   : > { %9786 = vmatmul.mubr.msk.f32.gmra.mrb[18].mxu0 %vm333_vm1, %v2109_v19  ;;  %v499_v19 = vld [vmem:[#allocation2 + $0xa1] sm:$0xff] }
 0x134   : > { %9788 = vmatprep.mubr.msk.f32.mxu0 %vm333_vm1, %v2110_v20  ;;  %v500_v20 = vld [vmem:[#allocation2 + $0xa9] sm:$0xff]  ;;  %9564 = vmatprep.mubr.msk.f32.mxu1 %vm333_vm1, %v499_v19 }
 0x135   : > { %9565 = vmatmul.mubr.msk.f32.gmra.mrb[8].mxu1 %vm333_vm1, %v500_v20  ;;  %v3819_v19 = vld [vmem:[#allocation2 + $0x6e] sm:$0xff]  ;;  %v3820_v20 = vld [vmem:[#allocation2 + $0x76] sm:$0xff] }
 0x137   : > { %9789 = vmatmul.mubr.msk.f32.gmra.mrb[20].mxu0 %vm333_vm1, %v2111_v21  ;;  %v501_v21 = vld [vmem:[#allocation2 + $0xb1] sm:$0xff] }
 0x138   : > { %9791 = vmatprep.mubr.msk.f32.mxu0 %vm333_vm1, %v2112_v22  ;;  %v502_v22 = vld [vmem:[#allocation2 + $0xb9] sm:$0xff]  ;;  %9567 = vmatprep.mubr.msk.f32.mxu1 %vm333_vm1, %v501_v21 }
 0x139   : > { %9568 = vmatmul.mubr.msk.f32.gmra.mrb[10].mxu1 %vm333_vm1, %v502_v22  ;;  %v3821_v21 = vld [vmem:[#allocation2 + $0x7e] sm:$0xff]  ;;  %v3822_v22 = vld [vmem:[#allocation2 + $0x86] sm:$0xff] }
 0x13b   : > { %9792 = vmatmul.mubr.msk.f32.gmra.mrb[22].mxu0 %vm333_vm1, %v2113_v23  ;;  %v503_v23 = vld [vmem:[#allocation2 + $0xc1] sm:$0xff] }
 0x13c   : > { %9794 = vmatprep.mubr.msk.f32.mxu0 %vm333_vm1, %v2114_v24  ;;  %v504_v24 = vld [vmem:[#allocation2 + $0xc9] sm:$0xff]  ;;  %9570 = vmatprep.mubr.msk.f32.mxu1 %vm333_vm1, %v503_v23 }
 0x13d   : > { %9571 = vmatmul.mubr.msk.f32.gmra.mrb[12].mxu1 %vm333_vm1, %v504_v24  ;;  %v3823_v23 = vld [vmem:[#allocation2 + $0x8e] sm:$0xff]  ;;  %v3824_v24 = vld [vmem:[#allocation2 + $0x96] sm:$0xff] }
 0x13f   : > { %9795 = vmatmul.mubr.msk.f32.gmra.mrb[24].mxu0 %vm333_vm1, %v2115_v25  ;;  %v2984_v25 = vld [vmem:[#allocation2 + $0x134] sm:$0xff] }
 0x140   : > { %9797 = vmatprep.mubr.msk.f32.mxu0 %vm333_vm1, %v2116_v26  ;;  %v505_v26 = vld [vmem:[#allocation2 + $0xd1] sm:$0xff] }
 0x141   : > { %9573 = vmatprep.mubr.msk.f32.mxu1 %vm333_vm1, %v505_v26  ;;  %v3826_v26 = vld [vmem:[#allocation2 + $0xa6] sm:$0xff] }
 0x143   : > { %9798 = vmatmul.mubr.msk.f32.gmra.mrb[26].mxu0 %vm333_vm1, %v2117_v27  ;;  %v506_v27 = vld [vmem:[#allocation2 + $0xd9] sm:$0xff] }
 0x144   : > { %9800 = vmatprep.mubr.msk.f32.mxu0 %vm333_vm1, %v2118_v28  ;;  %v2985_v28 = vld [vmem:[#allocation2 + $0x13c] sm:$0xff]  ;;  %9574 = vmatmul.mubr.msk.f32.gmra.mrb[14].mxu1 %vm333_vm1, %v506_v27  ;;  %v3827_v27 = vld [vmem:[#allocation2 + $0xae] sm:$0xff] }
 0x147   : > { %9801 = vmatmul.mubr.msk.f32.gmra.mrb[28].mxu0 %vm333_vm1, %v2119_v29  ;;  %v3380_v29 = vld [vmem:[#allocation2 + $0x25] sm:$0xff] }
 0x148   : > { %9803 = vmatprep.mubr.msk.f32.mxu0 %vm333_vm1, %v2120_v30  ;;  %v507_v30 = vld [vmem:[#allocation2 + $0xe1] sm:$0xff] }
 0x149   : > { %9576 = vmatprep.mubr.msk.f32.mxu1 %vm333_vm1, %v507_v30  ;;  %v3830_v30 = vld [vmem:[#allocation2 + $0xc6] sm:$0xff] }
 0x14b   : > { %9804 = vmatmul.mubr.msk.f32.gmra.mrb[30].mxu0 %vm333_vm1, %v2121_v31  ;;  %v508_v31 = vld [vmem:[#allocation2 + $0xe9] sm:$0xff] }
 0x14c   : > { %9806 = vmatprep.mubr.msk.f32.mxu0 %vm333_vm1, %v2122_v32  ;;  %v3381_v32 = vld [vmem:[#allocation2 + $0x2d] sm:$0xff]  ;;  %9577 = vmatmul.mubr.msk.f32.gmra.mrb[16].mxu1 %vm333_vm1, %v508_v31 }
 0x14d   : > { %v3831_v31 = vld [vmem:[#allocation2 + $0xce] sm:$0xff] }
 0x14f   : > { %9807 = vmatmul.mubr.msk.f32.gmra.mrb[32].mxu0 %vm333_vm1, %v2123_v33  ;;  %v3382_v33 = vld [vmem:[#allocation2 + $0x35] sm:$0xff] }
 0x150   : > { %9809 = vmatprep.mubr.msk.f32.mxu0 %vm333_vm1, %v2124_v34  ;;  %v509_v34 = vld [vmem:[#allocation2 + $0xf1] sm:$0xff] }
 0x151   : > { %9579 = vmatprep.mubr.msk.f32.mxu1 %vm333_vm1, %v509_v34  ;;  %v3834_v34 = vld [vmem:[#allocation2 + $0xe6] sm:$0xff] }
 0x153   : > { %9810 = vmatmul.mubr.msk.f32.gmra.mrb[34].mxu0 %vm333_vm1, %v2125_v35  ;;  %v510_v35 = vld [vmem:[#allocation2 + $0xf9] sm:$0xff] }
 0x154   : > { %9814 = vmatprep.mubr.msk.f32.mxu0 %vm333_vm1, %v2520_v36  ;;  %v3383_v36 = vld [vmem:[#allocation2 + $0x3d] sm:$0xff]  ;;  %9580 = vmatmul.mubr.msk.f32.gmra.mrb[18].mxu1 %vm333_vm1, %v510_v35  ;;  %v3835_v35 = vld [vmem:[#allocation2 + $0xee] sm:$0xff] }
 0x157   : > { %9815 = vmatmul.mubr.msk.f32.vlgmr.msra.gmra.mrb[0].mxu0 %vm333_vm1, %v2521_v37  ;;  %v3384_v37 = vld [vmem:[#allocation2 + $0x45] sm:$0xff] }
 0x158   : > { %9869 = vmatpush3.msk.msra.mxu0 %vm625_vm0, %v12096_v2  ;;  %9817 = vmatprep.mubr.msk.f32.mxu0 %vm333_vm1, %v12137_v38  ;;  %v2548_v2 = vld [vmem:[#allocation2 + $0xf4] sm:$0xff] }
 0x159   : > { %9924 = vmatprep.subr.msk.mxu0 %vm625_vm0, %v12142_v39 }
 0x15b   : > { %9818 = vmatmul.mubr.msk.f32.gmra.mrb[2].mxu0 %vm333_vm1, %v12149_v40 }
 0x15c   : > { %9820 = vmatprep.mubr.msk.f32.mxu0 %vm333_vm1, %v12151_v41 }
 0x15f   : > { %9821 = vmatmul.mubr.msk.f32.gmra.mrb[4].mxu0 %vm333_vm1, %v12159_v42 }
 0x160   : > { %9823 = vmatprep.mubr.msk.f32.mxu0 %vm333_vm1, %v12161_v43 }
 0x163   : > { %9824 = vmatmul.mubr.msk.f32.gmra.mrb[6].mxu0 %vm333_vm1, %v12167_v44 }
 0x164   : > { %9826 = vmatprep.mubr.msk.f32.mxu0 %vm333_vm1, %v12169_v45 }
 0x167   : > { %9827 = vmatmul.mubr.msk.f32.gmra.mrb[8].mxu0 %vm333_vm1, %v12175_v46 }
 0x168   : > { %9829 = vmatprep.mubr.msk.f32.mxu0 %vm333_vm1, %v12177_v47 }
 0x16b   : > { %9830 = vmatmul.mubr.msk.f32.gmra.mrb[10].mxu0 %vm333_vm1, %v2531_v48 }
 0x16c   : > { %9832 = vmatprep.mubr.msk.f32.mxu0 %vm333_vm1, %v2532_v49 }
 0x16f   : > { %9833 = vmatmul.mubr.msk.f32.gmra.mrb[12].mxu0 %vm333_vm1, %v2533_v50 }
 0x170   : > { %9835 = vmatprep.mubr.msk.f32.mxu0 %vm333_vm1, %v2534_v51 }
 0x173   : > { %9836 = vmatmul.mubr.msk.f32.gmra.mrb[14].mxu0 %vm333_vm1, %v2535_v52 }
 0x174   : > { %9838 = vmatprep.mubr.msk.f32.mxu0 %vm333_vm1, %v2536_v53 }
 0x177   : > { %9839 = vmatmul.mubr.msk.f32.gmra.mrb[16].mxu0 %vm333_vm1, %v2537_v54 }
 0x178   : > { %9841 = vmatprep.mubr.msk.f32.mxu0 %vm333_vm1, %v2538_v55 }
 0x17b   : > { %9842 = vmatmul.mubr.msk.f32.gmra.mrb[18].mxu0 %vm333_vm1, %v2539_v56 }
 0x17c   : > { %9844 = vmatprep.mubr.msk.f32.mxu0 %vm333_vm1, %v2540_v57 }
 0x17f   : > { %9845 = vmatmul.mubr.msk.f32.gmra.mrb[20].mxu0 %vm333_vm1, %v2541_v58 }
 0x180   : > { %9847 = vmatprep.mubr.msk.f32.mxu0 %vm333_vm1, %v2542_v59 }
 0x183   : > { %9848 = vmatmul.mubr.msk.f32.gmra.mrb[22].mxu0 %vm333_vm1, %v2543_v60 }
 0x184   : > { %9850 = vmatprep.mubr.msk.f32.mxu0 %vm333_vm1, %v2544_v61 }
 0x187   : > { %9851 = vmatmul.mubr.msk.f32.gmra.mrb[24].mxu0 %vm333_vm1, %v2545_v62 }
 0x188   : > { %9853 = vmatprep.mubr.msk.f32.mxu0 %vm333_vm1, %v2546_v63 }
 0x18b   : > { %9854 = vmatmul.mubr.msk.f32.gmra.mrb[26].mxu0 %vm333_vm1, %v2547_v0 }
 0x18c   : > { %9856 = vmatprep.mubr.msk.f32.mxu0 %vm333_vm1, %v2548_v2 }
 0x18f   : > { %9857 = vmatmul.mubr.msk.f32.gmra.mrb[28].mxu0 %vm333_vm1, %v2549_v3 }
 0x190   : > { %9859 = vmatprep.mubr.msk.f32.mxu0 %vm333_vm1, %v2550_v4 }
 0x193   : > { %9860 = vmatmul.mubr.msk.f32.gmra.mrb[30].mxu0 %vm333_vm1, %v2551_v5 }
 0x194   : > { %9862 = vmatprep.mubr.msk.f32.mxu0 %vm333_vm1, %v12203_v6 }
 0x197   : > { %9863 = vmatmul.mubr.msk.f32.gmra.mrb[32].mxu0 %vm333_vm1, %v12208_v7 }
 0x198   : > { %9865 = vmatprep.mubr.msk.f32.mxu0 %vm333_vm1, %v12210_v8 }
 0x19b   : > { %9866 = vmatmul.mubr.msk.f32.gmra.mrb[34].mxu0 %vm333_vm1, %v12216_v9 }
 0x19c   : > { %9870 = vmatprep.mubr.msk.f32.mxu0 %vm333_vm1, %v12137_v38  ;;  %v511_v38 = vld [vmem:[#allocation2 + $0x101] sm:$0xff] }
 0x19d   : > { %9582 = vmatprep.mubr.msk.f32.mxu1 %vm333_vm1, %v511_v38  ;;  %v3838_v38 = vld [vmem:[#allocation2 + $0x106] sm:$0xff] }
 0x19f   : > { %9871 = vmatmul.mubr.msk.f32.vlgmr.msra.gmra.mrb[0].mxu0 %vm333_vm1, %v12149_v40  ;;  %v512_v40 = vld [vmem:[#allocation2 + $0x109] sm:$0xff] }
 0x1a0   : > { %9925 = vmatpush3.msk.msra.mxu0 %vm625_vm0, %v12142_v39  ;;  %9873 = vmatprep.mubr.msk.f32.mxu0 %vm333_vm1, %v12151_v41  ;;  %v3385_v39 = vld [vmem:[#allocation2 + $0x4d] sm:$0xff]  ;;  %v3386_v41 = vld [vmem:[#allocation2 + $0x55] sm:$0xff] }
 0x1a1   : > { %9980 = vmatprep.subr.msk.mxu0 %vm625_vm0, %v12225_v10  ;;  %9583 = vmatmul.mubr.msk.f32.gmra.mrb[20].mxu1 %vm333_vm1, %v512_v40  ;;  %v3840_v40 = vld [vmem:[#allocation2 + $0x116] sm:$0xff] }
 0x1a3   : > { %9874 = vmatmul.mubr.msk.f32.gmra.mrb[2].mxu0 %vm333_vm1, %v12159_v42  ;;  %v513_v42 = vld [vmem:[#allocation2 + $0x111] sm:$0xff] }
 0x1a4   : > { %9876 = vmatprep.mubr.msk.f32.mxu0 %vm333_vm1, %v12161_v43  ;;  %v3387_v43 = vld [vmem:[#allocation2 + $0x5d] sm:$0xff]  ;;  %9585 = vmatprep.mubr.msk.f32.mxu1 %vm333_vm1, %v513_v42  ;;  %v3842_v42 = vld [vmem:[#allocation2 + $0x126] sm:$0xff] }
 0x1a7   : > { %9877 = vmatmul.mubr.msk.f32.gmra.mrb[4].mxu0 %vm333_vm1, %v12167_v44  ;;  %v514_v44 = vld [vmem:[#allocation2 + $0x119] sm:$0xff] }
 0x1a8   : > { %9879 = vmatprep.mubr.msk.f32.mxu0 %vm333_vm1, %v12169_v45  ;;  %v3388_v45 = vld [vmem:[#allocation2 + $0x65] sm:$0xff]  ;;  %9586 = vmatmul.mubr.msk.f32.gmra.mrb[22].mxu1 %vm333_vm1, %v514_v44  ;;  %v3844_v44 = vld [vmem:[#allocation2 + $0x136] sm:$0xff] }
 0x1ab   : > { %9880 = vmatmul.mubr.msk.f32.gmra.mrb[6].mxu0 %vm333_vm1, %v12175_v46  ;;  %v3389_v46 = vld [vmem:[#allocation2 + $0x6d] sm:$0xff] }
 0x1ac   : > { %9882 = vmatprep.mubr.msk.f32.mxu0 %vm333_vm1, %v12177_v47  ;;  %v3390_v47 = vld [vmem:[#allocation2 + $0x75] sm:$0xff] }
 0x1af   : > { %9883 = vmatmul.mubr.msk.f32.gmra.mrb[8].mxu0 %vm333_vm1, %v2531_v48  ;;  %v3391_v48 = vld [vmem:[#allocation2 + $0x7d] sm:$0xff] }
 0x1b0   : > { %9885 = vmatprep.mubr.msk.f32.mxu0 %vm333_vm1, %v2532_v49  ;;  %v3392_v49 = vld [vmem:[#allocation2 + $0x85] sm:$0xff] }
 0x1b3   : > { %9886 = vmatmul.mubr.msk.f32.gmra.mrb[10].mxu0 %vm333_vm1, %v2533_v50  ;;  %v3393_v50 = vld [vmem:[#allocation2 + $0x8d] sm:$0xff] }
 0x1b4   : > { %9888 = vmatprep.mubr.msk.f32.mxu0 %vm333_vm1, %v2534_v51  ;;  %v3394_v51 = vld [vmem:[#allocation2 + $0x95] sm:$0xff] }
 0x1b7   : > { %9889 = vmatmul.mubr.msk.f32.gmra.mrb[12].mxu0 %vm333_vm1, %v2535_v52  ;;  %v3395_v52 = vld [vmem:[#allocation2 + $0x9d] sm:$0xff] }
 0x1b8   : > { %9891 = vmatprep.mubr.msk.f32.mxu0 %vm333_vm1, %v2536_v53  ;;  %v3396_v53 = vld [vmem:[#allocation2 + $0xa5] sm:$0xff] }
 0x1bb   : > { %9892 = vmatmul.mubr.msk.f32.gmra.mrb[14].mxu0 %vm333_vm1, %v2537_v54  ;;  %v3397_v54 = vld [vmem:[#allocation2 + $0xad] sm:$0xff] }
 0x1bc   : > { %9894 = vmatprep.mubr.msk.f32.mxu0 %vm333_vm1, %v2538_v55  ;;  %v3398_v55 = vld [vmem:[#allocation2 + $0xb5] sm:$0xff] }
 0x1bf   : > { %9895 = vmatmul.mubr.msk.f32.gmra.mrb[16].mxu0 %vm333_vm1, %v2539_v56  ;;  %v3399_v56 = vld [vmem:[#allocation2 + $0xbd] sm:$0xff] }
 0x1c0   : > { %9897 = vmatprep.mubr.msk.f32.mxu0 %vm333_vm1, %v2540_v57  ;;  %v3400_v57 = vld [vmem:[#allocation2 + $0xc5] sm:$0xff] }
 0x1c3   : > { %9898 = vmatmul.mubr.msk.f32.gmra.mrb[18].mxu0 %vm333_vm1, %v2541_v58  ;;  %v3401_v58 = vld [vmem:[#allocation2 + $0xcd] sm:$0xff] }
 0x1c4   : > { %9900 = vmatprep.mubr.msk.f32.mxu0 %vm333_vm1, %v2542_v59  ;;  %v3402_v59 = vld [vmem:[#allocation2 + $0xd5] sm:$0xff] }
 0x1c7   : > { %9901 = vmatmul.mubr.msk.f32.gmra.mrb[20].mxu0 %vm333_vm1, %v2543_v60  ;;  %v3403_v60 = vld [vmem:[#allocation2 + $0xdd] sm:$0xff] }
 0x1c8   : > { %9903 = vmatprep.mubr.msk.f32.mxu0 %vm333_vm1, %v2544_v61  ;;  %v3404_v61 = vld [vmem:[#allocation2 + $0xe5] sm:$0xff] }
 0x1cb   : > { %9904 = vmatmul.mubr.msk.f32.gmra.mrb[22].mxu0 %vm333_vm1, %v2545_v62  ;;  %v3405_v62 = vld [vmem:[#allocation2 + $0xed] sm:$0xff] }
 0x1cc   : > { %9906 = vmatprep.mubr.msk.f32.mxu0 %vm333_vm1, %v2546_v63  ;;  %v3406_v63 = vld [vmem:[#allocation2 + $0xf5] sm:$0xff] }
 0x1cf   : > { %9907 = vmatmul.mubr.msk.f32.gmra.mrb[24].mxu0 %vm333_vm1, %v2547_v0  ;;  %v3407_v0 = vld [vmem:[#allocation2 + $0xfd] sm:$0xff] }
 0x1d0   : > { %9909 = vmatprep.mubr.msk.f32.mxu0 %vm333_vm1, %v2548_v2  ;;  %v3408_v2 = vld [vmem:[#allocation2 + $0x105] sm:$0xff] }
 0x1d3   : > { %9910 = vmatmul.mubr.msk.f32.gmra.mrb[26].mxu0 %vm333_vm1, %v2549_v3  ;;  %v3409_v3 = vld [vmem:[#allocation2 + $0x10d] sm:$0xff] }
 0x1d4   : > { %9912 = vmatprep.mubr.msk.f32.mxu0 %vm333_vm1, %v2550_v4  ;;  %v3410_v4 = vld [vmem:[#allocation2 + $0x115] sm:$0xff] }
 0x1d7   : > { %9913 = vmatmul.mubr.msk.f32.gmra.mrb[28].mxu0 %vm333_vm1, %v2551_v5  ;;  %v3411_v5 = vld [vmem:[#allocation2 + $0x11d] sm:$0xff] }
 0x1d8   : > { %9915 = vmatprep.mubr.msk.f32.mxu0 %vm333_vm1, %v12203_v6  ;;  %v3412_v6 = vld [vmem:[#allocation2 + $0x125] sm:$0xff] }
 0x1db   : > { %9916 = vmatmul.mubr.msk.f32.gmra.mrb[30].mxu0 %vm333_vm1, %v12208_v7  ;;  %v3413_v7 = vld [vmem:[#allocation2 + $0x12d] sm:$0xff] }
 0x1dc   : > { %9918 = vmatprep.mubr.msk.f32.mxu0 %vm333_vm1, %v12210_v8  ;;  %v3414_v8 = vld [vmem:[#allocation2 + $0x135] sm:$0xff] }
 0x1df   : > { %9919 = vmatmul.mubr.msk.f32.gmra.mrb[32].mxu0 %vm333_vm1, %v12216_v9  ;;  %v3415_v9 = vld [vmem:[#allocation2 + $0x13d] sm:$0xff] }
 0x1e0   : > { %9921 = vmatprep.mubr.msk.f32.mxu0 %vm333_vm1, %v2984_v25  ;;  %v3825_v25 = vld [vmem:[#allocation2 + $0x9e] sm:$0xff] }
 0x1e3   : > { %9922 = vmatmul.mubr.msk.f32.gmra.mrb[34].mxu0 %vm333_vm1, %v2985_v28  ;;  %v3828_v28 = vld [vmem:[#allocation2 + $0xb6] sm:$0xff] }
 0x1e4   : > { %9926 = vmatprep.mubr.msk.f32.mxu0 %vm333_vm1, %v3380_v29  ;;  %v3829_v29 = vld [vmem:[#allocation2 + $0xbe] sm:$0xff] }
 0x1e7   : > { %9927 = vmatmul.mubr.msk.f32.vlgmr.msra.gmra.mrb[0].mxu0 %vm333_vm1, %v3381_v32  ;;  %v3832_v32 = vld [vmem:[#allocation2 + $0xd6] sm:$0xff] }
 0x1e8   : > { %9981 = vmatpush3.msk.msra.mxu0 %vm625_vm0, %v12225_v10  ;;  %9929 = vmatprep.mubr.msk.f32.mxu0 %vm333_vm1, %v3382_v33  ;;  %v3810_v10 = vld [vmem:[#allocation2 + $0x26] sm:$0xff]  ;;  %v3833_v33 = vld [vmem:[#allocation2 + $0xde] sm:$0xff] }
 0x1eb   : > { %9930 = vmatmul.mubr.msk.f32.gmra.mrb[2].mxu0 %vm333_vm1, %v3383_v36  ;;  %v3836_v36 = vld [vmem:[#allocation2 + $0xf6] sm:$0xff] }
 0x1ec   : > { %9932 = vmatprep.mubr.msk.f32.mxu0 %vm333_vm1, %v3384_v37  ;;  %v3837_v37 = vld [vmem:[#allocation2 + $0xfe] sm:$0xff] }
 0x1ef   : > { %9933 = vmatmul.mubr.msk.f32.gmra.mrb[4].mxu0 %vm333_vm1, %v3385_v39  ;;  %v3839_v39 = vld [vmem:[#allocation2 + $0x10e] sm:$0xff] }
 0x1f0   : > { %9935 = vmatprep.mubr.msk.f32.mxu0 %vm333_vm1, %v3386_v41  ;;  %v3841_v41 = vld [vmem:[#allocation2 + $0x11e] sm:$0xff] }
 0x1f3   : > { %9936 = vmatmul.mubr.msk.f32.gmra.mrb[6].mxu0 %vm333_vm1, %v3387_v43  ;;  %v3843_v43 = vld [vmem:[#allocation2 + $0x12e] sm:$0xff] }
 0x1f4   : > { %9938 = vmatprep.mubr.msk.f32.mxu0 %vm333_vm1, %v3388_v45  ;;  %v3845_v45 = vld [vmem:[#allocation2 + $0x13e] sm:$0xff] }
 0x1f7   : > { %9939 = vmatmul.mubr.msk.f32.gmra.mrb[8].mxu0 %vm333_vm1, %v3389_v46  ;;  %v8420_v46 = vld [vmem:[%s13501_s3 + $0x40] sm:$0xff] }
 0x1f8   : > { %9941 = vmatprep.mubr.msk.f32.mxu0 %vm333_vm1, %v3390_v47  ;;  %v8421_v47 = vld [vmem:[%s13501_s3 + $0x48] sm:$0xff] }
 0x1fb   : > { %9942 = vmatmul.mubr.msk.f32.gmra.mrb[10].mxu0 %vm333_vm1, %v3391_v48  ;;  %v10759_v48 = vpack.c.bf16 %v8421_v47, %v8420_v46 }
 0x1fc   : > { %9944 = vmatprep.mubr.msk.f32.mxu0 %vm333_vm1, %v3392_v49  ;;  %v8422_v49 = vld [vmem:[%s13501_s3 + $0x50] sm:$0xff] }
 0x1fd   : > { %10760 = vmatprep.subr.bf16.mxu1 %v10759_v48 }
 0x1fe   : > { %10762 = vmatpush3.bf16.msra.mxu1 %v10759_v48 }
 0x1ff   : > { %9945 = vmatmul.mubr.msk.f32.gmra.mrb[12].mxu0 %vm333_vm1, %v3393_v50  ;;  %v8423_v50 = vld [vmem:[%s13501_s3 + $0x58] sm:$0xff] }
 0x200   : > { %9947 = vmatprep.mubr.msk.f32.mxu0 %vm333_vm1, %v3394_v51  ;;  %v10763_v1 = vpack.c.bf16 %v8423_v50, %v8422_v49  ;;  %v12414_v51 = vpop.f32.mrb[0].mxu1 }
 0x202   : > { %10764 = vmatprep.subr.bf16.mxu1 %v10763_v1 }
 0x203   : > { %9948 = vmatmul.mubr.msk.f32.gmra.mrb[14].mxu0 %vm333_vm1, %v3395_v52  ;;  %10766 = vmatpush3.bf16.msra.mxu1 %v10763_v1  ;;  %v8424_v52 = vld [vmem:[%s13501_s3 + $0x60] sm:$0xff] }
 0x204   : > { %9950 = vmatprep.mubr.msk.f32.mxu0 %vm333_vm1, %v3396_v53  ;;  %v8425_v53 = vld [vmem:[%s13501_s3 + $0x68] sm:$0xff] }
 0x207   : > { %9951 = vmatmul.mubr.msk.f32.gmra.mrb[16].mxu0 %vm333_vm1, %v3397_v54  ;;  %v12422_v54 = vpop.f32.mrb[1].mxu1 }
 0x208   : > { %9953 = vmatprep.mubr.msk.f32.mxu0 %vm333_vm1, %v3398_v55  ;;  %v10767_v55 = vpack.c.bf16 %v8425_v53, %v8424_v52 }
 0x20a   : > { %10768 = vmatprep.subr.bf16.mxu1 %v10767_v55 }
 0x20b   : > { %9954 = vmatmul.mubr.msk.f32.gmra.mrb[18].mxu0 %vm333_vm1, %v3399_v56  ;;  %v12424_v56 = vpop.f32.mrb[2].mxu1  ;;  %10770 = vmatpush3.bf16.msra.mxu1 %v10767_v55 }
 0x20c   : > { %9956 = vmatprep.mubr.msk.f32.mxu0 %vm333_vm1, %v3400_v57  ;;  %v8426_v57 = vld [vmem:[%s13501_s3 + $0x70] sm:$0xff] }
 0x20f   : > { %9957 = vmatmul.mubr.msk.f32.gmra.mrb[20].mxu0 %vm333_vm1, %v3401_v58  ;;  %v8427_v58 = vld [vmem:[%s13501_s3 + $0x78] sm:$0xff] }
 0x210   : > { %9959 = vmatprep.mubr.msk.f32.mxu0 %vm333_vm1, %v3402_v59  ;;  %v12432_v59 = vpop.f32.mrb[3].mxu1 }
 0x213   : > { %9960 = vmatmul.mubr.msk.f32.gmra.mrb[22].mxu0 %vm333_vm1, %v3403_v60  ;;  %v10771_v60 = vpack.c.bf16 %v8427_v58, %v8426_v57 }
 0x214   : > { %9962 = vmatprep.mubr.msk.f32.mxu0 %vm333_vm1, %v3404_v61  ;;  %v12434_v61 = vpop.f32.mrb[4].mxu1 }
 0x215   : > { %10772 = vmatprep.subr.bf16.mxu1 %v10771_v60 }
 0x216   : > { %10774 = vmatpush3.bf16.msra.mxu1 %v10771_v60 }
 0x217   : > { %9963 = vmatmul.mubr.msk.f32.gmra.mrb[24].mxu0 %vm333_vm1, %v3405_v62  ;;  %v12436_v62 = vpop.f32.mrb[5].mxu1 }
 0x218   : > { %9965 = vmatprep.mubr.msk.f32.mxu0 %vm333_vm1, %v3406_v63  ;;  %v4484_v63 = vld [vmem:[#allocation4 + $0x1] sm:$0xff] }
 0x219   : > { %10052 = vmatprep.mubr.msk.f32.mxu1 %vm4319_vm2, %v4484_v63 }
 0x21b   : > { %9966 = vmatmul.mubr.msk.f32.gmra.mrb[26].mxu0 %vm333_vm1, %v3407_v0  ;;  %v12439_v0 = vpop.f32.mrb[6].mxu1 }
 0x21c   : > { %9968 = vmatprep.mubr.msk.f32.mxu0 %vm333_vm1, %v3408_v2  ;;  %v12441_v2 = vpop.f32.mrb[7].mxu1 }
 0x21f   : > { %9969 = vmatmul.mubr.msk.f32.gmra.mrb[28].mxu0 %vm333_vm1, %v3409_v3  ;;  %v12443_v3 = vpop.f32.mrb[8].mxu1 }
 0x220   : > { %9971 = vmatprep.mubr.msk.f32.mxu0 %vm333_vm1, %v3410_v4  ;;  %v12445_v4 = vpop.f32.mrb[9].mxu1 }
 0x223   : > { %9972 = vmatmul.mubr.msk.f32.gmra.mrb[30].mxu0 %vm333_vm1, %v3411_v5  ;;  %v12447_v5 = vpop.f32.mrb[10].mxu1 }
 0x224   : > { %9974 = vmatprep.mubr.msk.f32.mxu0 %vm333_vm1, %v3412_v6  ;;  %v12449_v6 = vpop.f32.mrb[11].mxu1 }
 0x227   : > { %9975 = vmatmul.mubr.msk.f32.gmra.mrb[32].mxu0 %vm333_vm1, %v3413_v7  ;;  %v12451_v7 = vpop.f32.mrb[12].mxu1 }
 0x228   : > { %9977 = vmatprep.mubr.msk.f32.mxu0 %vm333_vm1, %v3414_v8  ;;  %v12453_v8 = vpop.f32.mrb[13].mxu1 }
 0x22b   : > { %9978 = vmatmul.mubr.msk.f32.gmra.mrb[34].mxu0 %vm333_vm1, %v3415_v9  ;;  %v12455_v9 = vpop.f32.mrb[14].mxu1 }
 0x22c   : > { %9982 = vmatprep.mubr.msk.f32.mxu0 %vm333_vm1, %v3810_v10  ;;  %v12457_v10 = vpop.f32.mrb[15].mxu1 }
 0x22f   : > { %9983 = vmatmul.mubr.msk.f32.vlgmr.msra.gmra.mrb[0].mxu0 %vm333_vm1, %v3811_v11  ;;  %v12459_v11 = vpop.f32.mrb[16].mxu1 }
 0x230   : > { %9985 = vmatprep.mubr.msk.f32.mxu0 %vm333_vm1, %v3812_v12  ;;  %v12461_v12 = vpop.f32.mrb[17].mxu1 }
 0x233   : > { %9986 = vmatmul.mubr.msk.f32.gmra.mrb[2].mxu0 %vm333_vm1, %v3813_v13  ;;  %v12463_v13 = vpop.f32.mrb[18].mxu1 }
 0x234   : > { %9988 = vmatprep.mubr.msk.f32.mxu0 %vm333_vm1, %v3814_v14  ;;  %v12465_v14 = vpop.f32.mrb[19].mxu1 }
 0x237   : > { %9989 = vmatmul.mubr.msk.f32.gmra.mrb[4].mxu0 %vm333_vm1, %v3815_v15 }
 0x238   : > { %9991 = vmatprep.mubr.msk.f32.mxu0 %vm333_vm1, %v3816_v16 }
 0x23b   : > { %9992 = vmatmul.mubr.msk.f32.gmra.mrb[6].mxu0 %vm333_vm1, %v3817_v17 }
 0x23c   : > { %9994 = vmatprep.mubr.msk.f32.mxu0 %vm333_vm1, %v3818_v18 }
 0x23f   : > { %9995 = vmatmul.mubr.msk.f32.gmra.mrb[8].mxu0 %vm333_vm1, %v3819_v19  ;;  %v4476_v19 = vld [vmem:[%s13501_s3] sm:$0xff] }
 0x240   : > { %9997 = vmatprep.mubr.msk.f32.mxu0 %vm333_vm1, %v3820_v20  ;;  %v4477_v20 = vld [vmem:[%s13501_s3 + $0x8] sm:$0xff] }
 0x243   : > { %9998 = vmatmul.mubr.msk.f32.gmra.mrb[10].mxu0 %vm333_vm1, %v3821_v21  ;;  %v12481_v21 = vpack.c.bf16 %v4477_v20, %v4476_v19 }
 0x244   : > { %10000 = vmatprep.mubr.msk.f32.mxu0 %vm333_vm1, %v3822_v22  ;;  %v12487_v22 = vld [vmem:[%s13500_s2] ss:$0 sm:$0xff] }
 0x245   : > { %10776 = vmatprep.subr.bf16.mxu1 %v12481_v21 }
 0x247   : > { %10001 = vmatmul.mubr.msk.f32.gmra.mrb[12].mxu0 %vm333_vm1, %v3823_v23 }
 0x248   : > { %10003 = vmatprep.mubr.msk.f32.mxu0 %vm333_vm1, %v3824_v24 }
 0x24b   : > { %10004 = vmatmul.mubr.msk.f32.gmra.mrb[14].mxu0 %vm333_vm1, %v3825_v25 }
 0x24c   : > { %10006 = vmatprep.mubr.msk.f32.mxu0 %vm333_vm1, %v3826_v26 }
 0x24f   : > { %10007 = vmatmul.mubr.msk.f32.gmra.mrb[16].mxu0 %vm333_vm1, %v3827_v27 }
 0x250   : > { %10009 = vmatprep.mubr.msk.f32.mxu0 %vm333_vm1, %v3828_v28 }
 0x253   : > { %10010 = vmatmul.mubr.msk.f32.gmra.mrb[18].mxu0 %vm333_vm1, %v3829_v29 }
 0x254   : > { %10012 = vmatprep.mubr.msk.f32.mxu0 %vm333_vm1, %v3830_v30 }
 0x257   : > { %10013 = vmatmul.mubr.msk.f32.gmra.mrb[20].mxu0 %vm333_vm1, %v3831_v31 }
 0x258   : > { %10015 = vmatprep.mubr.msk.f32.mxu0 %vm333_vm1, %v3832_v32 }
 0x25b   : > { %10016 = vmatmul.mubr.msk.f32.gmra.mrb[22].mxu0 %vm333_vm1, %v3833_v33 }
 0x25c   : > { %10018 = vmatprep.mubr.msk.f32.mxu0 %vm333_vm1, %v3834_v34 }
 0x25f   : > { %10019 = vmatmul.mubr.msk.f32.gmra.mrb[24].mxu0 %vm333_vm1, %v3835_v35 }
 0x260   : > { %10021 = vmatprep.mubr.msk.f32.mxu0 %vm333_vm1, %v3836_v36 }
 0x263   : > { %10022 = vmatmul.mubr.msk.f32.gmra.mrb[26].mxu0 %vm333_vm1, %v3837_v37 }
 0x264   : > { %10024 = vmatprep.mubr.msk.f32.mxu0 %vm333_vm1, %v3838_v38 }
 0x267   : > { %10025 = vmatmul.mubr.msk.f32.gmra.mrb[28].mxu0 %vm333_vm1, %v3839_v39 }
 0x268   : > { %10027 = vmatprep.mubr.msk.f32.mxu0 %vm333_vm1, %v3840_v40 }
 0x26b   : > { %10028 = vmatmul.mubr.msk.f32.gmra.mrb[30].mxu0 %vm333_vm1, %v3841_v41 }
 0x26c   : > { %10030 = vmatprep.mubr.msk.f32.mxu0 %vm333_vm1, %v3842_v42 }
 0x26f   : > { %10031 = vmatmul.mubr.msk.f32.gmra.mrb[32].mxu0 %vm333_vm1, %v3843_v43 }
 0x270   : > { %10033 = vmatprep.mubr.msk.f32.mxu0 %vm333_vm1, %v3844_v44 }
 0x273   : > { %10034 = vmatmul.mubr.msk.f32.gmra.mrb[34].mxu0 %vm333_vm1, %v3845_v45 }
 0x274   : > { %v12467_v15 = vpop.f32.mrb[20].mxu1 }
 0x275   : > { %v12469_v16 = vpop.f32.mrb[21].mxu1 }
 0x27b   : > { %v12471_v17 = vpop.f32.mrb[22].mxu1 }
 0x27c   : > { %v12473_v18 = vpop.f32.mrb[23].mxu1 }
 0x302   : > { %v9984_v23 = vpop.f32.mrb[0].mxu0 }
 0x303   : > { %v4248_v24 = vadd.f32 %v9984_v23, %v12487_v22  ;;  %v4025_v25 = vpop.f32.mrb[1].mxu0 }
 0x304   : > { %v4247_v26 = vadd.f32 %v12487_v22, %v4025_v25 }
 0x305   : > { %v4284_v27 = vmax.f32 %v4248_v24, 0.0 }
 0x306   : > { %v4283_v28 = vmax.f32 %v4247_v26, 0.0  ;;  %v9987_v29 = vpop.f32.mrb[2].mxu0 }
 0x307   : > { %4321 = vst.msk [vmem:[#allocation3 + $0x8] sm:$0xff] %vm4319_vm2, %v4284_v27  ;;  %v4250_v30 = vadd.f32 %v9987_v29, %v12487_v22  ;;  %v4035_v31 = vpop.f32.mrb[3].mxu0 }
 0x308   : > { %4320 = vst.msk [vmem:[#allocation3] sm:$0xff] %vm4319_vm2, %v4283_v28  ;;  %v4249_v32 = vadd.f32 %v12487_v22, %v4035_v31 }
 0x309   : > { %v4286_v33 = vmax.f32 %v4250_v30, 0.0 }
 0x30a   : > { %v4285_v34 = vmax.f32 %v4249_v32, 0.0  ;;  %v9990_v35 = vpop.f32.mrb[4].mxu0 }
 0x30b   : > { %4323 = vst.msk [vmem:[#allocation3 + $0x18] sm:$0xff] %vm4319_vm2, %v4286_v33  ;;  %v4252_v36 = vadd.f32 %v9990_v35, %v12487_v22  ;;  %v4045_v37 = vpop.f32.mrb[5].mxu0 }
 0x30c   : > { %4322 = vst.msk [vmem:[#allocation3 + $0x10] sm:$0xff] %vm4319_vm2, %v4285_v34  ;;  %v4251_v38 = vadd.f32 %v12487_v22, %v4045_v37 }
 0x30d   : > { %v4288_v39 = vmax.f32 %v4252_v36, 0.0 }
 0x30e   : > { %v4287_v40 = vmax.f32 %v4251_v38, 0.0  ;;  %v9993_v41 = vpop.f32.mrb[6].mxu0 }
 0x30f   : > { %4325 = vst.msk [vmem:[#allocation3 + $0x28] sm:$0xff] %vm4319_vm2, %v4288_v39  ;;  %v4254_v42 = vadd.f32 %v9993_v41, %v12487_v22  ;;  %v4055_v43 = vpop.f32.mrb[7].mxu0  ;;  %v4371_v1 = vld [vmem:[#allocation3] ss:$2 sm:$0xff]  ;;  %v4373_v52 = vld [vmem:[#allocation3 + $0x1] ss:$2 sm:$0xff] }
 0x310   : > { %4324 = vst.msk [vmem:[#allocation3 + $0x20] sm:$0xff] %vm4319_vm2, %v4287_v40  ;;  %v4253_v44 = vadd.f32 %v12487_v22, %v4055_v43  ;;  %v4378_v20 = vmax.f32 %v4371_v1, %v4373_v52 }
 0x311   : > { %v4290_v45 = vmax.f32 %v4254_v42, 0.0 }
 0x312   : > { %v4289_v46 = vmax.f32 %v4253_v44, 0.0  ;;  %v9996_v47 = vpop.f32.mrb[8].mxu0 }
 0x313   : > { %4327 = vst.msk [vmem:[#allocation3 + $0x38] sm:$0xff] %vm4319_vm2, %v4290_v45  ;;  %v4256_v48 = vadd.f32 %v9996_v47, %v12487_v22  ;;  %v4065_v49 = vpop.f32.mrb[9].mxu0  ;;  %v4479_v45 = vld [vmem:[%s13501_s3 + $0x18] sm:$0xff] }
 0x314   : > { %4326 = vst.msk [vmem:[#allocation3 + $0x30] sm:$0xff] %vm4319_vm2, %v4289_v46  ;;  %v4255_v50 = vadd.f32 %v12487_v22, %v4065_v49 }
 0x315   : > { %v4292_v53 = vmax.f32 %v4256_v48, 0.0 }
 0x316   : > { %v4291_v55 = vmax.f32 %v4255_v50, 0.0  ;;  %v9999_v57 = vpop.f32.mrb[10].mxu0 }
 0x317   : > { %v4375_v58 = vld [vmem:[#allocation3 + $0x12] ss:$2 sm:$0xff]  ;;  %v4377_v60 = vld [vmem:[#allocation3 + $0x13] ss:$2 sm:$0xff]  ;;  %4329 = vst.msk [vmem:[#allocation3 + $0x48] sm:$0xff] %vm4319_vm2, %v4292_v53  ;;  %v4258_v63 = vadd.f32 %v9999_v57, %v12487_v22  ;;  %v4075_v19 = vpop.f32.mrb[11].mxu0 }
 0x318   : > { %v4379_v23 = vmax.f32 %v4375_v58, %v4377_v60  ;;  %4328 = vst.msk [vmem:[#allocation3 + $0x40] sm:$0xff] %vm4319_vm2, %v4291_v55  ;;  %v4257_v24 = vadd.f32 %v12487_v22, %v4075_v19  ;;  %v4480_v57 = vld [vmem:[%s13501_s3 + $0x20] sm:$0xff]  ;;  %v4481_v58 = vld [vmem:[%s13501_s3 + $0x28] sm:$0xff] }
 0x319   : > { %v4294_v25 = vmax.f32 %v4258_v63, 0.0 }
 0x31a   : > { %v4380_v26 = vmax.f32 %v4378_v20, %v4379_v23  ;;  %v4293_v27 = vmax.f32 %v4257_v24, 0.0  ;;  %v10002_v28 = vpop.f32.mrb[12].mxu0 }
 0x31b   : > { %4331 = vst.msk [vmem:[#allocation3 + $0x58] sm:$0xff] %vm4319_vm2, %v4294_v25  ;;  %v11289_v29 = vadd.f32 %v10002_v28, %v12414_v51  ;;  %v4085_v30 = vpop.f32.mrb[13].mxu0  ;;  %v4383_v32 = vld [vmem:[#allocation3 + $0x24] ss:$2 sm:$0xff]  ;;  %v4385_v33 = vld [vmem:[#allocation3 + $0x25] ss:$2 sm:$0xff]  ;;  %v10783_v25 = vpack.c.bf16 %v4481_v58, %v4480_v57 }
 0x31c   : > { %4381 = vst.msk [vmem:[#allocation4 + $0xb] sm:$0xff] %vm4319_vm2, %v4380_v26  ;;  %4330 = vst.msk [vmem:[#allocation3 + $0x50] sm:$0xff] %vm4319_vm2, %v4293_v27  ;;  %v11290_v31 = vadd.f32 %v4085_v30, %v12422_v54  ;;  %v4390_v41 = vmax.f32 %v4383_v32, %v4385_v33  ;;  %v4478_v54 = vld [vmem:[%s13501_s3 + $0x10] sm:$0xff] }
 0x31d   : > { %v4260_v34 = vadd.f32 %v11289_v29, %v12487_v22  ;;  %v10779_v1 = vpack.c.bf16 %v4479_v45, %v4478_v54  ;;  %v4482_v28 = vld [vmem:[%s13501_s3 + $0x30] sm:$0xff]  ;;  %v4483_v29 = vld [vmem:[%s13501_s3 + $0x38] sm:$0xff] }
 0x31e   : > { %v4259_v35 = vadd.f32 %v11290_v31, %v12487_v22  ;;  %v10005_v36 = vpop.f32.mrb[14].mxu0 }
 0x31f   : > { %v4387_v37 = vld [vmem:[#allocation3 + $0x36] ss:$2 sm:$0xff]  ;;  %v4389_v38 = vld [vmem:[#allocation3 + $0x37] ss:$2 sm:$0xff]  ;;  %v4296_v39 = vmax.f32 %v4260_v34, 0.0  ;;  %v11291_v40 = vadd.f32 %v10005_v36, %v12424_v56  ;;  %v4095_v51 = vpop.f32.mrb[15].mxu0 }
 0x320   : > { %v4391_v42 = vmax.f32 %v4387_v37, %v4389_v38  ;;  %v4295_v43 = vmax.f32 %v4259_v35, 0.0  ;;  %v11292_v44 = vadd.f32 %v4095_v51, %v12432_v59  ;;  %v10787_v38 = vpack.c.bf16 %v4483_v29, %v4482_v28 }
 0x321   : > { %4333 = vst.msk [vmem:[#allocation3 + $0x68] sm:$0xff] %vm4319_vm2, %v4296_v39  ;;  %v4262_v46 = vadd.f32 %v11291_v40, %v12487_v22 }
 0x322   : > { %v4392_v47 = vmax.f32 %v4390_v41, %v4391_v42  ;;  %4332 = vst.msk [vmem:[#allocation3 + $0x60] sm:$0xff] %vm4319_vm2, %v4295_v43  ;;  %v4261_v56 = vadd.f32 %v11292_v44, %v12487_v22  ;;  %v10008_v48 = vpop.f32.mrb[16].mxu0  ;;  %v8448_v41 = vld [vmem:[%s13501_s3 + $0x80] sm:$0xff]  ;;  %v8449_v42 = vld [vmem:[%s13501_s3 + $0x88] sm:$0xff] }
 0x323   : > { %v4298_v49 = vmax.f32 %v4262_v46, 0.0  ;;  %v11293_v59 = vadd.f32 %v10008_v48, %v12434_v61  ;;  %v4105_v50 = vpop.f32.mrb[17].mxu0  ;;  %v4485_v55 = vld [vmem:[#allocation4 + $0x9] sm:$0xff] }
 0x324   : > { %4393 = vst.msk [vmem:[#allocation4 + $0x15] sm:$0xff] %vm4319_vm2, %v4392_v47  ;;  %v4297_v52 = vmax.f32 %v4261_v56, 0.0  ;;  %v11294_v53 = vadd.f32 %v4105_v50, %v12436_v62  ;;  %10053 = vmatmul.mubr.msk.f32.vlgmr.msra.gmra.mrb[24].mxu1 %vm4319_vm2, %v4485_v55  ;;  %v4395_v63 = vld [vmem:[#allocation3 + $0x48] ss:$2 sm:$0xff]  ;;  %v4397_v19 = vld [vmem:[#allocation3 + $0x49] ss:$2 sm:$0xff]  ;;  %v12572_v56 = vpack.c.bf16 %v8449_v42, %v8448_v41 }
 0x325   : > { %4335 = vst.msk [vmem:[#allocation3 + $0x78] sm:$0xff] %vm4319_vm2, %v4298_v49  ;;  %v4264_v61 = vadd.f32 %v11293_v59, %v12487_v22  ;;  %10778 = vmatpush3.bf16.msra.mxu1 %v12481_v21  ;;  %v4402_v31 = vmax.f32 %v4395_v63, %v4397_v19 }
 0x326   : > { %4334 = vst.msk [vmem:[#allocation3 + $0x70] sm:$0xff] %vm4319_vm2, %v4297_v52  ;;  %v4263_v60 = vadd.f32 %v11294_v53, %v12487_v22  ;;  %v10011_v62 = vpop.f32.mrb[18].mxu0  ;;  %10780 = vmatprep.subr.bf16.mxu1 %v10779_v1 }
 0x327   : > { %v4300_v20 = vmax.f32 %v4264_v61, 0.0  ;;  %v11295_v23 = vadd.f32 %v10011_v62, %v12439_v0  ;;  %v4115_v24 = vpop.f32.mrb[19].mxu0 }
 0x328   : > { %v4299_v26 = vmax.f32 %v4263_v60, 0.0  ;;  %v11296_v27 = vadd.f32 %v4115_v24, %v12441_v2 }
 0x329   : > { %v4399_v21 = vld [vmem:[#allocation3 + $0x5a] ss:$2 sm:$0xff]  ;;  %v4401_v30 = vld [vmem:[#allocation3 + $0x5b] ss:$2 sm:$0xff]  ;;  %4337 = vst.msk [vmem:[#allocation3 + $0x88] sm:$0xff] %vm4319_vm2, %v4300_v20  ;;  %v4266_v0 = vadd.f32 %v11295_v23, %v12487_v22  ;;  %10782 = vmatpush3.bf16.msra.mxu1 %v10779_v1 }
 0x32a   : > { %v4403_v32 = vmax.f32 %v4399_v21, %v4401_v30  ;;  %4336 = vst.msk [vmem:[#allocation3 + $0x80] sm:$0xff] %vm4319_vm2, %v4299_v26  ;;  %v4265_v2 = vadd.f32 %v11296_v27, %v12487_v22  ;;  %v10014_v33 = vpop.f32.mrb[20].mxu0  ;;  %10784 = vmatprep.subr.bf16.mxu1 %v10783_v25 }
 0x32b   : > { %v4302_v34 = vmax.f32 %v4266_v0, 0.0  ;;  %v11297_v35 = vadd.f32 %v10014_v33, %v12443_v3  ;;  %v4125_v36 = vpop.f32.mrb[21].mxu0  ;;  %v4486_v37 = vld [vmem:[#allocation4 + $0x11] sm:$0xff] }
 0x32c   : > { %v4404_v39 = vmax.f32 %v4402_v31, %v4403_v32  ;;  %v4301_v40 = vmax.f32 %v4265_v2, 0.0  ;;  %v11298_v51 = vadd.f32 %v4125_v36, %v12445_v4  ;;  %10055 = vmatprep.mubr.msk.f32.mxu1 %vm4319_vm2, %v4486_v37 }
 0x32d   : > { %4339 = vst.msk [vmem:[#allocation3 + $0x98] sm:$0xff] %vm4319_vm2, %v4302_v34  ;;  %v4268_v3 = vadd.f32 %v11297_v35, %v12487_v22  ;;  %10786 = vmatpush3.bf16.msra.mxu1 %v10783_v25  ;;  %v4407_v44 = vld [vmem:[#allocation3 + $0x6c] ss:$2 sm:$0xff]  ;;  %v4409_v54 = vld [vmem:[#allocation3 + $0x6d] ss:$2 sm:$0xff] }
 0x32e   : > { %4405 = vst.msk [vmem:[#allocation4 + $0x1f] sm:$0xff] %vm4319_vm2, %v4404_v39  ;;  %4338 = vst.msk [vmem:[#allocation3 + $0x90] sm:$0xff] %vm4319_vm2, %v4301_v40  ;;  %v4267_v4 = vadd.f32 %v11298_v51, %v12487_v22  ;;  %v10017_v43 = vpop.f32.mrb[22].mxu0  ;;  %10788 = vmatprep.subr.bf16.mxu1 %v10787_v38  ;;  %v4414_v52 = vmax.f32 %v4407_v44, %v4409_v54 }
 0x32f   : > { %v4304_v45 = vmax.f32 %v4268_v3, 0.0  ;;  %v11299_v46 = vadd.f32 %v10017_v43, %v12447_v5  ;;  %v4135_v47 = vpop.f32.mrb[23].mxu0 }
 0x330   : > { %v4303_v48 = vmax.f32 %v4267_v4, 0.0  ;;  %v11300_v49 = vadd.f32 %v4135_v47, %v12449_v6 }
 0x331   : > { %v4411_v59 = vld [vmem:[#allocation3 + $0x7e] ss:$2 sm:$0xff]  ;;  %v4413_v50 = vld [vmem:[#allocation3 + $0x7f] ss:$2 sm:$0xff]  ;;  %4341 = vst.msk [vmem:[#allocation3 + $0xa8] sm:$0xff] %vm4319_vm2, %v4304_v45  ;;  %v4270_v1 = vadd.f32 %v11299_v46, %v12487_v22  ;;  %10790 = vmatpush3.bf16.msra.mxu1 %v10787_v38 }
 0x332   : > { %v4415_v53 = vmax.f32 %v4411_v59, %v4413_v50  ;;  %4340 = vst.msk [vmem:[#allocation3 + $0xa0] sm:$0xff] %vm4319_vm2, %v4303_v48  ;;  %v4269_v55 = vadd.f32 %v11300_v49, %v12487_v22  ;;  %v10020_v5 = vpop.f32.mrb[24].mxu0  ;;  %10792 = vmatprep.subr.bf16.mxu1 %v12572_v56 }
 0x333   : > { %v4306_v57 = vmax.f32 %v4270_v1, 0.0  ;;  %v11301_v58 = vadd.f32 %v10020_v5, %v12451_v7  ;;  %v4145_v61 = vpop.f32.mrb[25].mxu0 }
 0x334   : > { %v4416_v6 = vmax.f32 %v4414_v52, %v4415_v53  ;;  %v4305_v60 = vmax.f32 %v4269_v55, 0.0  ;;  %v11302_v62 = vadd.f32 %v4145_v61, %v12453_v8 }
 0x335   : > { %4343 = vst.msk [vmem:[#allocation3 + $0xb8] sm:$0xff] %vm4319_vm2, %v4306_v57  ;;  %v4272_v63 = vadd.f32 %v11301_v58, %v12487_v22  ;;  %v4487_v19 = vld [vmem:[#allocation4 + $0x19] sm:$0xff]  ;;  %v4488_v7 = vld [vmem:[#allocation4 + $0x21] sm:$0xff] }
 0x336   : > { %4417 = vst.msk [vmem:[#allocation4 + $0x29] sm:$0xff] %vm4319_vm2, %v4416_v6  ;;  %4342 = vst.msk [vmem:[#allocation3 + $0xb0] sm:$0xff] %vm4319_vm2, %v4305_v60  ;;  %v4271_v20 = vadd.f32 %v11302_v62, %v12487_v22  ;;  %v10023_v23 = vpop.f32.mrb[26].mxu0  ;;  %10056 = vmatmul.mubr.msk.f32.gmra.mrb[26].mxu1 %vm4319_vm2, %v4487_v19  ;;  %v4419_v30 = vld [vmem:[#allocation3 + $0x90] ss:$2 sm:$0xff] }
 0x337   : > { %v4308_v24 = vmax.f32 %v4272_v63, 0.0  ;;  %v11303_v25 = vadd.f32 %v10023_v23, %v12455_v9  ;;  %v4155_v26 = vpop.f32.mrb[27].mxu0  ;;  %10058 = vmatprep.mubr.msk.f32.mxu1 %vm4319_vm2, %v4488_v7  ;;  %v4421_v0 = vld [vmem:[#allocation3 + $0x91] ss:$2 sm:$0xff] }
 0x338   : > { %v4307_v8 = vmax.f32 %v4271_v20, 0.0  ;;  %v11304_v27 = vadd.f32 %v4155_v26, %v12457_v10  ;;  %v4426_v37 = vmax.f32 %v4419_v30, %v4421_v0 }
 0x339   : > { %4345 = vst.msk [vmem:[#allocation3 + $0xc8] sm:$0xff] %vm4319_vm2, %v4308_v24  ;;  %v4274_v28 = vadd.f32 %v11303_v25, %v12487_v22 }
 0x33a   : > { %4344 = vst.msk [vmem:[#allocation3 + $0xc0] sm:$0xff] %vm4319_vm2, %v4307_v8  ;;  %v4273_v29 = vadd.f32 %v11304_v27, %v12487_v22  ;;  %v10026_v21 = vpop.f32.mrb[28].mxu0 }
 0x33b   : > { %v4310_v31 = vmax.f32 %v4274_v28, 0.0  ;;  %v11305_v9 = vadd.f32 %v10026_v21, %v12459_v11  ;;  %v4165_v32 = vpop.f32.mrb[29].mxu0 }
 0x33c   : > { %v4309_v2 = vmax.f32 %v4273_v29, 0.0  ;;  %v11306_v33 = vadd.f32 %v4165_v32, %v12461_v12  ;;  %v8450_v32 = vld [vmem:[%s13501_s3 + $0x90] sm:$0xff] }
 0x33d   : > { %v4423_v34 = vld [vmem:[#allocation3 + $0xa2] ss:$2 sm:$0xff]  ;;  %v4425_v10 = vld [vmem:[#allocation3 + $0xa3] ss:$2 sm:$0xff]  ;;  %4347 = vst.msk [vmem:[#allocation3 + $0xd8] sm:$0xff] %vm4319_vm2, %v4310_v31  ;;  %v4276_v35 = vadd.f32 %v11305_v9, %v12487_v22 }
 0x33e   : > { %v4489_v36 = vld [vmem:[#allocation4 + $0x29] sm:$0xff]  ;;  %v4427_v38 = vmax.f32 %v4423_v34, %v4425_v10  ;;  %4346 = vst.msk [vmem:[#allocation3 + $0xd0] sm:$0xff] %vm4319_vm2, %v4309_v2  ;;  %v4275_v39 = vadd.f32 %v11306_v33, %v12487_v22  ;;  %v10029_v40 = vpop.f32.mrb[30].mxu0  ;;  %v4466_v9 = vld [vmem:[#allocation4] sm:$0xff] }
 0x33f   : > { %10059 = vmatmul.mubr.msk.f32.gmra.mrb[28].mxu1 %vm4319_vm2, %v4489_v36  ;;  %v4312_v11 = vmax.f32 %v4276_v35, 0.0  ;;  %v11307_v51 = vadd.f32 %v10029_v40, %v12463_v13  ;;  %v4175_v12 = vpop.f32.mrb[31].mxu0  ;;  %v8451_v2 = vld [vmem:[%s13501_s3 + $0x98] sm:$0xff]  ;;  %v4467_v34 = vld [vmem:[#allocation4 + $0x8] sm:$0xff]  ;;  %v8453_v35 = vld [vmem:[%s13501_s3 + $0xa8] sm:$0xff] }
 0x340   : > { %v4428_v41 = vmax.f32 %v4426_v37, %v4427_v38  ;;  %v4311_v42 = vmax.f32 %v4275_v39, 0.0  ;;  %v11308_v3 = vadd.f32 %v4175_v12, %v12465_v14  ;;  %v10795_v33 = vpack.c.bf16 %v8451_v2, %v8450_v32  ;;  %v8452_v10 = vld [vmem:[%s13501_s3 + $0xa0] sm:$0xff]  ;;  %v4468_v36 = vld [vmem:[#allocation4 + $0x10] sm:$0xff]  ;;  %v4469_v38 = vld [vmem:[#allocation4 + $0x18] sm:$0xff] }
 0x341   : > { %4349 = vst.msk [vmem:[#allocation3 + $0xe8] sm:$0xff] %vm4319_vm2, %v4312_v11  ;;  %v4278_v4 = vadd.f32 %v11307_v51, %v12487_v22  ;;  %v4431_v54 = vld [vmem:[#allocation3 + $0xb4] ss:$2 sm:$0xff]  ;;  %v4433_v45 = vld [vmem:[#allocation3 + $0xb5] ss:$2 sm:$0xff]  ;;  %v10799_v37 = vpack.c.bf16 %v8453_v35, %v8452_v10  ;;  %v4471_v51 = vld [vmem:[#allocation4 + $0x28] sm:$0xff] }
 0x342   : > { %4429 = vst.msk [vmem:[#allocation4 + $0x33] sm:$0xff] %vm4319_vm2, %v4428_v41  ;;  %4348 = vst.msk [vmem:[#allocation3 + $0xe0] sm:$0xff] %vm4319_vm2, %v4311_v42  ;;  %v4277_v43 = vadd.f32 %v11308_v3, %v12487_v22  ;;  %v10032_v44 = vpop.f32.mrb[32].mxu0  ;;  %v4438_v1 = vmax.f32 %v4431_v54, %v4433_v45  ;;  %v8454_v39 = vld [vmem:[%s13501_s3 + $0xb0] sm:$0xff]  ;;  %v8455_v40 = vld [vmem:[%s13501_s3 + $0xb8] sm:$0xff] }
 0x343   : > { %v4314_v46 = vmax.f32 %v4278_v4, 0.0  ;;  %v11309_v13 = vadd.f32 %v10032_v44, %v12467_v15  ;;  %v4185_v47 = vpop.f32.mrb[33].mxu0  ;;  %v4470_v11 = vld [vmem:[#allocation4 + $0x20] sm:$0xff]  ;;  %v8466_v12 = vld [vmem:[%s13501_s3 + $0xc0] sm:$0xff]  ;;  %v8467_v41 = vld [vmem:[%s13501_s3 + $0xc8] sm:$0xff] }
 0x344   : > { %v4313_v48 = vmax.f32 %v4277_v43, 0.0  ;;  %v11310_v14 = vadd.f32 %v4185_v47, %v12469_v16  ;;  %v10807_v3 = vpack.c.bf16 %v8467_v41, %v8466_v12  ;;  %v4793_v44 = vld [vmem:[#allocation4 + $0x2] sm:$0xff]  ;;  %v8468_v45 = vld [vmem:[%s13501_s3 + $0xd0] sm:$0xff]  ;;  %v4794_v47 = vld [vmem:[#allocation4 + $0xa] sm:$0xff] }
 0x345   : > { %v4435_v49 = vld [vmem:[#allocation3 + $0xc6] ss:$2 sm:$0xff]  ;;  %v4437_v59 = vld [vmem:[#allocation3 + $0xc7] ss:$2 sm:$0xff]  ;;  %4351 = vst.msk [vmem:[#allocation3 + $0xf8] sm:$0xff] %vm4319_vm2, %v4314_v46  ;;  %v4280_v50 = vadd.f32 %v11309_v13, %v12487_v22  ;;  %v8522_v12 = vld [vmem:[%s13501_s3 + $0x190] sm:$0xff] }
 0x346   : > { %v4439_v52 = vmax.f32 %v4435_v49, %v4437_v59  ;;  %4350 = vst.msk [vmem:[#allocation3 + $0xf0] sm:$0xff] %vm4319_vm2, %v4313_v48  ;;  %v4279_v53 = vadd.f32 %v11310_v14, %v12487_v22  ;;  %v10035_v55 = vpop.f32.mrb[34].mxu0  ;;  %v8469_v46 = vld [vmem:[%s13501_s3 + $0xd8] sm:$0xff]  ;;  %v8470_v48 = vld [vmem:[%s13501_s3 + $0xe0] sm:$0xff]  ;;  %v8471_v14 = vld [vmem:[%s13501_s3 + $0xe8] sm:$0xff] }
 0x347   : > { %v4316_v5 = vmax.f32 %v4280_v50, 0.0  ;;  %v11311_v15 = vadd.f32 %v10035_v55, %v12471_v17  ;;  %v4195_v57 = vpop.f32.mrb[35].mxu0  ;;  %v10811_v13 = vpack.c.bf16 %v8469_v46, %v8468_v45  ;;  %v4795_v49 = vld [vmem:[#allocation4 + $0x12] sm:$0xff]  ;;  %v10815_v59 = vpack.c.bf16 %v8471_v14, %v8470_v48  ;;  %v4796_v50 = vld [vmem:[#allocation4 + $0x1a] sm:$0xff]  ;;  %v5144_v2 = vld [vmem:[#allocation4 + $0x23] sm:$0xff] }
 0x348   : > { %v4440_v58 = vmax.f32 %v4438_v1, %v4439_v52  ;;  %v4315_v61 = vmax.f32 %v4279_v53, 0.0  ;;  %v11312_v16 = vadd.f32 %v4195_v57, %v12473_v18  ;;  %v8472_v1 = vld [vmem:[%s13501_s3 + $0xf0] sm:$0xff]  ;;  %v8473_v52 = vld [vmem:[%s13501_s3 + $0xf8] sm:$0xff]  ;;  %v8485_v57 = vld [vmem:[%s13501_s3 + $0x108] sm:$0xff] }
 0x349   : > { %4353 = vst.msk [vmem:[#allocation3 + $0x108] sm:$0xff] %vm4319_vm2, %v4316_v5  ;;  %v4282_v6 = vadd.f32 %v11311_v15, %v12487_v22  ;;  %v4490_v60 = vld [vmem:[#allocation4 + $0x31] sm:$0xff]  ;;  %v4445_v17 = vld [vmem:[#allocation3 + $0xd9] ss:$2 sm:$0xff]  ;;  %v10819_v55 = vpack.c.bf16 %v8473_v52, %v8472_v1  ;;  %v8484_v15 = vld [vmem:[%s13501_s3 + $0x100] sm:$0xff] }
 0x34a   : > { %4441 = vst.msk [vmem:[#allocation4 + $0x3d] sm:$0xff] %vm4319_vm2, %v4440_v58  ;;  %4352 = vst.msk [vmem:[#allocation3 + $0x100] sm:$0xff] %vm4319_vm2, %v4315_v61  ;;  %v4281_v62 = vadd.f32 %v11312_v16, %v12487_v22  ;;  %10061 = vmatprep.mubr.msk.f32.mxu1 %vm4319_vm2, %v4490_v60  ;;  %v4443_v63 = vld [vmem:[#allocation3 + $0xd8] ss:$2 sm:$0xff]  ;;  %v4472_v42 = vld [vmem:[#allocation4 + $0x30] sm:$0xff]  ;;  %v10823_v61 = vpack.c.bf16 %v8485_v57, %v8484_v15 }
 0x34b   : > { %v4318_v19 = vmax.f32 %v4282_v6, 0.0  ;;  %v4450_v18 = vmax.f32 %v4443_v63, %v4445_v17  ;;  %v4797_v53 = vld [vmem:[#allocation4 + $0x22] sm:$0xff]  ;;  %v4798_v5 = vld [vmem:[#allocation4 + $0x2a] sm:$0xff]  ;;  %v4799_v58 = vld [vmem:[#allocation4 + $0x32] sm:$0xff] }
 0x34c   : > { %v4317_v20 = vmax.f32 %v4281_v62, 0.0  ;;  %v8486_v62 = vld [vmem:[%s13501_s3 + $0x110] sm:$0xff]  ;;  %v8487_v63 = vld [vmem:[%s13501_s3 + $0x118] sm:$0xff]  ;;  %v5145_v10 = vld [vmem:[#allocation4 + $0x2b] sm:$0xff] }
 0x34d   : > { %v4447_v23 = vld [vmem:[#allocation3 + $0xea] ss:$2 sm:$0xff]  ;;  %v4449_v7 = vld [vmem:[#allocation3 + $0xeb] ss:$2 sm:$0xff]  ;;  %4355 = vst.msk [vmem:[#allocation3 + $0x118] sm:$0xff] %vm4319_vm2, %v4318_v19  ;;  %v10827_v17 = vpack.c.bf16 %v8487_v63, %v8486_v62  ;;  %v8523_v41 = vld [vmem:[%s13501_s3 + $0x198] sm:$0xff] }
 0x34e   : > { %v4451_v24 = vmax.f32 %v4447_v23, %v4449_v7  ;;  %4354 = vst.msk [vmem:[#allocation3 + $0x110] sm:$0xff] %vm4319_vm2, %v4317_v20  ;;  %v8488_v19 = vld [vmem:[%s13501_s3 + $0x120] sm:$0xff]  ;;  %v8489_v20 = vld [vmem:[%s13501_s3 + $0x128] sm:$0xff]  ;;  %v8490_v7 = vld [vmem:[%s13501_s3 + $0x130] sm:$0xff] }
 0x34f   : > { %v10831_v23 = vpack.c.bf16 %v8489_v20, %v8488_v19  ;;  %v5318_v46 = vld [vmem:[#allocation4 + $0x24] sm:$0xff]  ;;  %v5319_v48 = vld [vmem:[#allocation4 + $0x2c] sm:$0xff]  ;;  %v8540_v15 = vld [vmem:[%s13501_s3 + $0x1d0] sm:$0xff] }
 0x350   : > { %v4452_v25 = vmax.f32 %v4450_v18, %v4451_v24  ;;  %v8491_v18 = vld [vmem:[%s13501_s3 + $0x138] sm:$0xff]  ;;  %v8557_v19 = vld [vmem:[%s13501_s3 + $0x208] sm:$0xff] }
 0x351   : > { %v4491_v26 = vld [vmem:[#allocation4 + $0x39] sm:$0xff]  ;;  %v10835_v24 = vpack.c.bf16 %v8491_v18, %v8490_v7 }
 0x352   : > { %4453 = vst.msk [vmem:[#allocation4 + $0x47] sm:$0xff] %vm4319_vm2, %v4452_v25  ;;  %10062 = vmatmul.mubr.msk.f32.gmra.mrb[30].mxu1 %vm4319_vm2, %v4491_v26  ;;  %v4455_v22 = vld [vmem:[#allocation3 + $0xfc] ss:$2 sm:$0xff]  ;;  %v4457_v8 = vld [vmem:[#allocation3 + $0xfd] ss:$2 sm:$0xff]  ;;  %v8503_v26 = vld [vmem:[%s13501_s3 + $0x148] sm:$0xff] }
 0x353   : > { %v4462_v29 = vmax.f32 %v4455_v22, %v4457_v8  ;;  %v4473_v4 = vld [vmem:[#allocation4 + $0x38] sm:$0xff]  ;;  %v8502_v25 = vld [vmem:[%s13501_s3 + $0x140] sm:$0xff]  ;;  %v8541_v57 = vld [vmem:[%s13501_s3 + $0x1d8] sm:$0xff] }
 0x354   : > { %v4800_v16 = vld [vmem:[#allocation4 + $0x3a] sm:$0xff]  ;;  %v10839_v22 = vpack.c.bf16 %v8503_v26, %v8502_v25 }
 0x355   : > { %v4459_v27 = vld [vmem:[#allocation3 + $0x10e] ss:$2 sm:$0xff]  ;;  %v4461_v28 = vld [vmem:[#allocation3 + $0x10f] ss:$2 sm:$0xff]  ;;  %v8545_v62 = vld [vmem:[%s13501_s3 + $0x1f8] sm:$0xff] }
 0x356   : > { %v4463_v21 = vmax.f32 %v4459_v27, %v4461_v28  ;;  %v8504_v27 = vld [vmem:[%s13501_s3 + $0x150] sm:$0xff]  ;;  %v8505_v28 = vld [vmem:[%s13501_s3 + $0x158] sm:$0xff] }
 0x357   : > { %v5321_v1 = vld [vmem:[#allocation4 + $0x3c] sm:$0xff] }
 0x358   : > { %v4464_v30 = vmax.f32 %v4462_v29, %v4463_v21  ;;  %v5141_v29 = vld [vmem:[#allocation4 + $0xb] sm:$0xff]  ;;  %v10843_v21 = vpack.c.bf16 %v8505_v28, %v8504_v27  ;;  %v8558_v7 = vld [vmem:[%s13501_s3 + $0x210] sm:$0xff]  ;;  %v8559_v18 = vld [vmem:[%s13501_s3 + $0x218] sm:$0xff] }
 0x359   : > { %v4492_v0 = vld [vmem:[#allocation4 + $0x41] sm:$0xff]  ;;  %v4493_v31 = vld [vmem:[#allocation4 + $0x49] sm:$0xff]  ;;  %v10891_v25 = vpack.c.bf16 %v8559_v18, %v8558_v7 }
 0x35a   : > { %4465 = vst.msk [vmem:[#allocation4 + $0x51] sm:$0xff] %vm4319_vm2, %v4464_v30  ;;  %10064 = vmatprep.mubr.msk.f32.mxu1 %vm4319_vm2, %v4492_v0  ;;  %v4474_v43 = vld [vmem:[#allocation4 + $0x40] sm:$0xff]  ;;  %v4475_v54 = vld [vmem:[#allocation4 + $0x48] sm:$0xff]  ;;  %v5142_v30 = vld [vmem:[#allocation4 + $0x13] sm:$0xff] }
 0x35b   : > { %10065 = vmatmul.mubr.msk.f32.gmra.mrb[32].mxu1 %vm4319_vm2, %v4493_v31  ;;  %v4801_v6 = vld [vmem:[#allocation4 + $0x42] sm:$0xff]  ;;  %v8507_v31 = vld [vmem:[%s13501_s3 + $0x168] sm:$0xff] }
 0x35c   : > { %10083 = vmatprep.mubr.msk.f32.mxu1 %vm4319_vm2, %v4466_v9  ;;  %v8506_v0 = vld [vmem:[%s13501_s3 + $0x160] sm:$0xff]  ;;  %v5143_v9 = vld [vmem:[#allocation4 + $0x1b] sm:$0xff] }
 0x35d   : > { %v10847_v32 = vpack.c.bf16 %v8507_v31, %v8506_v0  ;;  %v5664_v26 = vld [vmem:[#allocation4 + $0x1d] sm:$0xff]  ;;  %v5665_v27 = vld [vmem:[#allocation4 + $0x25] sm:$0xff]  ;;  %v5667_v0 = vld [vmem:[#allocation4 + $0x35] sm:$0xff] }
 0x35f   : > { %10084 = vmatmul.mubr.msk.f32.vlgmr.msra.gmra.mrb[24].mxu1 %vm4319_vm2, %v4467_v34  ;;  %v8509_v34 = vld [vmem:[%s13501_s3 + $0x178] sm:$0xff] }
 0x360   : > { %10794 = vmatpush3.bf16.msra.mxu1 %v12572_v56  ;;  %10086 = vmatprep.mubr.msk.f32.mxu1 %vm4319_vm2, %v4468_v36  ;;  %v10803_v56 = vpack.c.bf16 %v8455_v40, %v8454_v39  ;;  %v5146_v36 = vld [vmem:[#allocation4 + $0x33] sm:$0xff]  ;;  %v5147_v39 = vld [vmem:[#allocation4 + $0x3b] sm:$0xff] }
 0x361   : > { %10796 = vmatprep.subr.bf16.mxu1 %v10795_v33  ;;  %v4802_v60 = vld [vmem:[#allocation4 + $0x4a] sm:$0xff]  ;;  %v4976_v8 = vld [vmem:[#allocation4 + $0x52] sm:$0xff] }
 0x363   : > { %10087 = vmatmul.mubr.msk.f32.gmra.mrb[26].mxu1 %vm4319_vm2, %v4469_v38  ;;  %v8521_v38 = vld [vmem:[%s13501_s3 + $0x188] sm:$0xff] }
 0x364   : > { %10089 = vmatprep.mubr.msk.f32.mxu1 %vm4319_vm2, %v4470_v11  ;;  %10798 = vmatpush3.bf16.msra.mxu1 %v10795_v33  ;;  %v8508_v33 = vld [vmem:[%s13501_s3 + $0x170] sm:$0xff]  ;;  %v5148_v11 = vld [vmem:[#allocation4 + $0x43] sm:$0xff] }
 0x365   : > { %10800 = vmatprep.subr.bf16.mxu1 %v10799_v37  ;;  %v10851_v35 = vpack.c.bf16 %v8509_v34, %v8508_v33  ;;  %v5671_v33 = vld [vmem:[#allocation4 + $0x55] sm:$0xff]  ;;  %v5672_v34 = vld [vmem:[#allocation4 + $0x5d] sm:$0xff] }
 0x367   : > { %10090 = vmatmul.mubr.msk.f32.gmra.mrb[28].mxu1 %vm4319_vm2, %v4471_v51  ;;  %v5150_v51 = vld [vmem:[#allocation4 + $0x53] sm:$0xff] }
 0x368   : > { %10092 = vmatprep.mubr.msk.f32.mxu1 %vm4319_vm2, %v4472_v42  ;;  %10802 = vmatpush3.bf16.msra.mxu1 %v10799_v37  ;;  %v8520_v37 = vld [vmem:[%s13501_s3 + $0x180] sm:$0xff] }
 0x369   : > { %10804 = vmatprep.subr.bf16.mxu1 %v10803_v56  ;;  %v10855_v40 = vpack.c.bf16 %v8521_v38, %v8520_v37  ;;  %v5315_v42 = vld [vmem:[#allocation4 + $0xc] sm:$0xff]  ;;  %v5841_v38 = vld [vmem:[#allocation4 + $0x36] sm:$0xff] }
 0x36a   : > { %v5840_v37 = vld [vmem:[#allocation4 + $0x2e] sm:$0xff] }
 0x36b   : > { %10093 = vmatmul.mubr.msk.f32.gmra.mrb[30].mxu1 %vm4319_vm2, %v4473_v4  ;;  %v5316_v4 = vld [vmem:[#allocation4 + $0x14] sm:$0xff] }
 0x36c   : > { %10095 = vmatprep.mubr.msk.f32.mxu1 %vm4319_vm2, %v4474_v43  ;;  %10806 = vmatpush3.bf16.msra.mxu1 %v10803_v56  ;;  %v5149_v56 = vld [vmem:[#allocation4 + $0x4b] sm:$0xff] }
 0x36d   : > { %10808 = vmatprep.subr.bf16.mxu1 %v10807_v3  ;;  %v8524_v43 = vld [vmem:[%s13501_s3 + $0x1a0] sm:$0xff] }
 0x36f   : > { %10096 = vmatmul.mubr.msk.f32.gmra.mrb[32].mxu1 %vm4319_vm2, %v4475_v54  ;;  %v5317_v54 = vld [vmem:[#allocation4 + $0x1c] sm:$0xff] }
 0x370   : > { %10114 = vmatprep.mubr.msk.f32.mxu1 %vm4319_vm2, %v4793_v44  ;;  %v8525_v44 = vld [vmem:[%s13501_s3 + $0x1a8] sm:$0xff] }
 0x371   : > { %v10863_v45 = vpack.c.bf16 %v8525_v44, %v8524_v43  ;;  %v6101_v44 = vld [vmem:[%s13503_s5 + $0x20] sm:$0xff] }
 0x373   : > { %10115 = vmatmul.mubr.msk.f32.vlgmr.msra.gmra.mrb[24].mxu1 %vm4319_vm2, %v4794_v47 }
 0x374   : > { %10810 = vmatpush3.bf16.msra.mxu1 %v10807_v3  ;;  %10117 = vmatprep.mubr.msk.f32.mxu1 %vm4319_vm2, %v4795_v49  ;;  %v10859_v3 = vpack.c.bf16 %v8523_v41, %v8522_v12  ;;  %v6097_v12 = vld [vmem:[%s13503_s5] sm:$0xff]  ;;  %v6098_v41 = vld [vmem:[%s13503_s5 + $0x8] sm:$0xff] }
 0x375   : > { %10812 = vmatprep.subr.bf16.mxu1 %v10811_v13 }
 0x377   : > { %10118 = vmatmul.mubr.msk.f32.gmra.mrb[26].mxu1 %vm4319_vm2, %v4796_v50 }
 0x378   : > { %10120 = vmatprep.mubr.msk.f32.mxu1 %vm4319_vm2, %v4797_v53  ;;  %10814 = vmatpush3.bf16.msra.mxu1 %v10811_v13  ;;  %v8526_v13 = vld [vmem:[%s13501_s3 + $0x1b0] sm:$0xff] }
 0x379   : > { %10816 = vmatprep.subr.bf16.mxu1 %v10815_v59 }
 0x37b   : > { %10121 = vmatmul.mubr.msk.f32.gmra.mrb[28].mxu1 %vm4319_vm2, %v4798_v5 }
 0x37c   : > { %10123 = vmatprep.mubr.msk.f32.mxu1 %vm4319_vm2, %v4799_v58  ;;  %10818 = vmatpush3.bf16.msra.mxu1 %v10815_v59  ;;  %v8538_v59 = vld [vmem:[%s13501_s3 + $0x1c0] sm:$0xff] }
 0x37d   : > { %10820 = vmatprep.subr.bf16.mxu1 %v10819_v55 }
 0x37f   : > { %10124 = vmatmul.mubr.msk.f32.gmra.mrb[30].mxu1 %vm4319_vm2, %v4800_v16 }
 0x380   : > { %10126 = vmatprep.mubr.msk.f32.mxu1 %vm4319_vm2, %v4801_v6  ;;  %10822 = vmatpush3.bf16.msra.mxu1 %v10819_v55  ;;  %v5323_v55 = vld [vmem:[#allocation4 + $0x4c] sm:$0xff] }
 0x381   : > { %10824 = vmatprep.subr.bf16.mxu1 %v10823_v61 }
 0x383   : > { %10127 = vmatmul.mubr.msk.f32.gmra.mrb[32].mxu1 %vm4319_vm2, %v4802_v60 }
 0x384   : > { %10145 = vmatprep.mubr.msk.f32.mxu1 %vm4319_vm2, %v4794_v47  ;;  %v8527_v47 = vld [vmem:[%s13501_s3 + $0x1b8] sm:$0xff] }
 0x385   : > { %v10867_v14 = vpack.c.bf16 %v8527_v47, %v8526_v13  ;;  %v6104_v13 = vld [vmem:[%s13503_s5 + $0x38] sm:$0xff] }
 0x387   : > { %10146 = vmatmul.mubr.msk.f32.vlgmr.msra.gmra.mrb[24].mxu1 %vm4319_vm2, %v4795_v49  ;;  %v5320_v49 = vld [vmem:[#allocation4 + $0x34] sm:$0xff] }
 0x388   : > { %10826 = vmatpush3.bf16.msra.mxu1 %v10823_v61  ;;  %10148 = vmatprep.mubr.msk.f32.mxu1 %vm4319_vm2, %v4796_v50  ;;  %v8539_v50 = vld [vmem:[%s13501_s3 + $0x1c8] sm:$0xff]  ;;  %v8542_v61 = vld [vmem:[%s13501_s3 + $0x1e0] sm:$0xff] }
 0x389   : > { %10828 = vmatprep.subr.bf16.mxu1 %v10827_v17  ;;  %v10871_v52 = vpack.c.bf16 %v8539_v50, %v8538_v59  ;;  %v6107_v59 = vld [vmem:[%s13503_s5 + $0x50] sm:$0xff]  ;;  %v6108_v50 = vld [vmem:[%s13503_s5 + $0x58] sm:$0xff] }
 0x38b   : > { %10149 = vmatmul.mubr.msk.f32.gmra.mrb[26].mxu1 %vm4319_vm2, %v4797_v53  ;;  %v5322_v53 = vld [vmem:[#allocation4 + $0x44] sm:$0xff] }
 0x38c   : > { %10151 = vmatprep.mubr.msk.f32.mxu1 %vm4319_vm2, %v4798_v5  ;;  %10830 = vmatpush3.bf16.msra.mxu1 %v10827_v17  ;;  %v5324_v5 = vld [vmem:[#allocation4 + $0x54] sm:$0xff]  ;;  %v8556_v17 = vld [vmem:[%s13501_s3 + $0x200] sm:$0xff] }
 0x38d   : > { %10832 = vmatprep.subr.bf16.mxu1 %v10831_v23  ;;  %v10887_v20 = vpack.c.bf16 %v8557_v19, %v8556_v17 }
 0x38f   : > { %10152 = vmatmul.mubr.msk.f32.gmra.mrb[28].mxu1 %vm4319_vm2, %v4799_v58  ;;  %v10875_v58 = vpack.c.bf16 %v8541_v57, %v8540_v15  ;;  %v6112_v15 = vld [vmem:[%s13503_s5 + $0x78] sm:$0xff] }
 0x390   : > { %10154 = vmatprep.mubr.msk.f32.mxu1 %vm4319_vm2, %v4800_v16  ;;  %10834 = vmatpush3.bf16.msra.mxu1 %v10831_v23  ;;  %v8543_v16 = vld [vmem:[%s13501_s3 + $0x1e8] sm:$0xff]  ;;  %v5498_v23 = vld [vmem:[#allocation4 + $0x5c] sm:$0xff] }
 0x391   : > { %10836 = vmatprep.subr.bf16.mxu1 %v10835_v24 }
 0x393   : > { %10155 = vmatmul.mubr.msk.f32.gmra.mrb[30].mxu1 %vm4319_vm2, %v4801_v6  ;;  %v10879_v6 = vpack.c.bf16 %v8543_v16, %v8542_v61  ;;  %v6198_v61 = vld [vmem:[%s13505_s7 + $0x8] sm:$0xff] }
 0x394   : > { %10157 = vmatprep.mubr.msk.f32.mxu1 %vm4319_vm2, %v4802_v60  ;;  %10838 = vmatpush3.bf16.msra.mxu1 %v10835_v24  ;;  %v8544_v60 = vld [vmem:[%s13501_s3 + $0x1f0] sm:$0xff] }
 0x395   : > { %10840 = vmatprep.subr.bf16.mxu1 %v10839_v22  ;;  %v10883_v63 = vpack.c.bf16 %v8545_v62, %v8544_v60  ;;  %v5663_v24 = vld [vmem:[#allocation4 + $0x15] sm:$0xff] }
 0x397   : > { %10158 = vmatmul.mubr.msk.f32.gmra.mrb[32].mxu1 %vm4319_vm2, %v4976_v8  ;;  %v8561_v8 = vld [vmem:[%s13501_s3 + $0x228] sm:$0xff] }
 0x398   : > { %10176 = vmatprep.mubr.msk.f32.mxu1 %vm4319_vm2, %v5141_v29  ;;  %v5666_v29 = vld [vmem:[#allocation4 + $0x2d] sm:$0xff] }
 0x39b   : > { %10177 = vmatmul.mubr.msk.f32.vlgmr.msra.gmra.mrb[24].mxu1 %vm4319_vm2, %v5142_v30  ;;  %v8563_v30 = vld [vmem:[%s13501_s3 + $0x238] sm:$0xff] }
 0x39c   : > { %10842 = vmatpush3.bf16.msra.mxu1 %v10839_v22  ;;  %10179 = vmatprep.mubr.msk.f32.mxu1 %vm4319_vm2, %v5143_v9  ;;  %v8560_v22 = vld [vmem:[%s13501_s3 + $0x220] sm:$0xff]  ;;  %v5668_v9 = vld [vmem:[#allocation4 + $0x3d] sm:$0xff] }
 0x39d   : > { %10844 = vmatprep.subr.bf16.mxu1 %v10843_v21  ;;  %v10895_v28 = vpack.c.bf16 %v8561_v8, %v8560_v22 }
 0x39f   : > { %10180 = vmatmul.mubr.msk.f32.gmra.mrb[26].mxu1 %vm4319_vm2, %v5144_v2  ;;  %v5670_v2 = vld [vmem:[#allocation4 + $0x4d] sm:$0xff] }
 0x3a0   : > { %10182 = vmatprep.mubr.msk.f32.mxu1 %vm4319_vm2, %v5145_v10  ;;  %10846 = vmatpush3.bf16.msra.mxu1 %v10843_v21  ;;  %v8562_v21 = vld [vmem:[%s13501_s3 + $0x230] sm:$0xff] }
 0x3a1   : > { %10848 = vmatprep.subr.bf16.mxu1 %v10847_v32  ;;  %v10899_v31 = vpack.c.bf16 %v8563_v30, %v8562_v21  ;;  %v5837_v10 = vld [vmem:[#allocation4 + $0x16] sm:$0xff] }
 0x3a3   : > { %10183 = vmatmul.mubr.msk.f32.gmra.mrb[28].mxu1 %vm4319_vm2, %v5146_v36  ;;  %v5839_v36 = vld [vmem:[#allocation4 + $0x26] sm:$0xff] }
 0x3a4   : > { %10185 = vmatprep.mubr.msk.f32.mxu1 %vm4319_vm2, %v5147_v39  ;;  %10850 = vmatpush3.bf16.msra.mxu1 %v10847_v32  ;;  %v5669_v32 = vld [vmem:[#allocation4 + $0x45] sm:$0xff] }
 0x3a5   : > { %10852 = vmatprep.subr.bf16.mxu1 %v10851_v35  ;;  %v5842_v39 = vld [vmem:[#allocation4 + $0x3e] sm:$0xff] }
 0x3a7   : > { %10186 = vmatmul.mubr.msk.f32.gmra.mrb[30].mxu1 %vm4319_vm2, %v5148_v11  ;;  %v5844_v11 = vld [vmem:[#allocation4 + $0x4e] sm:$0xff] }
 0x3a8   : > { %10188 = vmatprep.mubr.msk.f32.mxu1 %vm4319_vm2, %v5149_v56  ;;  %10854 = vmatpush3.bf16.msra.mxu1 %v10851_v35  ;;  %v5838_v35 = vld [vmem:[#allocation4 + $0x1e] sm:$0xff]  ;;  %v5845_v56 = vld [vmem:[#allocation4 + $0x56] sm:$0xff] }
 0x3a9   : > { %10856 = vmatprep.subr.bf16.mxu1 %v10855_v40 }
 0x3ab   : > { %10189 = vmatmul.mubr.msk.f32.gmra.mrb[32].mxu1 %vm4319_vm2, %v5150_v51  ;;  %v5846_v51 = vld [vmem:[#allocation4 + $0x5e] sm:$0xff] }
 0x3ac   : > { %10207 = vmatprep.mubr.msk.f32.mxu1 %vm4319_vm2, %v5315_v42  ;;  %v10903_v42 = vpack.c.bf16 %v6098_v41, %v6097_v12 }
 0x3af   : > { %10208 = vmatmul.mubr.msk.f32.vlgmr.msra.gmra.mrb[24].mxu1 %vm4319_vm2, %v5316_v4 }
 0x3b0   : > { %10858 = vmatpush3.bf16.msra.mxu1 %v10855_v40  ;;  %10210 = vmatprep.mubr.msk.f32.mxu1 %vm4319_vm2, %v5317_v54  ;;  %v5843_v40 = vld [vmem:[#allocation4 + $0x46] sm:$0xff] }
 0x3b1   : > { %10860 = vmatprep.subr.bf16.mxu1 %v10859_v3 }
 0x3b3   : > { %10211 = vmatmul.mubr.msk.f32.gmra.mrb[26].mxu1 %vm4319_vm2, %v5318_v46 }
 0x3b4   : > { %10213 = vmatprep.mubr.msk.f32.mxu1 %vm4319_vm2, %v5319_v48  ;;  %10862 = vmatpush3.bf16.msra.mxu1 %v10859_v3  ;;  %v6099_v3 = vld [vmem:[%s13503_s5 + $0x10] sm:$0xff] }
 0x3b5   : > { %10864 = vmatprep.subr.bf16.mxu1 %v10863_v45 }
 0x3b7   : > { %10214 = vmatmul.mubr.msk.f32.gmra.mrb[28].mxu1 %vm4319_vm2, %v5320_v49 }
 0x3b8   : > { %10216 = vmatprep.mubr.msk.f32.mxu1 %vm4319_vm2, %v5321_v1  ;;  %10866 = vmatpush3.bf16.msra.mxu1 %v10863_v45 }
 0x3b9   : > { %10868 = vmatprep.subr.bf16.mxu1 %v10867_v14 }
 0x3bb   : > { %10217 = vmatmul.mubr.msk.f32.gmra.mrb[30].mxu1 %vm4319_vm2, %v5322_v53 }
 0x3bc   : > { %10219 = vmatprep.mubr.msk.f32.mxu1 %vm4319_vm2, %v5323_v55  ;;  %10870 = vmatpush3.bf16.msra.mxu1 %v10867_v14  ;;  %v6106_v14 = vld [vmem:[%s13503_s5 + $0x48] sm:$0xff] }
 0x3bd   : > { %10872 = vmatprep.subr.bf16.mxu1 %v10871_v52 }
 0x3bf   : > { %10220 = vmatmul.mubr.msk.f32.gmra.mrb[32].mxu1 %vm4319_vm2, %v5324_v5 }
 0x3c0   : > { %10238 = vmatprep.mubr.msk.f32.mxu1 %vm4319_vm2, %v5316_v4  ;;  %v6100_v4 = vld [vmem:[%s13503_s5 + $0x18] sm:$0xff] }
 0x3c1   : > { %v10907_v43 = vpack.c.bf16 %v6100_v4, %v6099_v3 }
 0x3c3   : > { %10239 = vmatmul.mubr.msk.f32.vlgmr.msra.gmra.mrb[24].mxu1 %vm4319_vm2, %v5317_v54  ;;  %v6102_v54 = vld [vmem:[%s13503_s5 + $0x28] sm:$0xff] }
 0x3c4   : > { %10874 = vmatpush3.bf16.msra.mxu1 %v10871_v52  ;;  %10241 = vmatprep.mubr.msk.f32.mxu1 %vm4319_vm2, %v5318_v46  ;;  %v10911_v45 = vpack.c.bf16 %v6102_v54, %v6101_v44  ;;  %v6103_v46 = vld [vmem:[%s13503_s5 + $0x30] sm:$0xff]  ;;  %v6109_v52 = vld [vmem:[%s13503_s5 + $0x60] sm:$0xff] }
 0x3c5   : > { %10876 = vmatprep.subr.bf16.mxu1 %v10875_v58  ;;  %v10915_v47 = vpack.c.bf16 %v6104_v13, %v6103_v46 }
 0x3c7   : > { %10242 = vmatmul.mubr.msk.f32.gmra.mrb[26].mxu1 %vm4319_vm2, %v5319_v48  ;;  %v6105_v48 = vld [vmem:[%s13503_s5 + $0x40] sm:$0xff] }
 0x3c8   : > { %10244 = vmatprep.mubr.msk.f32.mxu1 %vm4319_vm2, %v5320_v49  ;;  %10878 = vmatpush3.bf16.msra.mxu1 %v10875_v58  ;;  %v10919_v49 = vpack.c.bf16 %v6106_v14, %v6105_v48  ;;  %v6197_v58 = vld [vmem:[%s13505_s7] sm:$0xff] }
 0x3c9   : > { %10880 = vmatprep.subr.bf16.mxu1 %v10879_v6  ;;  %v12927_v16 = vpack.c.bf16 %v6198_v61, %v6197_v58  ;;  %v6200_v58 = vld [vmem:[%s13505_s7 + $0x18] sm:$0xff] }
 0x3cb   : > { %10245 = vmatmul.mubr.msk.f32.gmra.mrb[28].mxu1 %vm4319_vm2, %v5321_v1  ;;  %v10923_v1 = vpack.c.bf16 %v6108_v50, %v6107_v59 }
 0x3cc   : > { %10247 = vmatprep.mubr.msk.f32.mxu1 %vm4319_vm2, %v5322_v53  ;;  %10882 = vmatpush3.bf16.msra.mxu1 %v10879_v6  ;;  %v6110_v53 = vld [vmem:[%s13503_s5 + $0x68] sm:$0xff]  ;;  %v8574_v6 = vld [vmem:[%s13502_s4] ss:$0 sm:$0xff] }
 0x3cd   : > { %10884 = vmatprep.subr.bf16.mxu1 %v10883_v63 }
 0x3cf   : > { %10248 = vmatmul.mubr.msk.f32.gmra.mrb[30].mxu1 %vm4319_vm2, %v5323_v55  ;;  %v10927_v55 = vpack.c.bf16 %v6110_v53, %v6109_v52 }
 0x3d0   : > { %10250 = vmatprep.mubr.msk.f32.mxu1 %vm4319_vm2, %v5324_v5  ;;  %10886 = vmatpush3.bf16.msra.mxu1 %v10883_v63  ;;  %v6111_v5 = vld [vmem:[%s13503_s5 + $0x70] sm:$0xff] }
 0x3d1   : > { %10888 = vmatprep.subr.bf16.mxu1 %v10887_v20  ;;  %v10931_v57 = vpack.c.bf16 %v6112_v15, %v6111_v5 }
 0x3d3   : > { %10251 = vmatmul.mubr.msk.f32.gmra.mrb[32].mxu1 %vm4319_vm2, %v5498_v23 }
 0x3d4   : > { %10269 = vmatprep.mubr.msk.f32.mxu1 %vm4319_vm2, %v5663_v24 }
 0x3d7   : > { %10270 = vmatmul.mubr.msk.f32.vlgmr.msra.gmra.mrb[24].mxu1 %vm4319_vm2, %v5664_v26 }
 0x3d8   : > { %10890 = vmatpush3.bf16.msra.mxu1 %v10887_v20  ;;  %10272 = vmatprep.mubr.msk.f32.mxu1 %vm4319_vm2, %v5665_v27 }
 0x3d9   : > { %10892 = vmatprep.subr.bf16.mxu1 %v10891_v25 }
 0x3db   : > { %10273 = vmatmul.mubr.msk.f32.gmra.mrb[26].mxu1 %vm4319_vm2, %v5666_v29 }
 0x3dc   : > { %10275 = vmatprep.mubr.msk.f32.mxu1 %vm4319_vm2, %v5667_v0  ;;  %10894 = vmatpush3.bf16.msra.mxu1 %v10891_v25 }
 0x3dd   : > { %10896 = vmatprep.subr.bf16.mxu1 %v10895_v28 }
 0x3df   : > { %10276 = vmatmul.mubr.msk.f32.gmra.mrb[28].mxu1 %vm4319_vm2, %v5668_v9 }
 0x3e0   : > { %10278 = vmatprep.mubr.msk.f32.mxu1 %vm4319_vm2, %v5669_v32  ;;  %10898 = vmatpush3.bf16.msra.mxu1 %v10895_v28 }
 0x3e1   : > { %10900 = vmatprep.subr.bf16.mxu1 %v10899_v31 }
 0x3e3   : > { %10279 = vmatmul.mubr.msk.f32.gmra.mrb[30].mxu1 %vm4319_vm2, %v5670_v2 }
 0x3e4   : > { %10281 = vmatprep.mubr.msk.f32.mxu1 %vm4319_vm2, %v5671_v33  ;;  %10902 = vmatpush3.bf16.msra.mxu1 %v10899_v31 }
 0x3e5   : > { %10904 = vmatprep.subr.bf16.mxu1 %v10903_v42 }
 0x3e7   : > { %10282 = vmatmul.mubr.msk.f32.gmra.mrb[32].mxu1 %vm4319_vm2, %v5672_v34 }
 0x3e8   : > { %10300 = vmatprep.mubr.msk.f32.mxu1 %vm4319_vm2, %v5837_v10 }
 0x3eb   : > { %10301 = vmatmul.mubr.msk.f32.vlgmr.msra.gmra.mrb[24].mxu1 %vm4319_vm2, %v5838_v35 }
 0x3ec   : > { %10303 = vmatprep.mubr.msk.f32.mxu1 %vm4319_vm2, %v5839_v36  ;;  %10906 = vmatpush3.bf16.msra.mxu1 %v10903_v42 }
 0x3ed   : > { %10908 = vmatprep.subr.bf16.mxu1 %v10907_v43 }
 0x3ef   : > { %10304 = vmatmul.mubr.msk.f32.gmra.mrb[26].mxu1 %vm4319_vm2, %v5840_v37 }
 0x3f0   : > { %10306 = vmatprep.mubr.msk.f32.mxu1 %vm4319_vm2, %v5841_v38  ;;  %10910 = vmatpush3.bf16.msra.mxu1 %v10907_v43 }
 0x3f1   : > { %10912 = vmatprep.subr.bf16.mxu1 %v10911_v45 }
 0x3f3   : > { %10307 = vmatmul.mubr.msk.f32.gmra.mrb[28].mxu1 %vm4319_vm2, %v5842_v39 }
 0x3f4   : > { %10309 = vmatprep.mubr.msk.f32.mxu1 %vm4319_vm2, %v5843_v40  ;;  %10914 = vmatpush3.bf16.msra.mxu1 %v10911_v45 }
 0x3f5   : > { %10916 = vmatprep.subr.bf16.mxu1 %v10915_v47 }
 0x3f7   : > { %10310 = vmatmul.mubr.msk.f32.gmra.mrb[30].mxu1 %vm4319_vm2, %v5844_v11 }
 0x3f8   : > { %10312 = vmatprep.mubr.msk.f32.mxu1 %vm4319_vm2, %v5845_v56  ;;  %10918 = vmatpush3.bf16.msra.mxu1 %v10915_v47 }
 0x3f9   : > { %10920 = vmatprep.subr.bf16.mxu1 %v10919_v49 }
 0x3fb   : > { %10313 = vmatmul.mubr.msk.f32.gmra.mrb[32].mxu1 %vm4319_vm2, %v5846_v51 }
 0x3fc   : > { %10922 = vmatpush3.bf16.msra.mxu1 %v10919_v49 }
 0x3fd   : > { %10924 = vmatprep.subr.bf16.mxu1 %v10923_v1 }
 0x400   : > { %10926 = vmatpush3.bf16.msra.mxu1 %v10923_v1 }
 0x401   : > { %10928 = vmatprep.subr.bf16.mxu1 %v10927_v55 }
 0x404   : > { %10930 = vmatpush3.bf16.msra.mxu1 %v10927_v55 }
 0x405   : > { %10932 = vmatprep.subr.bf16.mxu1 %v10931_v57 }
 0x408   : > { %10934 = vmatpush3.bf16.msra.mxu1 %v10931_v57  ;;  %v6199_v57 = vld [vmem:[%s13505_s7 + $0x10] sm:$0xff] }
 0x409   : > { %10936 = vmatprep.subr.bf16.mxu1 %v12927_v16  ;;  %v12942_v61 = vpack.c.bf16 %v6200_v58, %v6199_v57  ;;  %v8624_v57 = vld [vmem:[%s13503_s5 + $0xb0] sm:$0xff]  ;;  %v8625_v58 = vld [vmem:[%s13503_s5 + $0xb8] sm:$0xff] }
 0x4be   : > { %v10302_v60 = vpop.f32.mrb[24].mxu1 }
 0x4bf   : > { %v6019_v62 = vadd.f32 %v10302_v60, %v8574_v6  ;;  %v5952_v63 = vpop.f32.mrb[25].mxu1  ;;  %v6201_v60 = vld [vmem:[%s13505_s7 + $0x20] sm:$0xff] }
 0x4c0   : > { %v6018_v17 = vadd.f32 %v8574_v6, %v5952_v63 }
 0x4c1   : > { %v6029_v19 = vmax.f32 %v6019_v62, 0.0  ;;  %v6202_v62 = vld [vmem:[%s13505_s7 + $0x28] sm:$0xff] }
 0x4c2   : > { %v6028_v20 = vmax.f32 %v6018_v17, 0.0  ;;  %v10305_v23 = vpop.f32.mrb[26].mxu1  ;;  %v12955_v63 = vpack.c.bf16 %v6202_v62, %v6201_v60  ;;  %v6203_v17 = vld [vmem:[%s13505_s7 + $0x30] sm:$0xff]  ;;  %v11011_v60 = vpack.c.bf16 %v8625_v58, %v8624_v57  ;;  %v8626_v62 = vld [vmem:[%s13503_s5 + $0xc0] sm:$0xff]  ;;  %v8684_v57 = vld [vmem:[%s13503_s5 + $0x128] sm:$0xff] }
 0x4c3   : > { %6039 = vst [vmem:[#allocation5 + $0x8] sm:$0xff] %v6029_v19  ;;  %v6021_v7 = vadd.f32 %v10305_v23, %v8574_v6  ;;  %v5962_v18 = vpop.f32.mrb[27].mxu1  ;;  %v6204_v19 = vld [vmem:[%s13505_s7 + $0x38] sm:$0xff]  ;;  %v8579_v23 = vld [vmem:[%s13505_s7 + $0x40] sm:$0xff] }
 0x4c4   : > { %6038 = vst [vmem:[#allocation5] sm:$0xff] %v6028_v20  ;;  %v6020_v24 = vadd.f32 %v8574_v6, %v5962_v18  ;;  %v12966_v20 = vpack.c.bf16 %v6204_v19, %v6203_v17  ;;  %v8627_v17 = vld [vmem:[%s13503_s5 + $0xc8] sm:$0xff] }
 0x4c5   : > { %v6031_v25 = vmax.f32 %v6021_v7, 0.0  ;;  %v8580_v7 = vld [vmem:[%s13505_s7 + $0x48] sm:$0xff]  ;;  %v11015_v19 = vpack.c.bf16 %v8627_v17, %v8626_v62  ;;  %v8686_v62 = vld [vmem:[%s13503_s5 + $0x138] sm:$0xff] }
 0x4c6   : > { %v6030_v26 = vmax.f32 %v6020_v24, 0.0  ;;  %v10308_v22 = vpop.f32.mrb[28].mxu1  ;;  %v12976_v18 = vpack.c.bf16 %v8580_v7, %v8579_v23  ;;  %v12982_v24 = vld [vmem:[%s13504_s6] ss:$0 sm:$0xff]  ;;  %v8628_v23 = vld [vmem:[%s13503_s5 + $0xd0] sm:$0xff]  ;;  %v8629_v7 = vld [vmem:[%s13503_s5 + $0xd8] sm:$0xff] }
 0x4c7   : > { %6041 = vst [vmem:[#allocation5 + $0x18] sm:$0xff] %v6031_v25  ;;  %v6023_v8 = vadd.f32 %v10308_v22, %v8574_v6  ;;  %v5972_v27 = vpop.f32.mrb[29].mxu1 }
 0x4c8   : > { %6040 = vst [vmem:[#allocation5 + $0x10] sm:$0xff] %v6030_v26  ;;  %v6022_v28 = vadd.f32 %v8574_v6, %v5972_v27  ;;  %v8581_v27 = vld [vmem:[%s13505_s7 + $0x50] sm:$0xff] }
 0x4c9   : > { %v6033_v29 = vmax.f32 %v6023_v8, 0.0 }
 0x4ca   : > { %v6032_v21 = vmax.f32 %v6022_v28, 0.0  ;;  %v10311_v30 = vpop.f32.mrb[30].mxu1  ;;  %v8582_v28 = vld [vmem:[%s13505_s7 + $0x58] sm:$0xff] }
 0x4cb   : > { %6043 = vst [vmem:[#allocation5 + $0x28] sm:$0xff] %v6033_v29  ;;  %v6025_v0 = vadd.f32 %v10311_v30, %v8574_v6  ;;  %v6048_v31 = vld [vmem:[#allocation5] ss:$2 sm:$0xf]  ;;  %v5982_v9 = vpop.f32.mrb[31].mxu1  ;;  %v12994_v30 = vpack.c.bf16 %v8582_v28, %v8581_v27  ;;  %v8632_v27 = vld [vmem:[%s13503_s5 + $0xf0] sm:$0xff] }
 0x4cc   : > { %6042 = vst [vmem:[#allocation5 + $0x20] sm:$0xff] %v6032_v21  ;;  %v6050_v32 = vld [vmem:[#allocation5 + $0x1] ss:$2 sm:$0xf]  ;;  %v6024_v33 = vadd.f32 %v8574_v6, %v5982_v9  ;;  %v8633_v28 = vld [vmem:[%s13503_s5 + $0xf8] sm:$0xff] }
 0x4cd   : > { %v6035_v2 = vmax.f32 %v6025_v0, 0.0  ;;  %v6055_v37 = vmax.f32 %v6048_v31, %v6050_v32  ;;  %v8583_v0 = vld [vmem:[%s13505_s7 + $0x60] sm:$0xff]  ;;  %v8584_v31 = vld [vmem:[%s13505_s7 + $0x68] sm:$0xff]  ;;  %v8585_v32 = vld [vmem:[%s13505_s7 + $0x70] sm:$0xff] }
 0x4ce   : > { %v10314_v34 = vpop.f32.mrb[32].mxu1  ;;  %v6034_v11 = vmax.f32 %v6024_v33, 0.0  ;;  %v13008_v9 = vpack.c.bf16 %v8584_v31, %v8583_v0 }
 0x4cf   : > { %v6052_v10 = vld [vmem:[#allocation5 + $0xa] ss:$2 sm:$0xf]  ;;  %v6054_v35 = vld [vmem:[#allocation5 + $0xb] ss:$2 sm:$0xf]  ;;  %v6027_v36 = vadd.f32 %v10314_v34, %v8574_v6 }
 0x4d0   : > { %6045 = vst [vmem:[#allocation5 + $0x38] sm:$0xff] %v6035_v2  ;;  %v6056_v38 = vmax.f32 %v6052_v10, %v6054_v35  ;;  %v6060_v39 = vld [vmem:[#allocation5 + $0x14] ss:$2 sm:$0xf]  ;;  %v5992_v51 = vpop.f32.mrb[33].mxu1  ;;  %6044 = vst [vmem:[#allocation5 + $0x30] sm:$0xff] %v6034_v11 }
 0x4d1   : > { %v6062_v40 = vld [vmem:[#allocation5 + $0x15] ss:$2 sm:$0xf]  ;;  %v6037_v56 = vmax.f32 %v6027_v36, 0.0  ;;  %v6026_v12 = vadd.f32 %v8574_v6, %v5992_v51  ;;  %v8593_v10 = vld [vmem:[%s13505_s7 + $0x88] sm:$0xff]  ;;  %v8594_v36 = vld [vmem:[%s13505_s7 + $0x90] sm:$0xff] }
 0x4d2   : > { %v6057_v41 = vmax.f32 %v6055_v37, %v6056_v38  ;;  %v6067_v4 = vmax.f32 %v6060_v39, %v6062_v40  ;;  %v6072_v45 = vld [vmem:[#allocation5 + $0x28] ss:$2 sm:$0xf]  ;;  %v6074_v46 = vld [vmem:[#allocation5 + $0x29] ss:$2 sm:$0xf] }
 0x4d3   : > { %v6064_v42 = vld [vmem:[#allocation5 + $0x1e] ss:$2 sm:$0xf]  ;;  %v6066_v3 = vld [vmem:[#allocation5 + $0x1f] ss:$2 sm:$0xf]  ;;  %v6079_v48 = vmax.f32 %v6072_v45, %v6074_v46 }
 0x4d4   : > { %6047 = vst [vmem:[#allocation5 + $0x48] sm:$0xff] %v6037_v56  ;;  %v6068_v43 = vmax.f32 %v6064_v42, %v6066_v3  ;;  %v6036_v44 = vmax.f32 %v6026_v12, 0.0  ;;  %6058 = vst [vmem:[#allocation6] sm:$0xf] %v6057_v41  ;;  %v8586_v2 = vld [vmem:[%s13505_s7 + $0x78] sm:$0xff]  ;;  %v8592_v34 = vld [vmem:[%s13505_s7 + $0x80] sm:$0xff] }
 0x4d5   : > { %v13018_v33 = vpack.c.bf16 %v8586_v2, %v8585_v32  ;;  %v13028_v35 = vpack.c.bf16 %v8593_v10, %v8592_v34  ;;  %v8595_v37 = vld [vmem:[%s13505_s7 + $0x98] sm:$0xff]  ;;  %v8596_v39 = vld [vmem:[%s13505_s7 + $0xa0] sm:$0xff]  ;;  %v8597_v40 = vld [vmem:[%s13505_s7 + $0xa8] sm:$0xff] }
 0x4d6   : > { %6046 = vst [vmem:[#allocation5 + $0x40] sm:$0xff] %v6036_v44  ;;  %v6069_v54 = vmax.f32 %v6067_v4, %v6068_v43  ;;  %v13038_v38 = vpack.c.bf16 %v8595_v37, %v8594_v36  ;;  %v13051_v11 = vpack.c.bf16 %v8597_v40, %v8596_v39  ;;  %v8598_v56 = vld [vmem:[%s13505_s7 + $0xb0] sm:$0xff]  ;;  %v8599_v51 = vld [vmem:[%s13505_s7 + $0xb8] sm:$0xff]  ;;  %v8605_v41 = vld [vmem:[%s13505_s7 + $0xc0] sm:$0xff] }
 0x4d7   : > { %v6076_v13 = vld [vmem:[#allocation5 + $0x32] ss:$2 sm:$0xf]  ;;  %v6078_v47 = vld [vmem:[#allocation5 + $0x33] ss:$2 sm:$0xf]  ;;  %v13061_v12 = vpack.c.bf16 %v8599_v51, %v8598_v56 }
 0x4d8   : > { %6070 = vst [vmem:[#allocation6 + $0x4] sm:$0xf] %v6069_v54  ;;  %v6080_v14 = vmax.f32 %v6076_v13, %v6078_v47  ;;  %v8606_v42 = vld [vmem:[%s13505_s7 + $0xc8] sm:$0xff]  ;;  %v8607_v4 = vld [vmem:[%s13505_s7 + $0xd0] sm:$0xff]  ;;  %v8608_v43 = vld [vmem:[%s13505_s7 + $0xd8] sm:$0xff] }
 0x4d9   : > { %v13071_v3 = vpack.c.bf16 %v8606_v42, %v8605_v41  ;;  %v13081_v44 = vpack.c.bf16 %v8608_v43, %v8607_v4  ;;  %v8609_v54 = vld [vmem:[%s13505_s7 + $0xe0] sm:$0xff]  ;;  %v8610_v45 = vld [vmem:[%s13505_s7 + $0xe8] sm:$0xff]  ;;  %v8611_v13 = vld [vmem:[%s13505_s7 + $0xf0] sm:$0xff] }
 0x4da   : > { %v6081_v49 = vmax.f32 %v6079_v48, %v6080_v14  ;;  %v13094_v46 = vpack.c.bf16 %v8610_v45, %v8609_v54  ;;  %v8612_v47 = vld [vmem:[%s13505_s7 + $0xf8] sm:$0xff]  ;;  %v8618_v14 = vld [vmem:[%s13503_s5 + $0x80] sm:$0xff] }
 0x4db   : > { %v13104_v48 = vpack.c.bf16 %v8612_v47, %v8611_v13 }
 0x4dc   : > { %6082 = vst [vmem:[#allocation6 + $0x8] sm:$0xf] %v6081_v49  ;;  %v8619_v49 = vld [vmem:[%s13503_s5 + $0x88] sm:$0xff] }
 0x4dd   : > { %v6084_v59 = vld [vmem:[#allocation5 + $0x3c] ss:$2 sm:$0xf]  ;;  %v6086_v50 = vld [vmem:[#allocation5 + $0x3d] ss:$2 sm:$0xf] }
 0x4de   : > { %v6088_v1 = vld [vmem:[#allocation5 + $0x46] ss:$2 sm:$0xf]  ;;  %v6090_v52 = vld [vmem:[#allocation5 + $0x47] ss:$2 sm:$0xf]  ;;  %v6091_v53 = vmax.f32 %v6084_v59, %v6086_v50  ;;  %v10999_v59 = vpack.c.bf16 %v8619_v49, %v8618_v14 }
 0x4df   : > { %v6092_v55 = vmax.f32 %v6088_v1, %v6090_v52  ;;  %v12933_v5 = vld [vmem:[#allocation6] sm:$0xff]  ;;  %v8620_v50 = vld [vmem:[%s13503_s5 + $0x90] sm:$0xff] }
 0x4e0   : > { %10347 = vmatprep.mubr.f32.mxu1 %v12933_v5  ;;  %v8621_v1 = vld [vmem:[%s13503_s5 + $0x98] sm:$0xff] }
 0x4e1   : > { %v6093_v15 = vmax.f32 %v6091_v53, %v6092_v55  ;;  %v11003_v52 = vpack.c.bf16 %v8621_v1, %v8620_v50  ;;  %v8622_v53 = vld [vmem:[%s13503_s5 + $0xa0] sm:$0xff]  ;;  %v8623_v55 = vld [vmem:[%s13503_s5 + $0xa8] sm:$0xff] }
 0x4e2   : > { %v8680_v50 = vld [vmem:[%s13503_s5 + $0x108] sm:$0xff] }
 0x4e3   : > { %6094 = vst [vmem:[#allocation6 + $0xc] sm:$0xf] %v6093_v15  ;;  %v11007_v15 = vpack.c.bf16 %v8623_v55, %v8622_v53  ;;  %v8682_v53 = vld [vmem:[%s13503_s5 + $0x118] sm:$0xff] }
 0x4ea   : > { %v12944_v6 = vld [vmem:[#allocation6 + $0x8] sm:$0xff] }
 0x4eb   : > { %10348 = vmatmul.mubr.f32.vlgmr.msra.gmra.mrb[34].mxu1 %v12944_v6 }
 0x4ec   : > { %10938 = vmatpush3.bf16.msra.mxu1 %v12927_v16 }
 0x4ed   : > { %10940 = vmatprep.subr.bf16.mxu1 %v12942_v61 }
 0x4f0   : > { %10942 = vmatpush3.bf16.msra.mxu1 %v12942_v61 }
 0x4f1   : > { %10944 = vmatprep.subr.bf16.mxu1 %v12955_v63 }
 0x4f4   : > { %10946 = vmatpush3.bf16.msra.mxu1 %v12955_v63 }
 0x4f5   : > { %10948 = vmatprep.subr.bf16.mxu1 %v12966_v20 }
 0x4f8   : > { %10950 = vmatpush3.bf16.msra.mxu1 %v12966_v20 }
 0x4f9   : > { %10952 = vmatprep.subr.bf16.mxu1 %v12976_v18 }
 0x5be   : > { %v10349_v25 = vpop.f32.mrb[34].mxu1 }
 0x5bf   : > { %v6192_v26 = vadd.f32 %v10349_v25, %v12982_v24  ;;  %v6186_v22 = vpop.f32.mrb[35].mxu1  ;;  %v11019_v25 = vpack.c.bf16 %v8629_v7, %v8628_v23  ;;  %v8688_v23 = vld [vmem:[%s13503_s5 + $0x148] sm:$0xff] }
 0x5c0   : > { %v6187_v8 = vadd.f32 %v12982_v24, %v6186_v22  ;;  %v8631_v22 = vld [vmem:[%s13503_s5 + $0xe8] sm:$0xff] }
 0x5c1   : > { %v12992_v21 = vmax.f32 %v6192_v26, 0.0  ;;  %v8630_v26 = vld [vmem:[%s13503_s5 + $0xe0] sm:$0xff] }
 0x5c2   : > { %v6195_v29 = vmax.f32 %v6187_v8, 0.0  ;;  %v11023_v8 = vpack.c.bf16 %v8631_v22, %v8630_v26  ;;  %v8690_v26 = vld [vmem:[%s13503_s5 + $0x158] sm:$0xff] }
 0x5c4   : > { %10366 = vmatprep.mubr.msk.f32.mxu1 %vm4319_vm2, %v6195_v29 }
 0x5c5   : > { %10367 = vmatmul.mubr.msk.f32.vlgmr.msra.gmra.mrb[36].mxu1 %vm4319_vm2, %v12992_v21 }
 0x5c6   : > { %10954 = vmatpush3.bf16.msra.mxu1 %v12976_v18  ;;  %10385 = vmatprep.mubr.msk.f32.mxu1 %vm4319_vm2, %v6195_v29 }
 0x5c7   : > { %10956 = vmatprep.subr.bf16.mxu1 %v12994_v30 }
 0x5ca   : > { %10958 = vmatpush3.bf16.msra.mxu1 %v12994_v30 }
 0x5cb   : > { %10960 = vmatprep.subr.bf16.mxu1 %v13008_v9 }
 0x5ce   : > { %10962 = vmatpush3.bf16.msra.mxu1 %v13008_v9 }
 0x5cf   : > { %10964 = vmatprep.subr.bf16.mxu1 %v13018_v33 }
 0x5d2   : > { %10966 = vmatpush3.bf16.msra.mxu1 %v13018_v33 }
 0x5d3   : > { %10968 = vmatprep.subr.bf16.mxu1 %v13028_v35 }
 0x5d5   : > { %10386 = vmatmul.mubr.msk.f32.vlgmr.msra.gmra.mrb[38].mxu1 %vm4319_vm2, %v12992_v21 }
 0x5d6   : > { %10970 = vmatpush3.bf16.msra.mxu1 %v13028_v35  ;;  %10404 = vmatprep.mubr.msk.f32.mxu1 %vm4319_vm2, %v6195_v29 }
 0x5d7   : > { %10972 = vmatprep.subr.bf16.mxu1 %v13038_v38 }
 0x5da   : > { %10974 = vmatpush3.bf16.msra.mxu1 %v13038_v38 }
 0x5db   : > { %10976 = vmatprep.subr.bf16.mxu1 %v13051_v11 }
 0x5de   : > { %10978 = vmatpush3.bf16.msra.mxu1 %v13051_v11 }
 0x5df   : > { %10980 = vmatprep.subr.bf16.mxu1 %v13061_v12 }
 0x5e2   : > { %10982 = vmatpush3.bf16.msra.mxu1 %v13061_v12 }
 0x5e3   : > { %10984 = vmatprep.subr.bf16.mxu1 %v13071_v3 }
 0x5e5   : > { %10405 = vmatmul.mubr.msk.f32.vlgmr.msra.gmra.mrb[40].mxu1 %vm4319_vm2, %v12992_v21 }
 0x5e6   : > { %10986 = vmatpush3.bf16.msra.mxu1 %v13071_v3  ;;  %10423 = vmatprep.mubr.msk.f32.mxu1 %vm4319_vm2, %v6195_v29  ;;  %v11027_v29 = vpack.c.bf16 %v8633_v28, %v8632_v27  ;;  %v8692_v27 = vld [vmem:[%s13503_s5 + $0x168] sm:$0xff] }
 0x5e7   : > { %10988 = vmatprep.subr.bf16.mxu1 %v13081_v44 }
 0x5ea   : > { %10990 = vmatpush3.bf16.msra.mxu1 %v13081_v44 }
 0x5eb   : > { %10992 = vmatprep.subr.bf16.mxu1 %v13094_v46 }
 0x5ee   : > { %10994 = vmatpush3.bf16.msra.mxu1 %v13094_v46 }
 0x5ef   : > { %10996 = vmatprep.subr.bf16.mxu1 %v13104_v48 }
 0x5f2   : > { %10998 = vmatpush3.bf16.msra.mxu1 %v13104_v48 }
 0x5f3   : > { %11000 = vmatprep.subr.bf16.mxu1 %v10999_v59 }
 0x5f5   : > { %10424 = vmatmul.mubr.msk.f32.vlgmr.msra.gmra.mrb[42].mxu1 %vm4319_vm2, %v12992_v21  ;;  %v13173_v21 = vld [vmem:[%s13506_s8] ss:$0 sm:$0xff] }
 0x5f6   : > { %11002 = vmatpush3.bf16.msra.mxu1 %v10999_v59  ;;  %10458 = vmatprep.mubr.f32.mxu1 %v12933_v5  ;;  %v8679_v59 = vld [vmem:[%s13503_s5 + $0x100] sm:$0xff] }
 0x5f7   : > { %11004 = vmatprep.subr.bf16.mxu1 %v11003_v52  ;;  %v11095_v1 = vpack.c.bf16 %v8680_v50, %v8679_v59 }
 0x5fa   : > { %11006 = vmatpush3.bf16.msra.mxu1 %v11003_v52  ;;  %v8681_v52 = vld [vmem:[%s13503_s5 + $0x110] sm:$0xff] }
 0x5fb   : > { %11008 = vmatprep.subr.bf16.mxu1 %v11007_v15  ;;  %v11099_v55 = vpack.c.bf16 %v8682_v53, %v8681_v52  ;;  %v8741_v52 = vld [vmem:[%s13503_s5 + $0x188] sm:$0xff] }
 0x5fe   : > { %11010 = vmatpush3.bf16.msra.mxu1 %v11007_v15  ;;  %v8683_v15 = vld [vmem:[%s13503_s5 + $0x120] sm:$0xff] }
 0x5ff   : > { %11012 = vmatprep.subr.bf16.mxu1 %v11011_v60  ;;  %v11103_v58 = vpack.c.bf16 %v8684_v57, %v8683_v15  ;;  %v8743_v15 = vld [vmem:[%s13503_s5 + $0x198] sm:$0xff] }
 0x602   : > { %11014 = vmatpush3.bf16.msra.mxu1 %v11011_v60  ;;  %v8685_v60 = vld [vmem:[%s13503_s5 + $0x130] sm:$0xff] }
 0x603   : > { %11016 = vmatprep.subr.bf16.mxu1 %v11015_v19  ;;  %v11107_v17 = vpack.c.bf16 %v8686_v62, %v8685_v60  ;;  %v8745_v60 = vld [vmem:[%s13503_s5 + $0x1a8] sm:$0xff] }
 0x606   : > { %11018 = vmatpush3.bf16.msra.mxu1 %v11015_v19  ;;  %v8687_v19 = vld [vmem:[%s13503_s5 + $0x140] sm:$0xff] }
 0x607   : > { %11020 = vmatprep.subr.bf16.mxu1 %v11019_v25  ;;  %v11111_v7 = vpack.c.bf16 %v8688_v23, %v8687_v19  ;;  %v8747_v19 = vld [vmem:[%s13503_s5 + $0x1b8] sm:$0xff] }
 0x60a   : > { %11022 = vmatpush3.bf16.msra.mxu1 %v11019_v25  ;;  %v8689_v25 = vld [vmem:[%s13503_s5 + $0x150] sm:$0xff] }
 0x60b   : > { %11024 = vmatprep.subr.bf16.mxu1 %v11023_v8  ;;  %v11115_v22 = vpack.c.bf16 %v8690_v26, %v8689_v25  ;;  %v8750_v26 = vld [vmem:[%s13503_s5 + $0x1d0] sm:$0xff] }
 0x60e   : > { %11026 = vmatpush3.bf16.msra.mxu1 %v11023_v8  ;;  %v8691_v8 = vld [vmem:[%s13503_s5 + $0x160] sm:$0xff] }
 0x60f   : > { %11028 = vmatprep.subr.bf16.mxu1 %v11027_v29  ;;  %v11119_v28 = vpack.c.bf16 %v8692_v27, %v8691_v8  ;;  %v8752_v27 = vld [vmem:[%s13503_s5 + $0x1e0] sm:$0xff] }
 0x612   : > { %11030 = vmatpush3.bf16.msra.mxu1 %v11027_v29  ;;  %v8693_v29 = vld [vmem:[%s13503_s5 + $0x170] sm:$0xff] }
 0x613   : > { %11032 = vmatprep.subr.bf16.mxu1 %v12927_v16 }
 0x615   : > { %10459 = vmatmul.mubr.f32.vlgmr.msra.gmra.mrb[44].mxu1 %v12944_v6 }
 0x616   : > { %11034 = vmatpush3.bf16.msra.mxu1 %v12927_v16 }
 0x617   : > { %11036 = vmatprep.subr.bf16.mxu1 %v12942_v61 }
 0x61a   : > { %11038 = vmatpush3.bf16.msra.mxu1 %v12942_v61 }
 0x61b   : > { %11040 = vmatprep.subr.bf16.mxu1 %v12955_v63 }
 0x61e   : > { %11042 = vmatpush3.bf16.msra.mxu1 %v12955_v63 }
 0x61f   : > { %11044 = vmatprep.subr.bf16.mxu1 %v12966_v20 }
 0x622   : > { %11046 = vmatpush3.bf16.msra.mxu1 %v12966_v20 }
 0x623   : > { %11048 = vmatprep.subr.bf16.mxu1 %v12976_v18 }
 0x698   : > { %v10368_v0 = vpop.f32.mrb[36].mxu1 }
 0x699   : > { %v6290_v31 = vadd.f32 %v10368_v0, %v13173_v21  ;;  %v6284_v32 = vpop.f32.mrb[37].mxu1  ;;  %v8694_v0 = vld [vmem:[%s13503_s5 + $0x178] sm:$0xff] }
 0x69a   : > { %v6285_v2 = vadd.f32 %v13173_v21, %v6284_v32 }
 0x69b   : > { %6294 = vst.msk [vmem:[%s13180_s27 + $0x8] sm:$0xff] %vm333_vm1, %v6290_v31  ;;  %v11123_v31 = vpack.c.bf16 %v8694_v0, %v8693_v29  ;;  %v8754_v0 = vld [vmem:[%s13503_s5 + $0x1f0] sm:$0xff] }
 0x69c   : > { %6293 = vst.msk [vmem:[%s13180_s27] sm:$0xff] %vm333_vm1, %v6285_v2 }
 0x6a8   : > { %v10387_v34 = vpop.f32.mrb[38].mxu1 }
 0x6a9   : > { %v6383_v10 = vadd.f32 %v10387_v34, %v13173_v21  ;;  %v6377_v36 = vpop.f32.mrb[39].mxu1 }
 0x6aa   : > { %v6378_v37 = vadd.f32 %v13173_v21, %v6377_v36 }
 0x6ab   : > { %8591 = vst.msk [vmem:[%s13180_s27 + $0x18] sm:$0xff] %vm333_vm1, %v6383_v10 }
 0x6ac   : > { %8590 = vst.msk [vmem:[%s13180_s27 + $0x10] sm:$0xff] %vm333_vm1, %v6378_v37 }
 0x6b8   : > { %v10406_v39 = vpop.f32.mrb[40].mxu1 }
 0x6b9   : > { %v6477_v40 = vadd.f32 %v10406_v39, %v13173_v21  ;;  %v6471_v56 = vpop.f32.mrb[41].mxu1 }
 0x6ba   : > { %v6472_v51 = vadd.f32 %v13173_v21, %v6471_v56 }
 0x6bb   : > { %8604 = vst.msk [vmem:[%s13180_s27 + $0x48] sm:$0xff] %vm333_vm1, %v6477_v40 }
 0x6bc   : > { %8603 = vst.msk [vmem:[%s13180_s27 + $0x40] sm:$0xff] %vm333_vm1, %v6472_v51 }
 0x6c8   : > { %v10425_v41 = vpop.f32.mrb[42].mxu1 }
 0x6c9   : > { %v6571_v42 = vadd.f32 %v10425_v41, %v13173_v21  ;;  %v6565_v4 = vpop.f32.mrb[43].mxu1 }
 0x6ca   : > { %v6566_v43 = vadd.f32 %v13173_v21, %v6565_v4 }
 0x6cb   : > { %8617 = vst.msk [vmem:[%s13180_s27 + $0x58] sm:$0xff] %vm333_vm1, %v6571_v42 }
 0x6cc   : > { %8616 = vst.msk [vmem:[%s13180_s27 + $0x50] sm:$0xff] %vm333_vm1, %v6566_v43 }
 0x6e8   : > { %v10460_v54 = vpop.f32.mrb[44].mxu1 }
 0x6e9   : > { %v6673_v45 = vadd.f32 %v10460_v54, %v12982_v24  ;;  %v6667_v13 = vpop.f32.mrb[45].mxu1 }
 0x6ea   : > { %v6668_v47 = vadd.f32 %v12982_v24, %v6667_v13 }
 0x6eb   : > { %v6677_v49 = vmax.f32 %v6673_v45, 0.0 }
 0x6ec   : > { %v6676_v14 = vmax.f32 %v6668_v47, 0.0 }
 0x6ee   : > { %10477 = vmatprep.mubr.msk.f32.mxu1 %vm4319_vm2, %v6676_v14 }
 0x6ef   : > { %10478 = vmatmul.mubr.msk.f32.vlgmr.msra.gmra.mrb[46].mxu1 %vm4319_vm2, %v6677_v49 }
 0x6f0   : > { %11050 = vmatpush3.bf16.msra.mxu1 %v12976_v18  ;;  %10496 = vmatprep.mubr.msk.f32.mxu1 %vm4319_vm2, %v6676_v14 }
 0x6f1   : > { %11052 = vmatprep.subr.bf16.mxu1 %v12994_v30 }
 0x6f4   : > { %11054 = vmatpush3.bf16.msra.mxu1 %v12994_v30 }
 0x6f5   : > { %11056 = vmatprep.subr.bf16.mxu1 %v13008_v9 }
 0x6f8   : > { %11058 = vmatpush3.bf16.msra.mxu1 %v13008_v9 }
 0x6f9   : > { %11060 = vmatprep.subr.bf16.mxu1 %v13018_v33 }
 0x6fc   : > { %11062 = vmatpush3.bf16.msra.mxu1 %v13018_v33 }
 0x6fd   : > { %11064 = vmatprep.subr.bf16.mxu1 %v13028_v35 }
 0x6ff   : > { %10497 = vmatmul.mubr.msk.f32.vlgmr.msra.gmra.mrb[48].mxu1 %vm4319_vm2, %v6677_v49 }
 0x700   : > { %11066 = vmatpush3.bf16.msra.mxu1 %v13028_v35  ;;  %10515 = vmatprep.mubr.msk.f32.mxu1 %vm4319_vm2, %v6676_v14 }
 0x701   : > { %11068 = vmatprep.subr.bf16.mxu1 %v13038_v38 }
 0x704   : > { %11070 = vmatpush3.bf16.msra.mxu1 %v13038_v38 }
 0x705   : > { %11072 = vmatprep.subr.bf16.mxu1 %v13051_v11 }
 0x708   : > { %11074 = vmatpush3.bf16.msra.mxu1 %v13051_v11 }
 0x709   : > { %11076 = vmatprep.subr.bf16.mxu1 %v13061_v12 }
 0x70c   : > { %11078 = vmatpush3.bf16.msra.mxu1 %v13061_v12 }
 0x70d   : > { %11080 = vmatprep.subr.bf16.mxu1 %v13071_v3 }
 0x70f   : > { %10516 = vmatmul.mubr.msk.f32.vlgmr.msra.gmra.mrb[50].mxu1 %vm4319_vm2, %v6677_v49 }
 0x710   : > { %11082 = vmatpush3.bf16.msra.mxu1 %v13071_v3  ;;  %10534 = vmatprep.mubr.msk.f32.mxu1 %vm4319_vm2, %v6676_v14 }
 0x711   : > { %11084 = vmatprep.subr.bf16.mxu1 %v13081_v44 }
 0x714   : > { %11086 = vmatpush3.bf16.msra.mxu1 %v13081_v44 }
 0x715   : > { %11088 = vmatprep.subr.bf16.mxu1 %v13094_v46 }
 0x718   : > { %11090 = vmatpush3.bf16.msra.mxu1 %v13094_v46 }
 0x719   : > { %11092 = vmatprep.subr.bf16.mxu1 %v13104_v48 }
 0x71c   : > { %11094 = vmatpush3.bf16.msra.mxu1 %v13104_v48 }
 0x71d   : > { %11096 = vmatprep.subr.bf16.mxu1 %v11095_v1 }
 0x71f   : > { %10535 = vmatmul.mubr.msk.f32.vlgmr.msra.gmra.mrb[52].mxu1 %vm4319_vm2, %v6677_v49 }
 0x720   : > { %11098 = vmatpush3.bf16.msra.mxu1 %v11095_v1  ;;  %10569 = vmatprep.mubr.f32.mxu1 %v12933_v5  ;;  %v8740_v1 = vld [vmem:[%s13503_s5 + $0x180] sm:$0xff] }
 0x721   : > { %11100 = vmatprep.subr.bf16.mxu1 %v11099_v55  ;;  %v11191_v53 = vpack.c.bf16 %v8741_v52, %v8740_v1 }
 0x724   : > { %11102 = vmatpush3.bf16.msra.mxu1 %v11099_v55  ;;  %v8742_v55 = vld [vmem:[%s13503_s5 + $0x190] sm:$0xff] }
 0x725   : > { %11104 = vmatprep.subr.bf16.mxu1 %v11103_v58  ;;  %v11195_v57 = vpack.c.bf16 %v8743_v15, %v8742_v55 }
 0x728   : > { %11106 = vmatpush3.bf16.msra.mxu1 %v11103_v58  ;;  %v8744_v58 = vld [vmem:[%s13503_s5 + $0x1a0] sm:$0xff] }
 0x729   : > { %11108 = vmatprep.subr.bf16.mxu1 %v11107_v17  ;;  %v11199_v62 = vpack.c.bf16 %v8745_v60, %v8744_v58 }
 0x72c   : > { %11110 = vmatpush3.bf16.msra.mxu1 %v11107_v17  ;;  %v8746_v17 = vld [vmem:[%s13503_s5 + $0x1b0] sm:$0xff] }
 0x72d   : > { %11112 = vmatprep.subr.bf16.mxu1 %v11111_v7  ;;  %v11203_v23 = vpack.c.bf16 %v8747_v19, %v8746_v17 }
 0x730   : > { %11114 = vmatpush3.bf16.msra.mxu1 %v11111_v7  ;;  %v8748_v7 = vld [vmem:[%s13503_s5 + $0x1c0] sm:$0xff] }
 0x731   : > { %11116 = vmatprep.subr.bf16.mxu1 %v11115_v22 }
 0x734   : > { %11118 = vmatpush3.bf16.msra.mxu1 %v11115_v22  ;;  %v8751_v22 = vld [vmem:[%s13503_s5 + $0x1d8] sm:$0xff] }
 0x735   : > { %11120 = vmatprep.subr.bf16.mxu1 %v11119_v28  ;;  %v11211_v8 = vpack.c.bf16 %v8751_v22, %v8750_v26 }
 0x738   : > { %11122 = vmatpush3.bf16.msra.mxu1 %v11119_v28  ;;  %v8753_v28 = vld [vmem:[%s13503_s5 + $0x1e8] sm:$0xff] }
 0x739   : > { %11124 = vmatprep.subr.bf16.mxu1 %v11123_v31  ;;  %v11215_v29 = vpack.c.bf16 %v8753_v28, %v8752_v27 }
 0x73c   : > { %11126 = vmatpush3.bf16.msra.mxu1 %v11123_v31  ;;  %v8755_v31 = vld [vmem:[%s13503_s5 + $0x1f8] sm:$0xff] }
 0x73d   : > { %11128 = vmatprep.subr.bf16.mxu1 %v12927_v16 }
 0x73f   : > { %10570 = vmatmul.mubr.f32.vlgmr.msra.gmra.mrb[54].mxu1 %v12944_v6 }
 0x740   : > { %11130 = vmatpush3.bf16.msra.mxu1 %v12927_v16 }
 0x741   : > { %11132 = vmatprep.subr.bf16.mxu1 %v12942_v61 }
 0x744   : > { %11134 = vmatpush3.bf16.msra.mxu1 %v12942_v61 }
 0x745   : > { %11136 = vmatprep.subr.bf16.mxu1 %v12955_v63 }
 0x748   : > { %11138 = vmatpush3.bf16.msra.mxu1 %v12955_v63 }
 0x749   : > { %11140 = vmatprep.subr.bf16.mxu1 %v12966_v20 }
 0x74c   : > { %11142 = vmatpush3.bf16.msra.mxu1 %v12966_v20 }
 0x74d   : > { %11144 = vmatprep.subr.bf16.mxu1 %v12976_v18 }
 0x7c2   : > { %v10479_v32 = vpop.f32.mrb[46].mxu1 }
 0x7c3   : > { %v6771_v2 = vadd.f32 %v10479_v32, %v13173_v21  ;;  %v6765_v34 = vpop.f32.mrb[47].mxu1  ;;  %v11219_v32 = vpack.c.bf16 %v8755_v31, %v8754_v0 }
 0x7c4   : > { %v6766_v10 = vadd.f32 %v13173_v21, %v6765_v34 }
 0x7c5   : > { %8639 = vst.msk [vmem:[%s13180_s27 + $0x28] sm:$0xff] %vm333_vm1, %v6771_v2 }
 0x7c6   : > { %8638 = vst.msk [vmem:[%s13180_s27 + $0x20] sm:$0xff] %vm333_vm1, %v6766_v10 }
 0x7d2   : > { %v10498_v36 = vpop.f32.mrb[48].mxu1 }
 0x7d3   : > { %v6864_v37 = vadd.f32 %v10498_v36, %v13173_v21  ;;  %v6858_v39 = vpop.f32.mrb[49].mxu1 }
 0x7d4   : > { %v6859_v40 = vadd.f32 %v13173_v21, %v6858_v39 }
 0x7d5   : > { %8652 = vst.msk [vmem:[%s13180_s27 + $0x38] sm:$0xff] %vm333_vm1, %v6864_v37 }
 0x7d6   : > { %8651 = vst.msk [vmem:[%s13180_s27 + $0x30] sm:$0xff] %vm333_vm1, %v6859_v40 }
 0x7e2   : > { %v10517_v56 = vpop.f32.mrb[50].mxu1 }
 0x7e3   : > { %v6957_v51 = vadd.f32 %v10517_v56, %v13173_v21  ;;  %v6951_v41 = vpop.f32.mrb[51].mxu1 }
 0x7e4   : > { %v6952_v42 = vadd.f32 %v13173_v21, %v6951_v41 }
 0x7e5   : > { %8665 = vst.msk [vmem:[%s13180_s27 + $0x68] sm:$0xff] %vm333_vm1, %v6957_v51 }
 0x7e6   : > { %8664 = vst.msk [vmem:[%s13180_s27 + $0x60] sm:$0xff] %vm333_vm1, %v6952_v42 }
 0x7f2   : > { %v10536_v4 = vpop.f32.mrb[52].mxu1 }
 0x7f3   : > { %v7050_v43 = vadd.f32 %v10536_v4, %v13173_v21  ;;  %v7044_v54 = vpop.f32.mrb[53].mxu1 }
 0x7f4   : > { %v7045_v45 = vadd.f32 %v13173_v21, %v7044_v54 }
 0x7f5   : > { %8678 = vst.msk [vmem:[%s13180_s27 + $0x78] sm:$0xff] %vm333_vm1, %v7050_v43 }
 0x7f6   : > { %8677 = vst.msk [vmem:[%s13180_s27 + $0x70] sm:$0xff] %vm333_vm1, %v7045_v45 }
 0x812   : > { %v10571_v13 = vpop.f32.mrb[54].mxu1 }
 0x813   : > { %v7152_v47 = vadd.f32 %v10571_v13, %v12982_v24  ;;  %v7146_v14 = vpop.f32.mrb[55].mxu1 }
 0x814   : > { %v7147_v49 = vadd.f32 %v12982_v24, %v7146_v14 }
 0x815   : > { %v7156_v50 = vmax.f32 %v7152_v47, 0.0 }
 0x816   : > { %v7155_v59 = vmax.f32 %v7147_v49, 0.0 }
 0x818   : > { %10588 = vmatprep.mubr.msk.f32.mxu1 %vm4319_vm2, %v7155_v59 }
 0x819   : > { %10589 = vmatmul.mubr.msk.f32.vlgmr.msra.gmra.mrb[56].mxu1 %vm4319_vm2, %v7156_v50 }
 0x81a   : > { %11146 = vmatpush3.bf16.msra.mxu1 %v12976_v18  ;;  %10607 = vmatprep.mubr.msk.f32.mxu1 %vm4319_vm2, %v7155_v59 }
 0x81b   : > { %11148 = vmatprep.subr.bf16.mxu1 %v12994_v30 }
 0x81e   : > { %11150 = vmatpush3.bf16.msra.mxu1 %v12994_v30 }
 0x81f   : > { %11152 = vmatprep.subr.bf16.mxu1 %v13008_v9 }
 0x822   : > { %11154 = vmatpush3.bf16.msra.mxu1 %v13008_v9 }
 0x823   : > { %11156 = vmatprep.subr.bf16.mxu1 %v13018_v33 }
 0x826   : > { %11158 = vmatpush3.bf16.msra.mxu1 %v13018_v33 }
 0x827   : > { %11160 = vmatprep.subr.bf16.mxu1 %v13028_v35 }
 0x829   : > { %10608 = vmatmul.mubr.msk.f32.vlgmr.msra.gmra.mrb[58].mxu1 %vm4319_vm2, %v7156_v50 }
 0x82a   : > { %11162 = vmatpush3.bf16.msra.mxu1 %v13028_v35  ;;  %10626 = vmatprep.mubr.msk.f32.mxu1 %vm4319_vm2, %v7155_v59 }
 0x82b   : > { %11164 = vmatprep.subr.bf16.mxu1 %v13038_v38 }
 0x82e   : > { %11166 = vmatpush3.bf16.msra.mxu1 %v13038_v38 }
 0x82f   : > { %11168 = vmatprep.subr.bf16.mxu1 %v13051_v11 }
 0x832   : > { %11170 = vmatpush3.bf16.msra.mxu1 %v13051_v11 }
 0x833   : > { %11172 = vmatprep.subr.bf16.mxu1 %v13061_v12 }
 0x836   : > { %11174 = vmatpush3.bf16.msra.mxu1 %v13061_v12 }
 0x837   : > { %11176 = vmatprep.subr.bf16.mxu1 %v13071_v3 }
 0x839   : > { %10627 = vmatmul.mubr.msk.f32.vlgmr.msra.gmra.mrb[60].mxu1 %vm4319_vm2, %v7156_v50 }
 0x83a   : > { %11178 = vmatpush3.bf16.msra.mxu1 %v13071_v3  ;;  %10645 = vmatprep.mubr.msk.f32.mxu1 %vm4319_vm2, %v7155_v59 }
 0x83b   : > { %11180 = vmatprep.subr.bf16.mxu1 %v13081_v44 }
 0x83e   : > { %11182 = vmatpush3.bf16.msra.mxu1 %v13081_v44 }
 0x83f   : > { %11184 = vmatprep.subr.bf16.mxu1 %v13094_v46 }
 0x842   : > { %11186 = vmatpush3.bf16.msra.mxu1 %v13094_v46 }
 0x843   : > { %11188 = vmatprep.subr.bf16.mxu1 %v13104_v48 }
 0x846   : > { %11190 = vmatpush3.bf16.msra.mxu1 %v13104_v48 }
 0x847   : > { %11192 = vmatprep.subr.bf16.mxu1 %v11191_v53 }
 0x849   : > { %10646 = vmatmul.mubr.msk.f32.vlgmr.msra.gmra.mrb[62].mxu1 %vm4319_vm2, %v7156_v50 }
 0x84a   : > { %11194 = vmatpush3.bf16.msra.mxu1 %v11191_v53  ;;  %10680 = vmatprep.mubr.f32.mxu1 %v12933_v5  ;;  %v8749_v5 = vld [vmem:[%s13503_s5 + $0x1c8] sm:$0xff] }
 0x84b   : > { %11196 = vmatprep.subr.bf16.mxu1 %v11195_v57  ;;  %v11207_v25 = vpack.c.bf16 %v8749_v5, %v8748_v7 }
 0x84e   : > { %11198 = vmatpush3.bf16.msra.mxu1 %v11195_v57 }
 0x84f   : > { %11200 = vmatprep.subr.bf16.mxu1 %v11199_v62 }
 0x852   : > { %11202 = vmatpush3.bf16.msra.mxu1 %v11199_v62 }
 0x853   : > { %11204 = vmatprep.subr.bf16.mxu1 %v11203_v23 }
 0x856   : > { %11206 = vmatpush3.bf16.msra.mxu1 %v11203_v23 }
 0x857   : > { %11208 = vmatprep.subr.bf16.mxu1 %v11207_v25 }
 0x85a   : > { %11210 = vmatpush3.bf16.msra.mxu1 %v11207_v25 }
 0x85b   : > { %11212 = vmatprep.subr.bf16.mxu1 %v11211_v8 }
 0x85e   : > { %11214 = vmatpush3.bf16.msra.mxu1 %v11211_v8 }
 0x85f   : > { %11216 = vmatprep.subr.bf16.mxu1 %v11215_v29 }
 0x862   : > { %11218 = vmatpush3.bf16.msra.mxu1 %v11215_v29 }
 0x863   : > { %11220 = vmatprep.subr.bf16.mxu1 %v11219_v32 }
 0x866   : > { %11222 = vmatpush3.bf16.msra.mxu1 %v11219_v32 }
 0x867   : > { %11224 = vmatprep.subr.bf16.mxu1 %v12927_v16 }
 0x869   : > { %10681 = vmatmul.mubr.f32.vlgmr.msra.gmra.mrb[64].mxu1 %v12944_v6 }
 0x86a   : > { %11226 = vmatpush3.bf16.msra.mxu1 %v12927_v16 }
 0x86b   : > { %11228 = vmatprep.subr.bf16.mxu1 %v12942_v61 }
 0x86e   : > { %11230 = vmatpush3.bf16.msra.mxu1 %v12942_v61 }
 0x86f   : > { %11232 = vmatprep.subr.bf16.mxu1 %v12955_v63 }
 0x872   : > { %11234 = vmatpush3.bf16.msra.mxu1 %v12955_v63 }
 0x873   : > { %11236 = vmatprep.subr.bf16.mxu1 %v12966_v20 }
 0x876   : > { %11238 = vmatpush3.bf16.msra.mxu1 %v12966_v20 }
 0x877   : > { %11240 = vmatprep.subr.bf16.mxu1 %v12976_v18 }
 0x8ec   : > { %v10590_v2 = vpop.f32.mrb[56].mxu1 }
 0x8ed   : > { %v7250_v16 = vadd.f32 %v10590_v2, %v13173_v21  ;;  %v7244_v6 = vpop.f32.mrb[57].mxu1 }
 0x8ee   : > { %v7245_v61 = vadd.f32 %v13173_v21, %v7244_v6 }
 0x8ef   : > { %8700 = vst.msk [vmem:[%s13180_s27 + $0x88] sm:$0xff] %vm333_vm1, %v7250_v16 }
 0x8f0   : > { %8699 = vst.msk [vmem:[%s13180_s27 + $0x80] sm:$0xff] %vm333_vm1, %v7245_v61 }
 0x8fc   : > { %v10609_v34 = vpop.f32.mrb[58].mxu1 }
 0x8fd   : > { %v7343_v63 = vadd.f32 %v10609_v34, %v13173_v21  ;;  %v7337_v20 = vpop.f32.mrb[59].mxu1 }
 0x8fe   : > { %v7338_v10 = vadd.f32 %v13173_v21, %v7337_v20 }
 0x8ff   : > { %8713 = vst.msk [vmem:[%s13180_s27 + $0x98] sm:$0xff] %vm333_vm1, %v7343_v63 }
 0x900   : > { %8712 = vst.msk [vmem:[%s13180_s27 + $0x90] sm:$0xff] %vm333_vm1, %v7338_v10 }
 0x90c   : > { %v10628_v36 = vpop.f32.mrb[60].mxu1 }
 0x90d   : > { %v7436_v37 = vadd.f32 %v10628_v36, %v13173_v21  ;;  %v7430_v39 = vpop.f32.mrb[61].mxu1 }
 0x90e   : > { %v7431_v40 = vadd.f32 %v13173_v21, %v7430_v39 }
 0x90f   : > { %8726 = vst.msk [vmem:[%s13180_s27 + $0xc8] sm:$0xff] %vm333_vm1, %v7436_v37 }
 0x910   : > { %8725 = vst.msk [vmem:[%s13180_s27 + $0xc0] sm:$0xff] %vm333_vm1, %v7431_v40 }
 0x91c   : > { %v10647_v56 = vpop.f32.mrb[62].mxu1 }
 0x91d   : > { %v7529_v51 = vadd.f32 %v10647_v56, %v13173_v21  ;;  %v7523_v41 = vpop.f32.mrb[63].mxu1 }
 0x91e   : > { %v7524_v42 = vadd.f32 %v13173_v21, %v7523_v41 }
 0x91f   : > { %8739 = vst.msk [vmem:[%s13180_s27 + $0xd8] sm:$0xff] %vm333_vm1, %v7529_v51 }
 0x920   : > { %8738 = vst.msk [vmem:[%s13180_s27 + $0xd0] sm:$0xff] %vm333_vm1, %v7524_v42 }
 0x93c   : > { %v10682_v4 = vpop.f32.mrb[64].mxu1 }
 0x93d   : > { %v7631_v43 = vadd.f32 %v10682_v4, %v12982_v24  ;;  %v7625_v54 = vpop.f32.mrb[65].mxu1 }
 0x93e   : > { %v7626_v45 = vadd.f32 %v12982_v24, %v7625_v54 }
 0x93f   : > { %v7635_v47 = vmax.f32 %v7631_v43, 0.0 }
 0x940   : > { %v7634_v13 = vmax.f32 %v7626_v45, 0.0 }
 0x942   : > { %10699 = vmatprep.mubr.msk.f32.mxu1 %vm4319_vm2, %v7634_v13 }
 0x943   : > { %10700 = vmatmul.mubr.msk.f32.vlgmr.msra.gmra.mrb[66].mxu1 %vm4319_vm2, %v7635_v47 }
 0x944   : > { %11242 = vmatpush3.bf16.msra.mxu1 %v12976_v18  ;;  %10718 = vmatprep.mubr.msk.f32.mxu1 %vm4319_vm2, %v7634_v13 }
 0x945   : > { %11244 = vmatprep.subr.bf16.mxu1 %v12994_v30 }
 0x948   : > { %11246 = vmatpush3.bf16.msra.mxu1 %v12994_v30 }
 0x949   : > { %11248 = vmatprep.subr.bf16.mxu1 %v13008_v9 }
 0x94c   : > { %11250 = vmatpush3.bf16.msra.mxu1 %v13008_v9 }
 0x94d   : > { %11252 = vmatprep.subr.bf16.mxu1 %v13018_v33 }
 0x950   : > { %11254 = vmatpush3.bf16.msra.mxu1 %v13018_v33 }
 0x951   : > { %11256 = vmatprep.subr.bf16.mxu1 %v13028_v35 }
 0x953   : > { %10719 = vmatmul.mubr.msk.f32.vlgmr.msra.gmra.mrb[68].mxu1 %vm4319_vm2, %v7635_v47 }
 0x954   : > { %11258 = vmatpush3.bf16.msra.mxu1 %v13028_v35  ;;  %10737 = vmatprep.mubr.msk.f32.mxu1 %vm4319_vm2, %v7634_v13 }
 0x955   : > { %11260 = vmatprep.subr.bf16.mxu1 %v13038_v38 }
 0x958   : > { %11262 = vmatpush3.bf16.msra.mxu1 %v13038_v38 }
 0x959   : > { %11264 = vmatprep.subr.bf16.mxu1 %v13051_v11 }
 0x95c   : > { %11266 = vmatpush3.bf16.msra.mxu1 %v13051_v11 }
 0x95d   : > { %11268 = vmatprep.subr.bf16.mxu1 %v13061_v12 }
 0x960   : > { %11270 = vmatpush3.bf16.msra.mxu1 %v13061_v12 }
 0x961   : > { %11272 = vmatprep.subr.bf16.mxu1 %v13071_v3 }
 0x963   : > { %10738 = vmatmul.mubr.msk.f32.vlgmr.msra.gmra.mrb[70].mxu1 %vm4319_vm2, %v7635_v47 }
 0x964   : > { %11274 = vmatpush3.bf16.msra.mxu1 %v13071_v3  ;;  %10756 = vmatprep.mubr.msk.f32.mxu1 %vm4319_vm2, %v7634_v13 }
 0x965   : > { %11276 = vmatprep.subr.bf16.mxu1 %v13081_v44 }
 0x968   : > { %11278 = vmatpush3.bf16.msra.mxu1 %v13081_v44 }
 0x969   : > { %11280 = vmatprep.subr.bf16.mxu1 %v13094_v46 }
 0x96c   : > { %11282 = vmatpush3.bf16.msra.mxu1 %v13094_v46 }
 0x96d   : > { %11284 = vmatprep.subr.bf16.mxu1 %v13104_v48 }
 0x970   : > { %11286 = vmatpush3.bf16.msra.mxu1 %v13104_v48 }
 0x973   : > { %10757 = vmatmul.mubr.msk.f32.vlgmr.msra.gmra.mrb[72].mxu1 %vm4319_vm2, %v7635_v47 }
 0xa16   : > { %v10701_v18 = vpop.f32.mrb[66].mxu1 }
 0xa17   : > { %v7729_v24 = vadd.f32 %v10701_v18, %v13173_v21  ;;  %v7723_v30 = vpop.f32.mrb[67].mxu1 }
 0xa18   : > { %v7724_v9 = vadd.f32 %v13173_v21, %v7723_v30 }
 0xa19   : > { %8761 = vst.msk [vmem:[%s13180_s27 + $0xa8] sm:$0xff] %vm333_vm1, %v7729_v24 }
 0xa1a   : > { %8760 = vst.msk [vmem:[%s13180_s27 + $0xa0] sm:$0xff] %vm333_vm1, %v7724_v9 }
 0xa26   : > { %v10720_v33 = vpop.f32.mrb[68].mxu1 }
 0xa27   : > { %v7822_v35 = vadd.f32 %v10720_v33, %v13173_v21  ;;  %v7816_v38 = vpop.f32.mrb[69].mxu1 }
 0xa28   : > { %v7817_v11 = vadd.f32 %v13173_v21, %v7816_v38 }
 0xa29   : > { %8774 = vst.msk [vmem:[%s13180_s27 + $0xb8] sm:$0xff] %vm333_vm1, %v7822_v35 }
 0xa2a   : > { %8773 = vst.msk [vmem:[%s13180_s27 + $0xb0] sm:$0xff] %vm333_vm1, %v7817_v11 }
 0xa36   : > { %v10739_v12 = vpop.f32.mrb[70].mxu1 }
 0xa37   : > { %v7915_v3 = vadd.f32 %v10739_v12, %v13173_v21  ;;  %v7909_v44 = vpop.f32.mrb[71].mxu1 }
 0xa38   : > { %v7910_v46 = vadd.f32 %v13173_v21, %v7909_v44 }
 0xa39   : > { %8787 = vst.msk [vmem:[%s13180_s27 + $0xe8] sm:$0xff] %vm333_vm1, %v7915_v3 }
 0xa3a   : > { %8786 = vst.msk [vmem:[%s13180_s27 + $0xe0] sm:$0xff] %vm333_vm1, %v7910_v46 }
 0xa46   : > { %v10758_v48 = vpop.f32.mrb[72].mxu1 }
 0xa47   : > { %v8008_v14 = vadd.f32 %v10758_v48, %v13173_v21  ;;  %v8002_v49 = vpop.f32.mrb[73].mxu1 }
 0xa48   : > { %v8003_v59 = vadd.f32 %v13173_v21, %v8002_v49 }
 0xa49   : > { %8800 = vst.msk [vmem:[%s13180_s27 + $0xf8] sm:$0xff] %vm333_vm1, %v8008_v14 }
 0xa4a   : > { %8799 = vst.msk [vmem:[%s13180_s27 + $0xf0] sm:$0xff] %vm333_vm1, %v8003_v59 }
 0xa4b PF: > { %s19_s30 = sadd.s32 1, %s11672_s30  }
 0xa4c   : > { %p16_p4 = scmp.ge.s32.totalorder %s19_s30, 4  }
 0xa4e   :  { %18 = sbr.rel (!%p16_p4) target bundleno = 1 (0x1), region = 169 }

</bundles_post_ra>
